<compile_context>
chip_gen: v6e
topology: v6e:2x2x1
jax: 0.10.0
libtpu: 0.0.40
codegen_flags: <defaults>
</compile_context>

<pallas_src>
import math
import numpy as np
import jax
import jax.numpy as jnp
from jax.experimental import pallas as pl
from jax.experimental.pallas import tpu as pltpu


# --------------------------------- kernel ------------------------------------

def transformer_layer_kernel(x_ref, *refs):
    (wqkv, bqkv,
     cq_w, cq_b, ck_w, ck_b,
     qp_w, qp_b, kp_w, kp_b,
     t_dwe, t_dwo, t_dbe, t_dbo, t_pw, t_pb,
     d_dwe, d_dwo, d_dbe, d_dbo, d_pw, d_pb,
     ow, ob, g1, b1, f1w, f1b, f2w, f2b, g2, b2) = refs[:-1]
    out_ref = refs[-1]

    f32 = jnp.float32
    bf16 = jnp.bfloat16

    x = x_ref[...]                                   # [L, D] f32
    L, D = x.shape
    H = t_pb.shape[0]
    dk = D // H
    scale = 1.0 / math.sqrt(dk)

    def mxu(a, b):                                   # bf16 x bf16 MXU matmul, f32 accumulate
        return jnp.dot(a, b, preferred_element_type=f32)

    def mxu_nt(a, b):                                # a @ b.T (contract last dims)
        return jax.lax.dot_general(a, b, (((1,), (1,)), ((), ())),
                                   preferred_element_type=f32)

    # zero-padded sequence shifts: slice+concat only (no MXU / shift-matrix work)
    def shift_prev(y):                               # out[l] = y[l-1], out[0] = 0
        zero = jnp.zeros((1, y.shape[1]), y.dtype)
        return jnp.concatenate([zero, y[:-1, :]], axis=0)

    def shift_next(y):                               # out[l] = y[l+1], out[L-1] = 0
        zero = jnp.zeros((1, y.shape[1]), y.dtype)
        return jnp.concatenate([y[1:, :], zero], axis=0)

    def gelu(z):                                     # tanh-form GELU (EUP tanh)
        c = math.sqrt(2.0 / math.pi)
        return 0.5 * z * (1.0 + jnp.tanh(c * (z + 0.044715 * (z * z * z))))

    xb = x.astype(bf16)                              # hoisted cast, reused below

    # ---------------------------- fused QKV projection ----------------------------
    qkv = mxu(xb, wqkv[...]) + bqkv[...]             # [L, 3D] f32, one wide MXU pass
    raw_qb = qkv[:, 0:D].astype(bf16)
    raw_kb = qkv[:, D:2 * D].astype(bf16)
    vb = qkv[:, 2 * D:3 * D].astype(bf16)

    def conv3(yb, w_ref, b_ref):
        # Conv1d(D, D, k=3, padding=1) as three accumulated K=D matmuls (no [L,3D] concat)
        return (mxu(shift_prev(yb), w_ref[0]) + mxu(yb, w_ref[1])
                + mxu(shift_next(yb), w_ref[2]) + b_ref[...])

    def proj2(a_b, b_b, w_ref, bias_ref):
        # Linear(2D -> D) over concat([a, b]) as two accumulated K=D matmuls (no [L,2D] concat)
        return mxu(a_b, w_ref[0]) + mxu(b_b, w_ref[1]) + bias_ref[...]

    q3b = conv3(raw_qb, cq_w, cq_b).astype(bf16)
    k3b = conv3(raw_kb, ck_w, ck_b).astype(bf16)
    qp = proj2(raw_qb, q3b, qp_w, qp_b)              # [L, D] f32
    kp = proj2(raw_kb, k3b, kp_w, kp_b)              # [L, D] f32

    # --------------------------- modulation nets (tau/delta) ----------------------
    x_prev = shift_prev(x)
    x_next = shift_next(x)

    def mod_streams(dwe_r, dwo_r, dbe_r, dbo_r):
        # Depthwise Conv1d(D, 2D, k=3, groups=D): pure VPU per-tap FMAs (f32).
        dwe = dwe_r[...]                             # [3, 1, D]
        dwo = dwo_r[...]
        e = x_prev * dwe[0] + x * dwe[1] + x_next * dwe[2] + dbe_r[...]
        o = x_prev * dwo[0] + x * dwo[1] + x_next * dwo[2] + dbo_r[...]
        return jnp.concatenate([gelu(e), gelu(o)], axis=-1).astype(bf16)   # [L, 2D] bf16

    # Both gates produced directly in [H, L] (head-major) via the transposed matmul.
    tauT = jax.nn.sigmoid(
        mxu_nt(t_pw[...], mod_streams(t_dwe, t_dwo, t_dbe, t_dbo)) + t_pb[...])   # [H, L]
    deltaT = jax.nn.sigmoid(
        mxu_nt(d_pw[...], mod_streams(d_dwe, d_dwo, d_dbe, d_dbo)) + d_pb[...])   # [H, L]

    # ------------------------------ head-batched attention ------------------------
    # tau and 1/sqrt(dk) folded into q before the score matmul (per-query-per-head factor).
    q_hm = (qp.reshape(L, H, dk).transpose(1, 0, 2) * (tauT * scale)[:, :, None]).astype(bf16)
    k_hm = kp.astype(bf16).reshape(L, H, dk).transpose(1, 0, 2)          # [H, L, dk]
    v_hm = vb.reshape(L, H, dk).transpose(1, 0, 2)                       # [H, L, dk]

    s = jnp.einsum('hqd,hkd->hqk', q_hm, k_hm, preferred_element_type=f32)   # [H, Lq, Lk]
    s = s + deltaT[:, None, :]                                                # per-key bias
    s = s - jnp.max(s, axis=-1, keepdims=True)
    es = jnp.exp(s)                                                           # f32
    rowsum = jnp.sum(es, axis=-1, keepdims=True)                              # f32
    o = jnp.einsum('hqk,hkd->hqd', es.astype(bf16), v_hm, preferred_element_type=f32)
    o = o * pl.reciprocal(rowsum, approx=True)        # deferred softmax normalization

    # concat heads -> out_proj: one wide K=D matmul
    attn_out = mxu(o.transpose(1, 0, 2).reshape(L, D).astype(bf16), ow[...]) + ob[...]

    def layer_norm(y, g_r, b_r):
        mu = jnp.mean(y, axis=-1, keepdims=True)
        cen = y - mu
        var = jnp.mean(cen * cen, axis=-1, keepdims=True)
        return cen * jax.lax.rsqrt(var + 1e-5) * g_r[...] + b_r[...]

    # residual + norm1 (dropout = identity in eval mode)
    y1 = layer_norm(x + attn_out, g1, b1)
    y1b = y1.astype(bf16)                            # hoisted cast for both FFN matmuls

    # ---------------------------------- FFN (F-tiled) -----------------------------
    F = f1b.shape[-1]
    TF = 512 if F % 512 == 0 else F                  # N-tiles; keeps the [L,TF] hidden small
    ffn_acc = jnp.zeros((L, D), f32)
    for t in range(F // TF):
        sl = slice(t * TF, (t + 1) * TF)
        hdn = gelu(mxu(y1b, f1w[:, sl]) + f1b[:, sl])
        ffn_acc = ffn_acc + mxu(hdn.astype(bf16), f2w[sl, :])
    ffn_out = ffn_acc + f2b[...]

    out_ref[...] = layer_norm(y1 + ffn_out, g2, b2)


# ------------------------------ wrapper / glue --------------------------------

def transformer_layer_forward(x, flat_params):
    B, L, D = x.shape
    in_specs = [pl.BlockSpec((None, L, D), lambda b: (b, 0, 0))]
    for w in flat_params:
        in_specs.append(pl.BlockSpec(w.shape, (lambda b, _n=w.ndim: (0,) * _n)))
    out_spec = pl.BlockSpec((None, L, D), lambda b: (b, 0, 0))
    return pl.pallas_call(
        transformer_layer_kernel,
        out_shape=jax.ShapeDtypeStruct((B, L, D), jnp.float32),
        grid_spec=pltpu.PrefetchScalarGridSpec(
            num_scalar_prefetch=0,
            grid=(B,),
            in_specs=in_specs,
            out_specs=out_spec,
        ),
        compiler_params=pltpu.CompilerParams(
            dimension_semantics=("parallel",),
            vmem_limit_bytes=32 * 1024 * 1024,
        ),
    )(x, *flat_params)


# ----------------------- deterministic parameter setup ------------------------
# Parameters are stored in PyTorch layouts (nn.Linear: [out, in]; Conv1d: [out, in, k])
# and then re-packed into kernel-friendly layouts (matmul weights as bf16).

def init_params(key, D, H, F):
    ks = iter(jax.random.split(key, 40))

    def w(shape, scale=0.15):
        return jax.random.normal(next(ks), shape, dtype=jnp.float32) * scale

    return dict(
        wq_w=w((D, D)), wq_b=w((D,)),
        wk_w=w((D, D)), wk_b=w((D,)),
        wv_w=w((D, D)), wv_b=w((D,)),
        cq_w=w((D, D, 3)), cq_b=w((D,)),
        ck_w=w((D, D, 3)), ck_b=w((D,)),
        qp_w=w((D, 2 * D)), qp_b=w((D,)),
        kp_w=w((D, 2 * D)), kp_b=w((D,)),
        t_dw=w((2 * D, 1, 3)), t_db=w((2 * D,)),
        t_pw=w((H, 2 * D, 1)), t_pb=w((H,)),
        d_dw=w((2 * D, 1, 3)), d_db=w((2 * D,)),
        d_pw=w((H, 2 * D, 1)), d_pb=w((H,)),
        ow=w((D, D)), ob=w((D,)),
        ln1_g=jnp.ones((D,), jnp.float32), ln1_b=jnp.zeros((D,), jnp.float32),
        f1_w=w((F, D)), f1_b=w((F,)),
        f2_w=w((D, F)), f2_b=w((D,)),
        ln2_g=jnp.ones((D,), jnp.float32), ln2_b=jnp.zeros((D,), jnp.float32),
    )


def prep_kernel_params(p, D, H):
    bf16 = jnp.bfloat16
    f32 = jnp.float32

    def row(b):
        return b.reshape(1, -1).astype(f32)

    def col(b):
        return b.reshape(-1, 1).astype(f32)

    def lin_t(wm):                       # nn.Linear weight [out, in] -> [in, out], bf16
        return jnp.transpose(wm).astype(bf16)

    def conv_taps(wc):                   # Conv1d [out, in, 3] -> [3, in, out] (tap-major), bf16
        return jnp.stack([jnp.transpose(wc[:, :, k]) for k in range(3)], axis=0).astype(bf16)

    def split2(wm):                      # nn.Linear [out, 2D] -> [2, D, out] (input-chunk major), bf16
        wt = jnp.transpose(wm)           # [2D, out]
        return jnp.stack([wt[:D], wt[D:]], axis=0).astype(bf16)

    def dw_split(wdw):                   # depthwise [2D,1,3] -> even/odd taps [3,1,D] (f32, VPU path)
        wflat = wdw[:, 0, :]             # [2D, 3]
        we = jnp.transpose(wflat[0::2, :]).reshape(3, 1, D).astype(f32)
        wo = jnp.transpose(wflat[1::2, :]).reshape(3, 1, D).astype(f32)
        return we, wo

    def pw_rows(wpw):                    # pointwise [H,2D,1] -> [H, 2D], cols ordered [even | odd]
        wflat = wpw[:, :, 0]             # [H, 2D] interleaved channels
        return jnp.concatenate([wflat[:, 0::2], wflat[:, 1::2]], axis=1).astype(bf16)

    t_dwe, t_dwo = dw_split(p['t_dw'])
    d_dwe, d_dwo = dw_split(p['d_dw'])

    # fused QKV: [D, 3D] weight, [1, 3D] bias
    wqkv = jnp.concatenate([lin_t(p['wq_w']), lin_t(p['wk_w']), lin_t(p['wv_w'])], axis=1)
    bqkv = jnp.concatenate([p['wq_b'], p['wk_b'], p['wv_b']]).reshape(1, -1).astype(f32)

    return [
        wqkv, bqkv,
        conv_taps(p['cq_w']), row(p['cq_b']),
        conv_taps(p['ck_w']), row(p['ck_b']),
        split2(p['qp_w']), row(p['qp_b']),
        split2(p['kp_w']), row(p['kp_b']),
        t_dwe, t_dwo, row(p['t_db'][0::2]), row(p['t_db'][1::2]),
        pw_rows(p['t_pw']), col(p['t_pb']),
        d_dwe, d_dwo, row(p['d_db'][0::2]), row(p['d_db'][1::2]),
        pw_rows(p['d_pw']), col(p['d_pb']),
        lin_t(p['ow']), row(p['ob']),
        row(p['ln1_g']), row(p['ln1_b']),
        lin_t(p['f1_w']), row(p['f1_b']),
        lin_t(p['f2_w']), row(p['f2_b']),
        row(p['ln2_g']), row(p['ln2_b']),
    ]


# --------------------------- pure-JAX reference -------------------------------

def reference_forward(x, p, H):
    B, L, D = x.shape
    dk = D // H
    prec = jax.lax.Precision.HIGHEST
    gelu = lambda z: jax.nn.gelu(z, approximate=False)

    def lin(y, wm, b):
        return jnp.einsum('blc,oc->blo', y, wm, precision=prec) + b

    def conv3(y, wc, b):
        yp = jnp.pad(y, ((0, 0), (1, 1), (0, 0)))
        out = sum(jnp.einsum('blc,oc->blo', yp[:, k:k + L, :], wc[:, :, k], precision=prec)
                  for k in range(3))
        return out + b

    def mod_net(wdw, bdw, wpw, bpw):
        yp = jnp.pad(x, ((0, 0), (1, 1), (0, 0)))
        taps = jnp.stack([yp[:, k:k + L, :] for k in range(3)], axis=-1)   # [B,L,D,3]
        wg = wdw[:, 0, :].reshape(D, 2, 3)
        dw = jnp.einsum('bldk,djk->bldj', taps, wg, precision=prec) + bdw.reshape(D, 2)
        dw = dw.reshape(B, L, 2 * D)
        pre = jnp.einsum('blc,hc->blh', gelu(dw), wpw[:, :, 0], precision=prec) + bpw
        return jax.nn.sigmoid(pre)                                         # [B,L,H]

    raw_q = lin(x, p['wq_w'], p['wq_b'])
    q3 = conv3(raw_q, p['cq_w'], p['cq_b'])
    q = lin(jnp.concatenate([raw_q, q3], -1), p['qp_w'], p['qp_b'])
    q = q.reshape(B, L, H, dk).transpose(0, 2, 1, 3)

    raw_k = lin(x, p['wk_w'], p['wk_b'])
    k3 = conv3(raw_k, p['ck_w'], p['ck_b'])
    k = lin(jnp.concatenate([raw_k, k3], -1), p['kp_w'], p['kp_b'])
    k = k.reshape(B, L, H, dk).transpose(0, 2, 1, 3)

    v = lin(x, p['wv_w'], p['wv_b']).reshape(B, L, H, dk).transpose(0, 2, 1, 3)

    tau = mod_net(p['t_dw'], p['t_db'], p['t_pw'], p['t_pb']).transpose(0, 2, 1)    # [B,H,L]
    delta = mod_net(p['d_dw'], p['d_db'], p['d_pw'], p['d_pb']).transpose(0, 2, 1)

    scores = jnp.einsum('bhld,bhmd->bhlm', q, k, precision=prec) / math.sqrt(dk)
    scores = scores * tau[..., None] + delta[:, :, None, :]
    attn = jax.nn.softmax(scores, axis=-1)
    out = jnp.einsum('bhlm,bhmd->bhld', attn, v, precision=prec)
    out = out.transpose(0, 2, 1, 3).reshape(B, L, D)
    attn_out = lin(out, p['ow'], p['ob'])

    def layer_norm(y, g, b):
        mu = jnp.mean(y, -1, keepdims=True)
        var = jnp.mean((y - mu) ** 2, -1, keepdims=True)
        return (y - mu) / jnp.sqrt(var + 1e-5) * g + b

    y1 = layer_norm(x + attn_out, p['ln1_g'], p['ln1_b'])
    ffn = lin(gelu(lin(y1, p['f1_w'], p['f1_b'])), p['f2_w'], p['f2_b'])
    return layer_norm(y1 + ffn, p['ln2_g'], p['ln2_b'])


# ----------------------------------- main -------------------------------------

if __name__ == "__main__":
    B, L, D, H, F = 2, 8, 32, 8, 64   # batch, seq, d_model, n_heads, d_ff (small test sizes)
    key = jax.random.PRNGKey(0)
    kx, kparams = jax.random.split(key)
    x = jax.random.normal(kx, (B, L, D), dtype=jnp.float32)

    params = init_params(kparams, D, H, F)
    flat = prep_kernel_params(params, D, H)

    out = jax.block_until_ready(transformer_layer_forward(x, flat))
    ref = jax.block_until_ready(reference_forward(x, params, H))

    assert out.shape == (B, L, D)
    assert bool(jnp.all(jnp.isfinite(out)))
    np.testing.assert_allclose(np.asarray(out), np.asarray(ref), rtol=5e-2, atol=5e-2)
    print("KERNEL_OK")
</pallas_src>

<mosaic_0001>
module attributes {stable_mosaic.version = 11 : i64} {
  func.func @transformer_layer_kernel(%arg0: i32, %arg1: memref<1x8x32xf32, #tpu.memory_space<vmem>>, %arg2: memref<32x96xbf16, #tpu.memory_space<vmem>>, %arg3: memref<1x96xf32, #tpu.memory_space<vmem>>, %arg4: memref<3x32x32xbf16, #tpu.memory_space<vmem>>, %arg5: memref<1x32xf32, #tpu.memory_space<vmem>>, %arg6: memref<3x32x32xbf16, #tpu.memory_space<vmem>>, %arg7: memref<1x32xf32, #tpu.memory_space<vmem>>, %arg8: memref<2x32x32xbf16, #tpu.memory_space<vmem>>, %arg9: memref<1x32xf32, #tpu.memory_space<vmem>>, %arg10: memref<2x32x32xbf16, #tpu.memory_space<vmem>>, %arg11: memref<1x32xf32, #tpu.memory_space<vmem>>, %arg12: memref<3x1x32xf32, #tpu.memory_space<vmem>>, %arg13: memref<3x1x32xf32, #tpu.memory_space<vmem>>, %arg14: memref<1x32xf32, #tpu.memory_space<vmem>>, %arg15: memref<1x32xf32, #tpu.memory_space<vmem>>, %arg16: memref<8x64xbf16, #tpu.memory_space<vmem>>, %arg17: memref<8x1xf32, #tpu.memory_space<vmem>>, %arg18: memref<3x1x32xf32, #tpu.memory_space<vmem>>, %arg19: memref<3x1x32xf32, #tpu.memory_space<vmem>>, %arg20: memref<1x32xf32, #tpu.memory_space<vmem>>, %arg21: memref<1x32xf32, #tpu.memory_space<vmem>>, %arg22: memref<8x64xbf16, #tpu.memory_space<vmem>>, %arg23: memref<8x1xf32, #tpu.memory_space<vmem>>, %arg24: memref<32x32xbf16, #tpu.memory_space<vmem>>, %arg25: memref<1x32xf32, #tpu.memory_space<vmem>>, %arg26: memref<1x32xf32, #tpu.memory_space<vmem>>, %arg27: memref<1x32xf32, #tpu.memory_space<vmem>>, %arg28: memref<32x64xbf16, #tpu.memory_space<vmem>>, %arg29: memref<1x64xf32, #tpu.memory_space<vmem>>, %arg30: memref<64x32xbf16, #tpu.memory_space<vmem>>, %arg31: memref<1x32xf32, #tpu.memory_space<vmem>>, %arg32: memref<1x32xf32, #tpu.memory_space<vmem>>, %arg33: memref<1x32xf32, #tpu.memory_space<vmem>>, %arg34: memref<1x8x32xf32, #tpu.memory_space<vmem>>) attributes {dimension_semantics = [#tpu.dimension_semantics<parallel>], iteration_bounds = array<i64: 2>, scalar_prefetch = 0 : i64, scratch_operands = 0 : i64, tpu.core_type = #tpu.core_type<tc>, window_params = [{transform_indices = @transform_0, window_bounds = array<i64: 1, 8, 32>}, {pipeline_mode = #tpu.pipeline_mode<synchronous>, transform_indices = @transform_1, window_bounds = array<i64: 32, 96>}, {pipeline_mode = #tpu.pipeline_mode<synchronous>, transform_indices = @transform_2, window_bounds = array<i64: 1, 96>}, {pipeline_mode = #tpu.pipeline_mode<synchronous>, transform_indices = @transform_3, window_bounds = array<i64: 3, 32, 32>}, {pipeline_mode = #tpu.pipeline_mode<synchronous>, transform_indices = @transform_4, window_bounds = array<i64: 1, 32>}, {pipeline_mode = #tpu.pipeline_mode<synchronous>, transform_indices = @transform_5, window_bounds = array<i64: 3, 32, 32>}, {pipeline_mode = #tpu.pipeline_mode<synchronous>, transform_indices = @transform_6, window_bounds = array<i64: 1, 32>}, {pipeline_mode = #tpu.pipeline_mode<synchronous>, transform_indices = @transform_7, window_bounds = array<i64: 2, 32, 32>}, {pipeline_mode = #tpu.pipeline_mode<synchronous>, transform_indices = @transform_8, window_bounds = array<i64: 1, 32>}, {pipeline_mode = #tpu.pipeline_mode<synchronous>, transform_indices = @transform_9, window_bounds = array<i64: 2, 32, 32>}, {pipeline_mode = #tpu.pipeline_mode<synchronous>, transform_indices = @transform_10, window_bounds = array<i64: 1, 32>}, {pipeline_mode = #tpu.pipeline_mode<synchronous>, transform_indices = @transform_11, window_bounds = array<i64: 3, 1, 32>}, {pipeline_mode = #tpu.pipeline_mode<synchronous>, transform_indices = @transform_12, window_bounds = array<i64: 3, 1, 32>}, {pipeline_mode = #tpu.pipeline_mode<synchronous>, transform_indices = @transform_13, window_bounds = array<i64: 1, 32>}, {pipeline_mode = #tpu.pipeline_mode<synchronous>, transform_indices = @transform_14, window_bounds = array<i64: 1, 32>}, {pipeline_mode = #tpu.pipeline_mode<synchronous>, transform_indices = @transform_15, window_bounds = array<i64: 8, 64>}, {pipeline_mode = #tpu.pipeline_mode<synchronous>, transform_indices = @transform_16, window_bounds = array<i64: 8, 1>}, {pipeline_mode = #tpu.pipeline_mode<synchronous>, transform_indices = @transform_17, window_bounds = array<i64: 3, 1, 32>}, {pipeline_mode = #tpu.pipeline_mode<synchronous>, transform_indices = @transform_18, window_bounds = array<i64: 3, 1, 32>}, {pipeline_mode = #tpu.pipeline_mode<synchronous>, transform_indices = @transform_19, window_bounds = array<i64: 1, 32>}, {pipeline_mode = #tpu.pipeline_mode<synchronous>, transform_indices = @transform_20, window_bounds = array<i64: 1, 32>}, {pipeline_mode = #tpu.pipeline_mode<synchronous>, transform_indices = @transform_21, window_bounds = array<i64: 8, 64>}, {pipeline_mode = #tpu.pipeline_mode<synchronous>, transform_indices = @transform_22, window_bounds = array<i64: 8, 1>}, {pipeline_mode = #tpu.pipeline_mode<synchronous>, transform_indices = @transform_23, window_bounds = array<i64: 32, 32>}, {pipeline_mode = #tpu.pipeline_mode<synchronous>, transform_indices = @transform_24, window_bounds = array<i64: 1, 32>}, {pipeline_mode = #tpu.pipeline_mode<synchronous>, transform_indices = @transform_25, window_bounds = array<i64: 1, 32>}, {pipeline_mode = #tpu.pipeline_mode<synchronous>, transform_indices = @transform_26, window_bounds = array<i64: 1, 32>}, {pipeline_mode = #tpu.pipeline_mode<synchronous>, transform_indices = @transform_27, window_bounds = array<i64: 32, 64>}, {pipeline_mode = #tpu.pipeline_mode<synchronous>, transform_indices = @transform_28, window_bounds = array<i64: 1, 64>}, {pipeline_mode = #tpu.pipeline_mode<synchronous>, transform_indices = @transform_29, window_bounds = array<i64: 64, 32>}, {pipeline_mode = #tpu.pipeline_mode<synchronous>, transform_indices = @transform_30, window_bounds = array<i64: 1, 32>}, {pipeline_mode = #tpu.pipeline_mode<synchronous>, transform_indices = @transform_31, window_bounds = array<i64: 1, 32>}, {pipeline_mode = #tpu.pipeline_mode<synchronous>, transform_indices = @transform_32, window_bounds = array<i64: 1, 32>}, {transform_indices = @transform_33, window_bounds = array<i64: 1, 8, 32>}]} {
    %c0 = arith.constant 0 : index
    %c0_0 = arith.constant 0 : index
    %c0_1 = arith.constant 0 : index
    %0 = vector.load %arg1[%c0, %c0_0, %c0_1] : memref<1x8x32xf32, #tpu.memory_space<vmem>>, vector<1x8x32xf32>
    %1 = vector.shape_cast %0 : vector<1x8x32xf32> to vector<8x32xf32>
    %2 = arith.truncf %1 : vector<8x32xf32> to vector<8x32xbf16>
    %c0_2 = arith.constant 0 : index
    %c0_3 = arith.constant 0 : index
    %3 = vector.load %arg2[%c0_2, %c0_3] : memref<32x96xbf16, #tpu.memory_space<vmem>>, vector<32x96xbf16>
    %cst = arith.constant dense<0.000000e+00> : vector<8x96xf32>
    %4 = tpu.matmul %2, %3, %cst {dimension_numbers = #tpu.dot_dimension_numbers<[1], [0], [0], [1], [0, 0, 1, 1], [], []>} : vector<8x32xbf16>, vector<32x96xbf16>, vector<8x96xf32> -> vector<8x96xf32>
    %c0_4 = arith.constant 0 : index
    %c0_5 = arith.constant 0 : index
    %5 = vector.load %arg3[%c0_4, %c0_5] : memref<1x96xf32, #tpu.memory_space<vmem>>, vector<1x96xf32>
    %6 = vector.broadcast %5 : vector<1x96xf32> to vector<8x96xf32>
    %7 = arith.addf %4, %6 : vector<8x96xf32>
    %8 = vector.extract_strided_slice %7 {offsets = [0, 0], sizes = [8, 32], strides = [1, 1]} : vector<8x96xf32> to vector<8x32xf32>
    %9 = arith.truncf %8 : vector<8x32xf32> to vector<8x32xbf16>
    %10 = vector.extract_strided_slice %7 {offsets = [0, 32], sizes = [8, 32], strides = [1, 1]} : vector<8x96xf32> to vector<8x32xf32>
    %11 = arith.truncf %10 : vector<8x32xf32> to vector<8x32xbf16>
    %12 = vector.extract_strided_slice %7 {offsets = [0, 64], sizes = [8, 32], strides = [1, 1]} : vector<8x96xf32> to vector<8x32xf32>
    %13 = arith.truncf %12 : vector<8x32xf32> to vector<8x32xbf16>
    %cst_6 = arith.constant 0.000000e+00 : bf16
    %14 = vector.broadcast %cst_6 : bf16 to vector<1x32xbf16>
    %15 = vector.extract_strided_slice %9 {offsets = [0, 0], sizes = [7, 32], strides = [1, 1]} : vector<8x32xbf16> to vector<7x32xbf16>
    %16 = tpu.concatenate %14, %15 in 0 : vector<1x32xbf16>, vector<7x32xbf16> -> vector<8x32xbf16>
    %c0_7 = arith.constant 0 : index
    %c0_8 = arith.constant 0 : index
    %c0_9 = arith.constant 0 : index
    %17 = vector.load %arg4[%c0_7, %c0_8, %c0_9] : memref<3x32x32xbf16, #tpu.memory_space<vmem>>, vector<1x32x32xbf16>
    %18 = vector.shape_cast %17 : vector<1x32x32xbf16> to vector<32x32xbf16>
    %cst_10 = arith.constant dense<0.000000e+00> : vector<8x32xf32>
    %19 = tpu.matmul %16, %18, %cst_10 {dimension_numbers = #tpu.dot_dimension_numbers<[1], [0], [0], [1], [0, 0, 1, 1], [], []>} : vector<8x32xbf16>, vector<32x32xbf16>, vector<8x32xf32> -> vector<8x32xf32>
    %c1 = arith.constant 1 : index
    %c0_11 = arith.constant 0 : index
    %c0_12 = arith.constant 0 : index
    %20 = vector.load %arg4[%c1, %c0_11, %c0_12] : memref<3x32x32xbf16, #tpu.memory_space<vmem>>, vector<1x32x32xbf16>
    %21 = vector.shape_cast %20 : vector<1x32x32xbf16> to vector<32x32xbf16>
    %cst_13 = arith.constant dense<0.000000e+00> : vector<8x32xf32>
    %22 = tpu.matmul %9, %21, %cst_13 {dimension_numbers = #tpu.dot_dimension_numbers<[1], [0], [0], [1], [0, 0, 1, 1], [], []>} : vector<8x32xbf16>, vector<32x32xbf16>, vector<8x32xf32> -> vector<8x32xf32>
    %23 = arith.addf %19, %22 : vector<8x32xf32>
    %cst_14 = arith.constant 0.000000e+00 : bf16
    %24 = vector.broadcast %cst_14 : bf16 to vector<1x32xbf16>
    %25 = vector.extract_strided_slice %9 {offsets = [1, 0], sizes = [7, 32], strides = [1, 1]} : vector<8x32xbf16> to vector<7x32xbf16>
    %26 = tpu.concatenate %25, %24 in 0 : vector<7x32xbf16>, vector<1x32xbf16> -> vector<8x32xbf16>
    %c2 = arith.constant 2 : index
    %c0_15 = arith.constant 0 : index
    %c0_16 = arith.constant 0 : index
    %27 = vector.load %arg4[%c2, %c0_15, %c0_16] : memref<3x32x32xbf16, #tpu.memory_space<vmem>>, vector<1x32x32xbf16>
    %28 = vector.shape_cast %27 : vector<1x32x32xbf16> to vector<32x32xbf16>
    %cst_17 = arith.constant dense<0.000000e+00> : vector<8x32xf32>
    %29 = tpu.matmul %26, %28, %cst_17 {dimension_numbers = #tpu.dot_dimension_numbers<[1], [0], [0], [1], [0, 0, 1, 1], [], []>} : vector<8x32xbf16>, vector<32x32xbf16>, vector<8x32xf32> -> vector<8x32xf32>
    %30 = arith.addf %23, %29 : vector<8x32xf32>
    %c0_18 = arith.constant 0 : index
    %c0_19 = arith.constant 0 : index
    %31 = vector.load %arg5[%c0_18, %c0_19] : memref<1x32xf32, #tpu.memory_space<vmem>>, vector<1x32xf32>
    %32 = vector.broadcast %31 : vector<1x32xf32> to vector<8x32xf32>
    %33 = arith.addf %30, %32 : vector<8x32xf32>
    %34 = arith.truncf %33 : vector<8x32xf32> to vector<8x32xbf16>
    %cst_20 = arith.constant 0.000000e+00 : bf16
    %35 = vector.broadcast %cst_20 : bf16 to vector<1x32xbf16>
    %36 = vector.extract_strided_slice %11 {offsets = [0, 0], sizes = [7, 32], strides = [1, 1]} : vector<8x32xbf16> to vector<7x32xbf16>
    %37 = tpu.concatenate %35, %36 in 0 : vector<1x32xbf16>, vector<7x32xbf16> -> vector<8x32xbf16>
    %c0_21 = arith.constant 0 : index
    %c0_22 = arith.constant 0 : index
    %c0_23 = arith.constant 0 : index
    %38 = vector.load %arg6[%c0_21, %c0_22, %c0_23] : memref<3x32x32xbf16, #tpu.memory_space<vmem>>, vector<1x32x32xbf16>
    %39 = vector.shape_cast %38 : vector<1x32x32xbf16> to vector<32x32xbf16>
    %cst_24 = arith.constant dense<0.000000e+00> : vector<8x32xf32>
    %40 = tpu.matmul %37, %39, %cst_24 {dimension_numbers = #tpu.dot_dimension_numbers<[1], [0], [0], [1], [0, 0, 1, 1], [], []>} : vector<8x32xbf16>, vector<32x32xbf16>, vector<8x32xf32> -> vector<8x32xf32>
    %c1_25 = arith.constant 1 : index
    %c0_26 = arith.constant 0 : index
    %c0_27 = arith.constant 0 : index
    %41 = vector.load %arg6[%c1_25, %c0_26, %c0_27] : memref<3x32x32xbf16, #tpu.memory_space<vmem>>, vector<1x32x32xbf16>
    %42 = vector.shape_cast %41 : vector<1x32x32xbf16> to vector<32x32xbf16>
    %cst_28 = arith.constant dense<0.000000e+00> : vector<8x32xf32>
    %43 = tpu.matmul %11, %42, %cst_28 {dimension_numbers = #tpu.dot_dimension_numbers<[1], [0], [0], [1], [0, 0, 1, 1], [], []>} : vector<8x32xbf16>, vector<32x32xbf16>, vector<8x32xf32> -> vector<8x32xf32>
    %44 = arith.addf %40, %43 : vector<8x32xf32>
    %cst_29 = arith.constant 0.000000e+00 : bf16
    %45 = vector.broadcast %cst_29 : bf16 to vector<1x32xbf16>
    %46 = vector.extract_strided_slice %11 {offsets = [1, 0], sizes = [7, 32], strides = [1, 1]} : vector<8x32xbf16> to vector<7x32xbf16>
    %47 = tpu.concatenate %46, %45 in 0 : vector<7x32xbf16>, vector<1x32xbf16> -> vector<8x32xbf16>
    %c2_30 = arith.constant 2 : index
    %c0_31 = arith.constant 0 : index
    %c0_32 = arith.constant 0 : index
    %48 = vector.load %arg6[%c2_30, %c0_31, %c0_32] : memref<3x32x32xbf16, #tpu.memory_space<vmem>>, vector<1x32x32xbf16>
    %49 = vector.shape_cast %48 : vector<1x32x32xbf16> to vector<32x32xbf16>
    %cst_33 = arith.constant dense<0.000000e+00> : vector<8x32xf32>
    %50 = tpu.matmul %47, %49, %cst_33 {dimension_numbers = #tpu.dot_dimension_numbers<[1], [0], [0], [1], [0, 0, 1, 1], [], []>} : vector<8x32xbf16>, vector<32x32xbf16>, vector<8x32xf32> -> vector<8x32xf32>
    %51 = arith.addf %44, %50 : vector<8x32xf32>
    %c0_34 = arith.constant 0 : index
    %c0_35 = arith.constant 0 : index
    %52 = vector.load %arg7[%c0_34, %c0_35] : memref<1x32xf32, #tpu.memory_space<vmem>>, vector<1x32xf32>
    %53 = vector.broadcast %52 : vector<1x32xf32> to vector<8x32xf32>
    %54 = arith.addf %51, %53 : vector<8x32xf32>
    %55 = arith.truncf %54 : vector<8x32xf32> to vector<8x32xbf16>
    %c0_36 = arith.constant 0 : index
    %c0_37 = arith.constant 0 : index
    %c0_38 = arith.constant 0 : index
    %56 = vector.load %arg8[%c0_36, %c0_37, %c0_38] : memref<2x32x32xbf16, #tpu.memory_space<vmem>>, vector<1x32x32xbf16>
    %57 = vector.shape_cast %56 : vector<1x32x32xbf16> to vector<32x32xbf16>
    %cst_39 = arith.constant dense<0.000000e+00> : vector<8x32xf32>
    %58 = tpu.matmul %9, %57, %cst_39 {dimension_numbers = #tpu.dot_dimension_numbers<[1], [0], [0], [1], [0, 0, 1, 1], [], []>} : vector<8x32xbf16>, vector<32x32xbf16>, vector<8x32xf32> -> vector<8x32xf32>
    %c1_40 = arith.constant 1 : index
    %c0_41 = arith.constant 0 : index
    %c0_42 = arith.constant 0 : index
    %59 = vector.load %arg8[%c1_40, %c0_41, %c0_42] : memref<2x32x32xbf16, #tpu.memory_space<vmem>>, vector<1x32x32xbf16>
    %60 = vector.shape_cast %59 : vector<1x32x32xbf16> to vector<32x32xbf16>
    %cst_43 = arith.constant dense<0.000000e+00> : vector<8x32xf32>
    %61 = tpu.matmul %34, %60, %cst_43 {dimension_numbers = #tpu.dot_dimension_numbers<[1], [0], [0], [1], [0, 0, 1, 1], [], []>} : vector<8x32xbf16>, vector<32x32xbf16>, vector<8x32xf32> -> vector<8x32xf32>
    %62 = arith.addf %58, %61 : vector<8x32xf32>
    %c0_44 = arith.constant 0 : index
    %c0_45 = arith.constant 0 : index
    %63 = vector.load %arg9[%c0_44, %c0_45] : memref<1x32xf32, #tpu.memory_space<vmem>>, vector<1x32xf32>
    %64 = vector.broadcast %63 : vector<1x32xf32> to vector<8x32xf32>
    %65 = arith.addf %62, %64 : vector<8x32xf32>
    %c0_46 = arith.constant 0 : index
    %c0_47 = arith.constant 0 : index
    %c0_48 = arith.constant 0 : index
    %66 = vector.load %arg10[%c0_46, %c0_47, %c0_48] : memref<2x32x32xbf16, #tpu.memory_space<vmem>>, vector<1x32x32xbf16>
    %67 = vector.shape_cast %66 : vector<1x32x32xbf16> to vector<32x32xbf16>
    %cst_49 = arith.constant dense<0.000000e+00> : vector<8x32xf32>
    %68 = tpu.matmul %11, %67, %cst_49 {dimension_numbers = #tpu.dot_dimension_numbers<[1], [0], [0], [1], [0, 0, 1, 1], [], []>} : vector<8x32xbf16>, vector<32x32xbf16>, vector<8x32xf32> -> vector<8x32xf32>
    %c1_50 = arith.constant 1 : index
    %c0_51 = arith.constant 0 : index
    %c0_52 = arith.constant 0 : index
    %69 = vector.load %arg10[%c1_50, %c0_51, %c0_52] : memref<2x32x32xbf16, #tpu.memory_space<vmem>>, vector<1x32x32xbf16>
    %70 = vector.shape_cast %69 : vector<1x32x32xbf16> to vector<32x32xbf16>
    %cst_53 = arith.constant dense<0.000000e+00> : vector<8x32xf32>
    %71 = tpu.matmul %55, %70, %cst_53 {dimension_numbers = #tpu.dot_dimension_numbers<[1], [0], [0], [1], [0, 0, 1, 1], [], []>} : vector<8x32xbf16>, vector<32x32xbf16>, vector<8x32xf32> -> vector<8x32xf32>
    %72 = arith.addf %68, %71 : vector<8x32xf32>
    %c0_54 = arith.constant 0 : index
    %c0_55 = arith.constant 0 : index
    %73 = vector.load %arg11[%c0_54, %c0_55] : memref<1x32xf32, #tpu.memory_space<vmem>>, vector<1x32xf32>
    %74 = vector.broadcast %73 : vector<1x32xf32> to vector<8x32xf32>
    %75 = arith.addf %72, %74 : vector<8x32xf32>
    %cst_56 = arith.constant 0.000000e+00 : f32
    %76 = vector.broadcast %cst_56 : f32 to vector<1x32xf32>
    %77 = vector.extract_strided_slice %1 {offsets = [0, 0], sizes = [7, 32], strides = [1, 1]} : vector<8x32xf32> to vector<7x32xf32>
    %78 = tpu.concatenate %76, %77 in 0 : vector<1x32xf32>, vector<7x32xf32> -> vector<8x32xf32>
    %cst_57 = arith.constant 0.000000e+00 : f32
    %79 = vector.broadcast %cst_57 : f32 to vector<1x32xf32>
    %80 = vector.extract_strided_slice %1 {offsets = [1, 0], sizes = [7, 32], strides = [1, 1]} : vector<8x32xf32> to vector<7x32xf32>
    %81 = tpu.concatenate %80, %79 in 0 : vector<7x32xf32>, vector<1x32xf32> -> vector<8x32xf32>
    %c0_58 = arith.constant 0 : index
    %c0_59 = arith.constant 0 : index
    %82 = vector.load %arg16[%c0_58, %c0_59] : memref<8x64xbf16, #tpu.memory_space<vmem>>, vector<8x64xbf16>
    %c0_60 = arith.constant 0 : index
    %c0_61 = arith.constant 0 : index
    %c0_62 = arith.constant 0 : index
    %83 = vector.load %arg12[%c0_60, %c0_61, %c0_62] : memref<3x1x32xf32, #tpu.memory_space<vmem>>, vector<3x1x32xf32>
    %c0_63 = arith.constant 0 : index
    %c0_64 = arith.constant 0 : index
    %c0_65 = arith.constant 0 : index
    %84 = vector.load %arg13[%c0_63, %c0_64, %c0_65] : memref<3x1x32xf32, #tpu.memory_space<vmem>>, vector<3x1x32xf32>
    %85 = vector.extract_strided_slice %83 {offsets = [0, 0, 0], sizes = [1, 1, 32], strides = [1, 1, 1]} : vector<3x1x32xf32> to vector<1x1x32xf32>
    %86 = vector.shape_cast %85 : vector<1x1x32xf32> to vector<1x32xf32>
    %87 = vector.broadcast %86 : vector<1x32xf32> to vector<8x32xf32>
    %88 = arith.mulf %78, %87 : vector<8x32xf32>
    %89 = vector.extract_strided_slice %83 {offsets = [1, 0, 0], sizes = [1, 1, 32], strides = [1, 1, 1]} : vector<3x1x32xf32> to vector<1x1x32xf32>
    %90 = vector.shape_cast %89 : vector<1x1x32xf32> to vector<1x32xf32>
    %91 = vector.broadcast %90 : vector<1x32xf32> to vector<8x32xf32>
    %92 = arith.mulf %1, %91 : vector<8x32xf32>
    %93 = arith.addf %88, %92 : vector<8x32xf32>
    %94 = vector.extract_strided_slice %83 {offsets = [2, 0, 0], sizes = [1, 1, 32], strides = [1, 1, 1]} : vector<3x1x32xf32> to vector<1x1x32xf32>
    %95 = vector.shape_cast %94 : vector<1x1x32xf32> to vector<1x32xf32>
    %96 = vector.broadcast %95 : vector<1x32xf32> to vector<8x32xf32>
    %97 = arith.mulf %81, %96 : vector<8x32xf32>
    %98 = arith.addf %93, %97 : vector<8x32xf32>
    %c0_66 = arith.constant 0 : index
    %c0_67 = arith.constant 0 : index
    %99 = vector.load %arg14[%c0_66, %c0_67] : memref<1x32xf32, #tpu.memory_space<vmem>>, vector<1x32xf32>
    %100 = vector.broadcast %99 : vector<1x32xf32> to vector<8x32xf32>
    %101 = arith.addf %98, %100 : vector<8x32xf32>
    %102 = vector.extract_strided_slice %84 {offsets = [0, 0, 0], sizes = [1, 1, 32], strides = [1, 1, 1]} : vector<3x1x32xf32> to vector<1x1x32xf32>
    %103 = vector.shape_cast %102 : vector<1x1x32xf32> to vector<1x32xf32>
    %104 = vector.broadcast %103 : vector<1x32xf32> to vector<8x32xf32>
    %105 = arith.mulf %78, %104 : vector<8x32xf32>
    %106 = vector.extract_strided_slice %84 {offsets = [1, 0, 0], sizes = [1, 1, 32], strides = [1, 1, 1]} : vector<3x1x32xf32> to vector<1x1x32xf32>
    %107 = vector.shape_cast %106 : vector<1x1x32xf32> to vector<1x32xf32>
    %108 = vector.broadcast %107 : vector<1x32xf32> to vector<8x32xf32>
    %109 = arith.mulf %1, %108 : vector<8x32xf32>
    %110 = arith.addf %105, %109 : vector<8x32xf32>
    %111 = vector.extract_strided_slice %84 {offsets = [2, 0, 0], sizes = [1, 1, 32], strides = [1, 1, 1]} : vector<3x1x32xf32> to vector<1x1x32xf32>
    %112 = vector.shape_cast %111 : vector<1x1x32xf32> to vector<1x32xf32>
    %113 = vector.broadcast %112 : vector<1x32xf32> to vector<8x32xf32>
    %114 = arith.mulf %81, %113 : vector<8x32xf32>
    %115 = arith.addf %110, %114 : vector<8x32xf32>
    %c0_68 = arith.constant 0 : index
    %c0_69 = arith.constant 0 : index
    %116 = vector.load %arg15[%c0_68, %c0_69] : memref<1x32xf32, #tpu.memory_space<vmem>>, vector<1x32xf32>
    %117 = vector.broadcast %116 : vector<1x32xf32> to vector<8x32xf32>
    %118 = arith.addf %115, %117 : vector<8x32xf32>
    %cst_70 = arith.constant 5.000000e-01 : f32
    %119 = vector.broadcast %cst_70 : f32 to vector<8x32xf32>
    %120 = arith.mulf %119, %101 : vector<8x32xf32>
    %121 = arith.mulf %101, %101 : vector<8x32xf32>
    %122 = arith.mulf %121, %101 : vector<8x32xf32>
    %cst_71 = arith.constant 4.471500e-02 : f32
    %123 = vector.broadcast %cst_71 : f32 to vector<8x32xf32>
    %124 = arith.mulf %123, %122 : vector<8x32xf32>
    %125 = arith.addf %101, %124 : vector<8x32xf32>
    %cst_72 = arith.constant 0.797884583 : f32
    %126 = vector.broadcast %cst_72 : f32 to vector<8x32xf32>
    %127 = arith.mulf %126, %125 : vector<8x32xf32>
    %128 = math.tanh %127 : vector<8x32xf32>
    %cst_73 = arith.constant 1.000000e+00 : f32
    %129 = vector.broadcast %cst_73 : f32 to vector<8x32xf32>
    %130 = arith.addf %129, %128 : vector<8x32xf32>
    %131 = arith.mulf %120, %130 : vector<8x32xf32>
    %cst_74 = arith.constant 5.000000e-01 : f32
    %132 = vector.broadcast %cst_74 : f32 to vector<8x32xf32>
    %133 = arith.mulf %132, %118 : vector<8x32xf32>
    %134 = arith.mulf %118, %118 : vector<8x32xf32>
    %135 = arith.mulf %134, %118 : vector<8x32xf32>
    %cst_75 = arith.constant 4.471500e-02 : f32
    %136 = vector.broadcast %cst_75 : f32 to vector<8x32xf32>
    %137 = arith.mulf %136, %135 : vector<8x32xf32>
    %138 = arith.addf %118, %137 : vector<8x32xf32>
    %cst_76 = arith.constant 0.797884583 : f32
    %139 = vector.broadcast %cst_76 : f32 to vector<8x32xf32>
    %140 = arith.mulf %139, %138 : vector<8x32xf32>
    %141 = math.tanh %140 : vector<8x32xf32>
    %cst_77 = arith.constant 1.000000e+00 : f32
    %142 = vector.broadcast %cst_77 : f32 to vector<8x32xf32>
    %143 = arith.addf %142, %141 : vector<8x32xf32>
    %144 = arith.mulf %133, %143 : vector<8x32xf32>
    %145 = tpu.concatenate %131, %144 in 1 : vector<8x32xf32>, vector<8x32xf32> -> vector<8x64xf32>
    %146 = arith.truncf %145 : vector<8x64xf32> to vector<8x64xbf16>
    %cst_78 = arith.constant dense<0.000000e+00> : vector<8x8xf32>
    %147 = tpu.matmul %82, %146, %cst_78 {dimension_numbers = #tpu.dot_dimension_numbers<[1], [1], [0], [0], [0, 0, 1, 0], [], []>} : vector<8x64xbf16>, vector<8x64xbf16>, vector<8x8xf32> -> vector<8x8xf32>
    %c0_79 = arith.constant 0 : index
    %c0_80 = arith.constant 0 : index
    %148 = vector.load %arg17[%c0_79, %c0_80] : memref<8x1xf32, #tpu.memory_space<vmem>>, vector<8x1xf32>
    %149 = vector.broadcast %148 : vector<8x1xf32> to vector<8x8xf32>
    %150 = arith.addf %147, %149 : vector<8x8xf32>
    %151 = arith.negf %150 : vector<8x8xf32>
    %152 = math.exp %151 : vector<8x8xf32>
    %cst_81 = arith.constant 1.000000e+00 : f32
    %153 = vector.broadcast %cst_81 : f32 to vector<8x8xf32>
    %154 = arith.addf %153, %152 : vector<8x8xf32>
    %155 = arith.divf %153, %154 : vector<8x8xf32>
    %c0_82 = arith.constant 0 : index
    %c0_83 = arith.constant 0 : index
    %156 = vector.load %arg22[%c0_82, %c0_83] : memref<8x64xbf16, #tpu.memory_space<vmem>>, vector<8x64xbf16>
    %c0_84 = arith.constant 0 : index
    %c0_85 = arith.constant 0 : index
    %c0_86 = arith.constant 0 : index
    %157 = vector.load %arg18[%c0_84, %c0_85, %c0_86] : memref<3x1x32xf32, #tpu.memory_space<vmem>>, vector<3x1x32xf32>
    %c0_87 = arith.constant 0 : index
    %c0_88 = arith.constant 0 : index
    %c0_89 = arith.constant 0 : index
    %158 = vector.load %arg19[%c0_87, %c0_88, %c0_89] : memref<3x1x32xf32, #tpu.memory_space<vmem>>, vector<3x1x32xf32>
    %159 = vector.extract_strided_slice %157 {offsets = [0, 0, 0], sizes = [1, 1, 32], strides = [1, 1, 1]} : vector<3x1x32xf32> to vector<1x1x32xf32>
    %160 = vector.shape_cast %159 : vector<1x1x32xf32> to vector<1x32xf32>
    %161 = vector.broadcast %160 : vector<1x32xf32> to vector<8x32xf32>
    %162 = arith.mulf %78, %161 : vector<8x32xf32>
    %163 = vector.extract_strided_slice %157 {offsets = [1, 0, 0], sizes = [1, 1, 32], strides = [1, 1, 1]} : vector<3x1x32xf32> to vector<1x1x32xf32>
    %164 = vector.shape_cast %163 : vector<1x1x32xf32> to vector<1x32xf32>
    %165 = vector.broadcast %164 : vector<1x32xf32> to vector<8x32xf32>
    %166 = arith.mulf %1, %165 : vector<8x32xf32>
    %167 = arith.addf %162, %166 : vector<8x32xf32>
    %168 = vector.extract_strided_slice %157 {offsets = [2, 0, 0], sizes = [1, 1, 32], strides = [1, 1, 1]} : vector<3x1x32xf32> to vector<1x1x32xf32>
    %169 = vector.shape_cast %168 : vector<1x1x32xf32> to vector<1x32xf32>
    %170 = vector.broadcast %169 : vector<1x32xf32> to vector<8x32xf32>
    %171 = arith.mulf %81, %170 : vector<8x32xf32>
    %172 = arith.addf %167, %171 : vector<8x32xf32>
    %c0_90 = arith.constant 0 : index
    %c0_91 = arith.constant 0 : index
    %173 = vector.load %arg20[%c0_90, %c0_91] : memref<1x32xf32, #tpu.memory_space<vmem>>, vector<1x32xf32>
    %174 = vector.broadcast %173 : vector<1x32xf32> to vector<8x32xf32>
    %175 = arith.addf %172, %174 : vector<8x32xf32>
    %176 = vector.extract_strided_slice %158 {offsets = [0, 0, 0], sizes = [1, 1, 32], strides = [1, 1, 1]} : vector<3x1x32xf32> to vector<1x1x32xf32>
    %177 = vector.shape_cast %176 : vector<1x1x32xf32> to vector<1x32xf32>
    %178 = vector.broadcast %177 : vector<1x32xf32> to vector<8x32xf32>
    %179 = arith.mulf %78, %178 : vector<8x32xf32>
    %180 = vector.extract_strided_slice %158 {offsets = [1, 0, 0], sizes = [1, 1, 32], strides = [1, 1, 1]} : vector<3x1x32xf32> to vector<1x1x32xf32>
    %181 = vector.shape_cast %180 : vector<1x1x32xf32> to vector<1x32xf32>
    %182 = vector.broadcast %181 : vector<1x32xf32> to vector<8x32xf32>
    %183 = arith.mulf %1, %182 : vector<8x32xf32>
    %184 = arith.addf %179, %183 : vector<8x32xf32>
    %185 = vector.extract_strided_slice %158 {offsets = [2, 0, 0], sizes = [1, 1, 32], strides = [1, 1, 1]} : vector<3x1x32xf32> to vector<1x1x32xf32>
    %186 = vector.shape_cast %185 : vector<1x1x32xf32> to vector<1x32xf32>
    %187 = vector.broadcast %186 : vector<1x32xf32> to vector<8x32xf32>
    %188 = arith.mulf %81, %187 : vector<8x32xf32>
    %189 = arith.addf %184, %188 : vector<8x32xf32>
    %c0_92 = arith.constant 0 : index
    %c0_93 = arith.constant 0 : index
    %190 = vector.load %arg21[%c0_92, %c0_93] : memref<1x32xf32, #tpu.memory_space<vmem>>, vector<1x32xf32>
    %191 = vector.broadcast %190 : vector<1x32xf32> to vector<8x32xf32>
    %192 = arith.addf %189, %191 : vector<8x32xf32>
    %cst_94 = arith.constant 5.000000e-01 : f32
    %193 = vector.broadcast %cst_94 : f32 to vector<8x32xf32>
    %194 = arith.mulf %193, %175 : vector<8x32xf32>
    %195 = arith.mulf %175, %175 : vector<8x32xf32>
    %196 = arith.mulf %195, %175 : vector<8x32xf32>
    %cst_95 = arith.constant 4.471500e-02 : f32
    %197 = vector.broadcast %cst_95 : f32 to vector<8x32xf32>
    %198 = arith.mulf %197, %196 : vector<8x32xf32>
    %199 = arith.addf %175, %198 : vector<8x32xf32>
    %cst_96 = arith.constant 0.797884583 : f32
    %200 = vector.broadcast %cst_96 : f32 to vector<8x32xf32>
    %201 = arith.mulf %200, %199 : vector<8x32xf32>
    %202 = math.tanh %201 : vector<8x32xf32>
    %cst_97 = arith.constant 1.000000e+00 : f32
    %203 = vector.broadcast %cst_97 : f32 to vector<8x32xf32>
    %204 = arith.addf %203, %202 : vector<8x32xf32>
    %205 = arith.mulf %194, %204 : vector<8x32xf32>
    %cst_98 = arith.constant 5.000000e-01 : f32
    %206 = vector.broadcast %cst_98 : f32 to vector<8x32xf32>
    %207 = arith.mulf %206, %192 : vector<8x32xf32>
    %208 = arith.mulf %192, %192 : vector<8x32xf32>
    %209 = arith.mulf %208, %192 : vector<8x32xf32>
    %cst_99 = arith.constant 4.471500e-02 : f32
    %210 = vector.broadcast %cst_99 : f32 to vector<8x32xf32>
    %211 = arith.mulf %210, %209 : vector<8x32xf32>
    %212 = arith.addf %192, %211 : vector<8x32xf32>
    %cst_100 = arith.constant 0.797884583 : f32
    %213 = vector.broadcast %cst_100 : f32 to vector<8x32xf32>
    %214 = arith.mulf %213, %212 : vector<8x32xf32>
    %215 = math.tanh %214 : vector<8x32xf32>
    %cst_101 = arith.constant 1.000000e+00 : f32
    %216 = vector.broadcast %cst_101 : f32 to vector<8x32xf32>
    %217 = arith.addf %216, %215 : vector<8x32xf32>
    %218 = arith.mulf %207, %217 : vector<8x32xf32>
    %219 = tpu.concatenate %205, %218 in 1 : vector<8x32xf32>, vector<8x32xf32> -> vector<8x64xf32>
    %220 = arith.truncf %219 : vector<8x64xf32> to vector<8x64xbf16>
    %cst_102 = arith.constant dense<0.000000e+00> : vector<8x8xf32>
    %221 = tpu.matmul %156, %220, %cst_102 {dimension_numbers = #tpu.dot_dimension_numbers<[1], [1], [0], [0], [0, 0, 1, 0], [], []>} : vector<8x64xbf16>, vector<8x64xbf16>, vector<8x8xf32> -> vector<8x8xf32>
    %c0_103 = arith.constant 0 : index
    %c0_104 = arith.constant 0 : index
    %222 = vector.load %arg23[%c0_103, %c0_104] : memref<8x1xf32, #tpu.memory_space<vmem>>, vector<8x1xf32>
    %223 = vector.broadcast %222 : vector<8x1xf32> to vector<8x8xf32>
    %224 = arith.addf %221, %223 : vector<8x8xf32>
    %225 = arith.negf %224 : vector<8x8xf32>
    %226 = math.exp %225 : vector<8x8xf32>
    %cst_105 = arith.constant 1.000000e+00 : f32
    %227 = vector.broadcast %cst_105 : f32 to vector<8x8xf32>
    %228 = arith.addf %227, %226 : vector<8x8xf32>
    %229 = arith.divf %227, %228 : vector<8x8xf32>
    %230 = vector.shape_cast %65 : vector<8x32xf32> to vector<8x8x4xf32>
    %231 = tpu.transpose %230, [1, 0, 2] : vector<8x8x4xf32> -> vector<8x8x4xf32>
    %cst_106 = arith.constant 5.000000e-01 : f32
    %232 = vector.broadcast %cst_106 : f32 to vector<8x8xf32>
    %233 = arith.mulf %155, %232 : vector<8x8xf32>
    %234 = vector.shape_cast %233 : vector<8x8xf32> to vector<8x8x1xf32>
    %235 = vector.broadcast %234 : vector<8x8x1xf32> to vector<8x8x4xf32>
    %236 = arith.mulf %231, %235 : vector<8x8x4xf32>
    %237 = arith.truncf %236 : vector<8x8x4xf32> to vector<8x8x4xbf16>
    %238 = arith.truncf %75 : vector<8x32xf32> to vector<8x32xbf16>
    %239 = vector.shape_cast %238 : vector<8x32xbf16> to vector<8x8x4xbf16>
    %240 = tpu.transpose %239, [1, 0, 2] : vector<8x8x4xbf16> -> vector<8x8x4xbf16>
    %241 = vector.shape_cast %13 : vector<8x32xbf16> to vector<8x8x4xbf16>
    %242 = tpu.transpose %241, [1, 0, 2] : vector<8x8x4xbf16> -> vector<8x8x4xbf16>
    "tpu.trace_start"() <{level = 10 : i32, message = "hqd,hkd->hqk"}> : () -> ()
    %cst_107 = arith.constant dense<0.000000e+00> : vector<8x8x8xf32>
    %243 = tpu.matmul %237, %240, %cst_107 {dimension_numbers = #tpu.dot_dimension_numbers<[2], [2], [1], [1], [0, 0, 0, 1, 1, 1], [0], [0]>} : vector<8x8x4xbf16>, vector<8x8x4xbf16>, vector<8x8x8xf32> -> vector<8x8x8xf32>
    "tpu.trace_stop"() : () -> ()
    %244 = vector.shape_cast %229 : vector<8x8xf32> to vector<8x1x8xf32>
    %245 = vector.broadcast %244 : vector<8x1x8xf32> to vector<8x8x8xf32>
    %246 = arith.addf %243, %245 : vector<8x8x8xf32>
    %cst_108 = arith.constant dense<0xFF800000> : vector<8x8xf32>
    %247 = vector.multi_reduction <maximumf>, %246, %cst_108 [2] : vector<8x8x8xf32> to vector<8x8xf32>
    %248 = vector.shape_cast %247 : vector<8x8xf32> to vector<8x8x1xf32>
    %249 = vector.broadcast %248 : vector<8x8x1xf32> to vector<8x8x8xf32>
    %250 = arith.subf %246, %249 : vector<8x8x8xf32>
    %251 = math.exp %250 : vector<8x8x8xf32>
    %cst_109 = arith.constant dense<0.000000e+00> : vector<8x8xf32>
    %252 = vector.multi_reduction <add>, %251, %cst_109 [2] : vector<8x8x8xf32> to vector<8x8xf32>
    %253 = vector.shape_cast %252 : vector<8x8xf32> to vector<8x8x1xf32>
    %254 = arith.truncf %251 : vector<8x8x8xf32> to vector<8x8x8xbf16>
    "tpu.trace_start"() <{level = 10 : i32, message = "hqk,hkd->hqd"}> : () -> ()
    %cst_110 = arith.constant dense<0.000000e+00> : vector<8x8x4xf32>
    %255 = tpu.matmul %254, %242, %cst_110 {dimension_numbers = #tpu.dot_dimension_numbers<[2], [1], [1], [2], [0, 0, 0, 1, 1, 2], [0], [0]>} : vector<8x8x8xbf16>, vector<8x8x4xbf16>, vector<8x8x4xf32> -> vector<8x8x4xf32>
    "tpu.trace_stop"() : () -> ()
    %256 = tpu.reciprocal %253 {approx = true} : vector<8x8x1xf32> -> vector<8x8x1xf32>
    %257 = vector.broadcast %256 : vector<8x8x1xf32> to vector<8x8x4xf32>
    %258 = arith.mulf %255, %257 : vector<8x8x4xf32>
    %259 = tpu.transpose %258, [1, 0, 2] : vector<8x8x4xf32> -> vector<8x8x4xf32>
    %260 = vector.shape_cast %259 : vector<8x8x4xf32> to vector<8x32xf32>
    %261 = arith.truncf %260 : vector<8x32xf32> to vector<8x32xbf16>
    %c0_111 = arith.constant 0 : index
    %c0_112 = arith.constant 0 : index
    %262 = vector.load %arg24[%c0_111, %c0_112] : memref<32x32xbf16, #tpu.memory_space<vmem>>, vector<32x32xbf16>
    %cst_113 = arith.constant dense<0.000000e+00> : vector<8x32xf32>
    %263 = tpu.matmul %261, %262, %cst_113 {dimension_numbers = #tpu.dot_dimension_numbers<[1], [0], [0], [1], [0, 0, 1, 1], [], []>} : vector<8x32xbf16>, vector<32x32xbf16>, vector<8x32xf32> -> vector<8x32xf32>
    %c0_114 = arith.constant 0 : index
    %c0_115 = arith.constant 0 : index
    %264 = vector.load %arg25[%c0_114, %c0_115] : memref<1x32xf32, #tpu.memory_space<vmem>>, vector<1x32xf32>
    %265 = vector.broadcast %264 : vector<1x32xf32> to vector<8x32xf32>
    %266 = arith.addf %263, %265 : vector<8x32xf32>
    %267 = arith.addf %1, %266 : vector<8x32xf32>
    %cst_116 = arith.constant dense<0.000000e+00> : vector<8xf32>
    %268 = vector.multi_reduction <add>, %267, %cst_116 [1] : vector<8x32xf32> to vector<8xf32>
    %269 = vector.shape_cast %268 : vector<8xf32> to vector<8x1xf32>
    %cst_117 = arith.constant 3.200000e+01 : f32
    %270 = vector.broadcast %cst_117 : f32 to vector<8x1xf32>
    %271 = arith.divf %269, %270 : vector<8x1xf32>
    %272 = vector.broadcast %271 : vector<8x1xf32> to vector<8x32xf32>
    %273 = arith.subf %267, %272 : vector<8x32xf32>
    %274 = arith.mulf %273, %273 : vector<8x32xf32>
    %cst_118 = arith.constant dense<0.000000e+00> : vector<8xf32>
    %275 = vector.multi_reduction <add>, %274, %cst_118 [1] : vector<8x32xf32> to vector<8xf32>
    %276 = vector.shape_cast %275 : vector<8xf32> to vector<8x1xf32>
    %cst_119 = arith.constant 3.200000e+01 : f32
    %277 = vector.broadcast %cst_119 : f32 to vector<8x1xf32>
    %278 = arith.divf %276, %277 : vector<8x1xf32>
    %cst_120 = arith.constant 9.99999974E-6 : f32
    %279 = vector.broadcast %cst_120 : f32 to vector<8x1xf32>
    %280 = arith.addf %278, %279 : vector<8x1xf32>
    %281 = math.rsqrt %280 : vector<8x1xf32>
    %282 = vector.broadcast %281 : vector<8x1xf32> to vector<8x32xf32>
    %283 = arith.mulf %273, %282 : vector<8x32xf32>
    %c0_121 = arith.constant 0 : index
    %c0_122 = arith.constant 0 : index
    %284 = vector.load %arg26[%c0_121, %c0_122] : memref<1x32xf32, #tpu.memory_space<vmem>>, vector<1x32xf32>
    %285 = vector.broadcast %284 : vector<1x32xf32> to vector<8x32xf32>
    %286 = arith.mulf %283, %285 : vector<8x32xf32>
    %c0_123 = arith.constant 0 : index
    %c0_124 = arith.constant 0 : index
    %287 = vector.load %arg27[%c0_123, %c0_124] : memref<1x32xf32, #tpu.memory_space<vmem>>, vector<1x32xf32>
    %288 = vector.broadcast %287 : vector<1x32xf32> to vector<8x32xf32>
    %289 = arith.addf %286, %288 : vector<8x32xf32>
    %290 = arith.truncf %289 : vector<8x32xf32> to vector<8x32xbf16>
    %cst_125 = arith.constant 0.000000e+00 : f32
    %291 = vector.broadcast %cst_125 : f32 to vector<8x32xf32>
    %c0_126 = arith.constant 0 : index
    %c0_127 = arith.constant 0 : index
    %292 = vector.load %arg28[%c0_126, %c0_127] : memref<32x64xbf16, #tpu.memory_space<vmem>>, vector<32x64xbf16>
    %cst_128 = arith.constant dense<0.000000e+00> : vector<8x64xf32>
    %293 = tpu.matmul %290, %292, %cst_128 {dimension_numbers = #tpu.dot_dimension_numbers<[1], [0], [0], [1], [0, 0, 1, 1], [], []>} : vector<8x32xbf16>, vector<32x64xbf16>, vector<8x64xf32> -> vector<8x64xf32>
    %c0_129 = arith.constant 0 : index
    %c0_130 = arith.constant 0 : index
    %294 = vector.load %arg29[%c0_129, %c0_130] : memref<1x64xf32, #tpu.memory_space<vmem>>, vector<1x64xf32>
    %295 = vector.broadcast %294 : vector<1x64xf32> to vector<8x64xf32>
    %296 = arith.addf %293, %295 : vector<8x64xf32>
    %cst_131 = arith.constant 5.000000e-01 : f32
    %297 = vector.broadcast %cst_131 : f32 to vector<8x64xf32>
    %298 = arith.mulf %297, %296 : vector<8x64xf32>
    %299 = arith.mulf %296, %296 : vector<8x64xf32>
    %300 = arith.mulf %299, %296 : vector<8x64xf32>
    %cst_132 = arith.constant 4.471500e-02 : f32
    %301 = vector.broadcast %cst_132 : f32 to vector<8x64xf32>
    %302 = arith.mulf %301, %300 : vector<8x64xf32>
    %303 = arith.addf %296, %302 : vector<8x64xf32>
    %cst_133 = arith.constant 0.797884583 : f32
    %304 = vector.broadcast %cst_133 : f32 to vector<8x64xf32>
    %305 = arith.mulf %304, %303 : vector<8x64xf32>
    %306 = math.tanh %305 : vector<8x64xf32>
    %cst_134 = arith.constant 1.000000e+00 : f32
    %307 = vector.broadcast %cst_134 : f32 to vector<8x64xf32>
    %308 = arith.addf %307, %306 : vector<8x64xf32>
    %309 = arith.mulf %298, %308 : vector<8x64xf32>
    %310 = arith.truncf %309 : vector<8x64xf32> to vector<8x64xbf16>
    %c0_135 = arith.constant 0 : index
    %c0_136 = arith.constant 0 : index
    %311 = vector.load %arg30[%c0_135, %c0_136] : memref<64x32xbf16, #tpu.memory_space<vmem>>, vector<64x32xbf16>
    %cst_137 = arith.constant dense<0.000000e+00> : vector<8x32xf32>
    %312 = tpu.matmul %310, %311, %cst_137 {dimension_numbers = #tpu.dot_dimension_numbers<[1], [0], [0], [1], [0, 0, 1, 1], [], []>} : vector<8x64xbf16>, vector<64x32xbf16>, vector<8x32xf32> -> vector<8x32xf32>
    %313 = arith.addf %291, %312 : vector<8x32xf32>
    %c0_138 = arith.constant 0 : index
    %c0_139 = arith.constant 0 : index
    %314 = vector.load %arg31[%c0_138, %c0_139] : memref<1x32xf32, #tpu.memory_space<vmem>>, vector<1x32xf32>
    %315 = vector.broadcast %314 : vector<1x32xf32> to vector<8x32xf32>
    %316 = arith.addf %313, %315 : vector<8x32xf32>
    %317 = arith.addf %289, %316 : vector<8x32xf32>
    %cst_140 = arith.constant dense<0.000000e+00> : vector<8xf32>
    %318 = vector.multi_reduction <add>, %317, %cst_140 [1] : vector<8x32xf32> to vector<8xf32>
    %319 = vector.shape_cast %318 : vector<8xf32> to vector<8x1xf32>
    %cst_141 = arith.constant 3.200000e+01 : f32
    %320 = vector.broadcast %cst_141 : f32 to vector<8x1xf32>
    %321 = arith.divf %319, %320 : vector<8x1xf32>
    %322 = vector.broadcast %321 : vector<8x1xf32> to vector<8x32xf32>
    %323 = arith.subf %317, %322 : vector<8x32xf32>
    %324 = arith.mulf %323, %323 : vector<8x32xf32>
    %cst_142 = arith.constant dense<0.000000e+00> : vector<8xf32>
    %325 = vector.multi_reduction <add>, %324, %cst_142 [1] : vector<8x32xf32> to vector<8xf32>
    %326 = vector.shape_cast %325 : vector<8xf32> to vector<8x1xf32>
    %cst_143 = arith.constant 3.200000e+01 : f32
    %327 = vector.broadcast %cst_143 : f32 to vector<8x1xf32>
    %328 = arith.divf %326, %327 : vector<8x1xf32>
    %cst_144 = arith.constant 9.99999974E-6 : f32
    %329 = vector.broadcast %cst_144 : f32 to vector<8x1xf32>
    %330 = arith.addf %328, %329 : vector<8x1xf32>
    %331 = math.rsqrt %330 : vector<8x1xf32>
    %332 = vector.broadcast %331 : vector<8x1xf32> to vector<8x32xf32>
    %333 = arith.mulf %323, %332 : vector<8x32xf32>
    %c0_145 = arith.constant 0 : index
    %c0_146 = arith.constant 0 : index
    %334 = vector.load %arg32[%c0_145, %c0_146] : memref<1x32xf32, #tpu.memory_space<vmem>>, vector<1x32xf32>
    %335 = vector.broadcast %334 : vector<1x32xf32> to vector<8x32xf32>
    %336 = arith.mulf %333, %335 : vector<8x32xf32>
    %c0_147 = arith.constant 0 : index
    %c0_148 = arith.constant 0 : index
    %337 = vector.load %arg33[%c0_147, %c0_148] : memref<1x32xf32, #tpu.memory_space<vmem>>, vector<1x32xf32>
    %338 = vector.broadcast %337 : vector<1x32xf32> to vector<8x32xf32>
    %339 = arith.addf %336, %338 : vector<8x32xf32>
    %c0_149 = arith.constant 0 : index
    %c0_150 = arith.constant 0 : index
    %c0_151 = arith.constant 0 : index
    %340 = vector.load %arg34[%c0_149, %c0_150, %c0_151] : memref<1x8x32xf32, #tpu.memory_space<vmem>>, vector<1x8x32xf32>
    %341 = vector.shape_cast %340 : vector<1x8x32xf32> to vector<8x32xf32>
    %342 = vector.shape_cast %339 : vector<8x32xf32> to vector<1x8x32xf32>
    tpu.vector_store %arg34[%c0_149, %c0_150, %c0_151], %342 {strides = array<i32>} : memref<1x8x32xf32, #tpu.memory_space<vmem>>, vector<1x8x32xf32>,
    return
  }
  func.func @transform_0(%arg0: i32) -> (i32, i32, i32) {
    %c0_i32 = arith.constant 0 : i32
    %c0_i32_0 = arith.constant 0 : i32
    %c0_i32_1 = arith.constant 0 : i32
    return %arg0, %c0_i32, %c0_i32_0 : i32, i32, i32
  }
  func.func @transform_1(%arg0: i32) -> (i32, i32) {
    %c0_i32 = arith.constant 0 : i32
    %c0_i32_0 = arith.constant 0 : i32
    %c0_i32_1 = arith.constant 0 : i32
    return %c0_i32, %c0_i32_0 : i32, i32
  }
  func.func @transform_2(%arg0: i32) -> (i32, i32) {
    %c0_i32 = arith.constant 0 : i32
    %c0_i32_0 = arith.constant 0 : i32
    %c0_i32_1 = arith.constant 0 : i32
    return %c0_i32, %c0_i32_0 : i32, i32
  }
  func.func @transform_3(%arg0: i32) -> (i32, i32, i32) {
    %c0_i32 = arith.constant 0 : i32
    %c0_i32_0 = arith.constant 0 : i32
    %c0_i32_1 = arith.constant 0 : i32
    %c0_i32_2 = arith.constant 0 : i32
    return %c0_i32, %c0_i32_0, %c0_i32_1 : i32, i32, i32
  }
  func.func @transform_4(%arg0: i32) -> (i32, i32) {
    %c0_i32 = arith.constant 0 : i32
    %c0_i32_0 = arith.constant 0 : i32
    %c0_i32_1 = arith.constant 0 : i32
    return %c0_i32, %c0_i32_0 : i32, i32
  }
  func.func @transform_5(%arg0: i32) -> (i32, i32, i32) {
    %c0_i32 = arith.constant 0 : i32
    %c0_i32_0 = arith.constant 0 : i32
    %c0_i32_1 = arith.constant 0 : i32
    %c0_i32_2 = arith.constant 0 : i32
    return %c0_i32, %c0_i32_0, %c0_i32_1 : i32, i32, i32
  }
  func.func @transform_6(%arg0: i32) -> (i32, i32) {
    %c0_i32 = arith.constant 0 : i32
    %c0_i32_0 = arith.constant 0 : i32
    %c0_i32_1 = arith.constant 0 : i32
    return %c0_i32, %c0_i32_0 : i32, i32
  }
  func.func @transform_7(%arg0: i32) -> (i32, i32, i32) {
    %c0_i32 = arith.constant 0 : i32
    %c0_i32_0 = arith.constant 0 : i32
    %c0_i32_1 = arith.constant 0 : i32
    %c0_i32_2 = arith.constant 0 : i32
    return %c0_i32, %c0_i32_0, %c0_i32_1 : i32, i32, i32
  }
  func.func @transform_8(%arg0: i32) -> (i32, i32) {
    %c0_i32 = arith.constant 0 : i32
    %c0_i32_0 = arith.constant 0 : i32
    %c0_i32_1 = arith.constant 0 : i32
    return %c0_i32, %c0_i32_0 : i32, i32
  }
  func.func @transform_9(%arg0: i32) -> (i32, i32, i32) {
    %c0_i32 = arith.constant 0 : i32
    %c0_i32_0 = arith.constant 0 : i32
    %c0_i32_1 = arith.constant 0 : i32
    %c0_i32_2 = arith.constant 0 : i32
    return %c0_i32, %c0_i32_0, %c0_i32_1 : i32, i32, i32
  }
  func.func @transform_10(%arg0: i32) -> (i32, i32) {
    %c0_i32 = arith.constant 0 : i32
    %c0_i32_0 = arith.constant 0 : i32
    %c0_i32_1 = arith.constant 0 : i32
    return %c0_i32, %c0_i32_0 : i32, i32
  }
  func.func @transform_11(%arg0: i32) -> (i32, i32, i32) {
    %c0_i32 = arith.constant 0 : i32
    %c0_i32_0 = arith.constant 0 : i32
    %c0_i32_1 = arith.constant 0 : i32
    %c0_i32_2 = arith.constant 0 : i32
    return %c0_i32, %c0_i32_0, %c0_i32_1 : i32, i32, i32
  }
  func.func @transform_12(%arg0: i32) -> (i32, i32, i32) {
    %c0_i32 = arith.constant 0 : i32
    %c0_i32_0 = arith.constant 0 : i32
    %c0_i32_1 = arith.constant 0 : i32
    %c0_i32_2 = arith.constant 0 : i32
    return %c0_i32, %c0_i32_0, %c0_i32_1 : i32, i32, i32
  }
  func.func @transform_13(%arg0: i32) -> (i32, i32) {
    %c0_i32 = arith.constant 0 : i32
    %c0_i32_0 = arith.constant 0 : i32
    %c0_i32_1 = arith.constant 0 : i32
    return %c0_i32, %c0_i32_0 : i32, i32
  }
  func.func @transform_14(%arg0: i32) -> (i32, i32) {
    %c0_i32 = arith.constant 0 : i32
    %c0_i32_0 = arith.constant 0 : i32
    %c0_i32_1 = arith.constant 0 : i32
    return %c0_i32, %c0_i32_0 : i32, i32
  }
  func.func @transform_15(%arg0: i32) -> (i32, i32) {
    %c0_i32 = arith.constant 0 : i32
    %c0_i32_0 = arith.constant 0 : i32
    %c0_i32_1 = arith.constant 0 : i32
    return %c0_i32, %c0_i32_0 : i32, i32
  }
  func.func @transform_16(%arg0: i32) -> (i32, i32) {
    %c0_i32 = arith.constant 0 : i32
    %c0_i32_0 = arith.constant 0 : i32
    %c0_i32_1 = arith.constant 0 : i32
    return %c0_i32, %c0_i32_0 : i32, i32
  }
  func.func @transform_17(%arg0: i32) -> (i32, i32, i32) {
    %c0_i32 = arith.constant 0 : i32
    %c0_i32_0 = arith.constant 0 : i32
    %c0_i32_1 = arith.constant 0 : i32
    %c0_i32_2 = arith.constant 0 : i32
    return %c0_i32, %c0_i32_0, %c0_i32_1 : i32, i32, i32
  }
  func.func @transform_18(%arg0: i32) -> (i32, i32, i32) {
    %c0_i32 = arith.constant 0 : i32
    %c0_i32_0 = arith.constant 0 : i32
    %c0_i32_1 = arith.constant 0 : i32
    %c0_i32_2 = arith.constant 0 : i32
    return %c0_i32, %c0_i32_0, %c0_i32_1 : i32, i32, i32
  }
  func.func @transform_19(%arg0: i32) -> (i32, i32) {
    %c0_i32 = arith.constant 0 : i32
    %c0_i32_0 = arith.constant 0 : i32
    %c0_i32_1 = arith.constant 0 : i32
    return %c0_i32, %c0_i32_0 : i32, i32
  }
  func.func @transform_20(%arg0: i32) -> (i32, i32) {
    %c0_i32 = arith.constant 0 : i32
    %c0_i32_0 = arith.constant 0 : i32
    %c0_i32_1 = arith.constant 0 : i32
    return %c0_i32, %c0_i32_0 : i32, i32
  }
  func.func @transform_21(%arg0: i32) -> (i32, i32) {
    %c0_i32 = arith.constant 0 : i32
    %c0_i32_0 = arith.constant 0 : i32
    %c0_i32_1 = arith.constant 0 : i32
    return %c0_i32, %c0_i32_0 : i32, i32
  }
  func.func @transform_22(%arg0: i32) -> (i32, i32) {
    %c0_i32 = arith.constant 0 : i32
    %c0_i32_0 = arith.constant 0 : i32
    %c0_i32_1 = arith.constant 0 : i32
    return %c0_i32, %c0_i32_0 : i32, i32
  }
  func.func @transform_23(%arg0: i32) -> (i32, i32) {
    %c0_i32 = arith.constant 0 : i32
    %c0_i32_0 = arith.constant 0 : i32
    %c0_i32_1 = arith.constant 0 : i32
    return %c0_i32, %c0_i32_0 : i32, i32
  }
  func.func @transform_24(%arg0: i32) -> (i32, i32) {
    %c0_i32 = arith.constant 0 : i32
    %c0_i32_0 = arith.constant 0 : i32
    %c0_i32_1 = arith.constant 0 : i32
    return %c0_i32, %c0_i32_0 : i32, i32
  }
  func.func @transform_25(%arg0: i32) -> (i32, i32) {
    %c0_i32 = arith.constant 0 : i32
    %c0_i32_0 = arith.constant 0 : i32
    %c0_i32_1 = arith.constant 0 : i32
    return %c0_i32, %c0_i32_0 : i32, i32
  }
  func.func @transform_26(%arg0: i32) -> (i32, i32) {
    %c0_i32 = arith.constant 0 : i32
    %c0_i32_0 = arith.constant 0 : i32
    %c0_i32_1 = arith.constant 0 : i32
    return %c0_i32, %c0_i32_0 : i32, i32
  }
  func.func @transform_27(%arg0: i32) -> (i32, i32) {
    %c0_i32 = arith.constant 0 : i32
    %c0_i32_0 = arith.constant 0 : i32
    %c0_i32_1 = arith.constant 0 : i32
    return %c0_i32, %c0_i32_0 : i32, i32
  }
  func.func @transform_28(%arg0: i32) -> (i32, i32) {
    %c0_i32 = arith.constant 0 : i32
    %c0_i32_0 = arith.constant 0 : i32
    %c0_i32_1 = arith.constant 0 : i32
    return %c0_i32, %c0_i32_0 : i32, i32
  }
  func.func @transform_29(%arg0: i32) -> (i32, i32) {
    %c0_i32 = arith.constant 0 : i32
    %c0_i32_0 = arith.constant 0 : i32
    %c0_i32_1 = arith.constant 0 : i32
    return %c0_i32, %c0_i32_0 : i32, i32
  }
  func.func @transform_30(%arg0: i32) -> (i32, i32) {
    %c0_i32 = arith.constant 0 : i32
    %c0_i32_0 = arith.constant 0 : i32
    %c0_i32_1 = arith.constant 0 : i32
    return %c0_i32, %c0_i32_0 : i32, i32
  }
  func.func @transform_31(%arg0: i32) -> (i32, i32) {
    %c0_i32 = arith.constant 0 : i32
    %c0_i32_0 = arith.constant 0 : i32
    %c0_i32_1 = arith.constant 0 : i32
    return %c0_i32, %c0_i32_0 : i32, i32
  }
  func.func @transform_32(%arg0: i32) -> (i32, i32) {
    %c0_i32 = arith.constant 0 : i32
    %c0_i32_0 = arith.constant 0 : i32
    %c0_i32_1 = arith.constant 0 : i32
    return %c0_i32, %c0_i32_0 : i32, i32
  }
  func.func @transform_33(%arg0: i32) -> (i32, i32, i32) {
    %c0_i32 = arith.constant 0 : i32
    %c0_i32_0 = arith.constant 0 : i32
    %c0_i32_1 = arith.constant 0 : i32
    return %arg0, %c0_i32, %c0_i32_0 : i32, i32, i32
  }
}

</mosaic_0001>

<bundles_post_ra>
// kernel: tpu_custom_call.1
= control target key start
LH: loop header
LB: loop body
LE: loop exit
PB: predicated region body
PF: predicated region fallthrough
CT: control target
= control target key end

     0   :  { %s6625_s6 = smov 1   ;;  %s6626_s10 = smov 2   ;;  %s7749_s0 = inlined_call_operand.smem [shape: u32[34], index: -1, kind: input, shape index: {}] }
   0x1   :  { %s6717_s5 = sld [smem:[%s7749_s0]]   ;;  %s6627_s14 = smov 3  }
   0x2   :  { %s6722_s9 = sld [smem:[%s7749_s0 + %s6625_s6]]   ;;  %s6628_s18 = smov 4  }
   0x3   :  { %s6727_s13 = sld [smem:[%s7749_s0 + %s6626_s10]]   ;;  %s6629_s22 = smov 5  }
   0x4   :  { %s6732_s17 = sld [smem:[%s7749_s0 + %s6627_s14]]   ;;  %s6630_s26 = smov 6  }
   0x5   :  { %s6737_s21 = sld [smem:[%s7749_s0 + %s6628_s18]]   ;;  %s6631_s30 = smov 7  }
   0x6   :  { %s6742_s25 = sld [smem:[%s7749_s0 + %s6629_s22]]   ;;  %s6632_s4 = smov 8  }
   0x7   :  { %7773 = sst [smem:[#allocation52_spill]] %s6717_s5  ;;  %s6633_s10 = smov 9  }
   0x8   :  { %7774 = sst [smem:[#allocation53_spill]] %s6722_s9  ;;  %s6634_s15 = smov 10  }
   0x9   :  { %7775 = sst [smem:[#allocation54_spill]] %s6727_s13  ;;  %s6635_s20 = smov 11  }
   0xa   :  { %7776 = sst [smem:[#allocation55_spill]] %s6732_s17  ;;  %s6637_s1 = smov 13  }
   0xb   :  { %s6747_s29 = sld [smem:[%s7749_s0 + %s6630_s26]]   ;;  %s6636_s26 = smov 12  }
   0xc   :  { %s6752_s3 = sld [smem:[%s7749_s0 + %s6631_s30]]   ;;  %s6638_s7 = smov 14  }
   0xd   :  { %s6757_s8 = sld [smem:[%s7749_s0 + %s6632_s4]]   ;;  %s6640_s22 = smov 16  }
   0xe   :  { %s6762_s14 = sld [smem:[%s7749_s0 + %s6633_s10]]   ;;  %s6641_s28 = smov 17  }
   0xf   :  { %s6767_s19 = sld [smem:[%s7749_s0 + %s6634_s15]]   ;;  %s6639_s15 = smov 15  }
  0x10   :  { %s6772_s24 = sld [smem:[%s7749_s0 + %s6635_s20]]  }
  0x11   :  { %s6777_s30 = sld [smem:[%s7749_s0 + %s6636_s26]]  }
  0x12   :  { %7777 = sst [smem:[#allocation56_spill]] %s6752_s3 }
  0x13   :  { %7778 = sst [smem:[#allocation57_spill]] %s6757_s8 }
  0x14   :  { %7779 = sst [smem:[#allocation58_spill]] %s6762_s14 }
  0x15   :  { %7780 = sst [smem:[#allocation59_spill]] %s6767_s19 }
  0x16   :  { %s6782_s6 = sld [smem:[%s7749_s0 + %s6637_s1]]  }
  0x17   :  { %7781 = sst [smem:[#allocation60_spill]] %s6777_s30 }
  0x18   :  { %s6787_s12 = sld [smem:[%s7749_s0 + %s6638_s7]]   ;;  %s6642_s7 = smov 18  }
  0x19   :  { %s6792_s20 = sld [smem:[%s7749_s0 + %s6639_s15]]   ;;  %s6643_s15 = smov 19  }
  0x1a   :  { %s6797_s27 = sld [smem:[%s7749_s0 + %s6640_s22]]   ;;  %s6644_s22 = smov 20  }
  0x1b   :  { %s6802_s4 = sld [smem:[%s7749_s0 + %s6641_s28]]   ;;  %s6645_s28 = smov 21  }
  0x1c   :  { %7782 = sst [smem:[#allocation61_spill]] %s6782_s6 }
  0x1d   :  { %s6807_s14 = sld [smem:[%s7749_s0 + %s6642_s7]]   ;;  %s6646_s7 = smov 22  }
  0x1e   :  { %7783 = sst [smem:[#allocation62_spill]] %s6787_s12 }
  0x1f   :  { %s6812_s17 = sld [smem:[%s7749_s0 + %s6643_s15]]   ;;  %s6647_s15 = smov 23  }
  0x20   :  { %7784 = sst [smem:[#allocation63_spill]] %s6797_s27 }
  0x21   :  { %7785 = sst [smem:[#allocation64_spill]] %s6802_s4 }
  0x22   :  { %s6817_s27 = sld [smem:[%s7749_s0 + %s6644_s22]]   ;;  %s6648_s22 = smov 24  }
  0x23   :  { %s6822_s5 = sld [smem:[%s7749_s0 + %s6645_s28]]   ;;  %s6649_s28 = smov 25  }
  0x24   :  { %s6827_s4 = sld [smem:[%s7749_s0 + %s6646_s7]]   ;;  %s6650_s7 = smov 26  }
  0x25   :  { %7786 = sst [smem:[#allocation65_spill]] %s6812_s17 }
  0x26   :  { %s6832_s17 = sld [smem:[%s7749_s0 + %s6647_s15]]   ;;  %s6651_s15 = smov 27  }
  0x27   :  { %s6837_s12 = sld [smem:[%s7749_s0 + %s6648_s22]]   ;;  %s6652_s22 = smov 28  }
  0x28   :  { %s6852_s30 = sld [smem:[%s7749_s0 + %s6651_s15]]   ;;  %s6655_s15 = smov 31  }
  0x29   :  { %7787 = sst [smem:[#allocation66_spill]] %s6822_s5 }
  0x2a   :  { %7788 = sst [smem:[#allocation67_spill]] %s6827_s4 }
  0x2b   :  { %s6842_s5 = sld [smem:[%s7749_s0 + %s6649_s28]]   ;;  %s6653_s28 = smov 29  }
  0x2c   :  { %s6847_s4 = sld [smem:[%s7749_s0 + %s6650_s7]]   ;;  %s6654_s7 = smov 30  }
  0x2d   :  { %7789 = sst [smem:[#allocation68_spill]] %s6837_s12 }
  0x2e   :  { %7792 = sst [smem:[#allocation71_spill]] %s6852_s30 }
  0x2f   :  { %s6857_s12 = sld [smem:[%s7749_s0 + %s6652_s22]]   ;;  %s6656_s22 = smov 32  }
  0x30   :  { %s6862_s19 = sld [smem:[%s7749_s0 + %s6653_s28]]   ;;  %s6657_s28 = smov 33  }
  0x31   :  { %7790 = sst [smem:[#allocation69_spill]] %s6842_s5 }
  0x32   :  { %7791 = sst [smem:[#allocation70_spill]] %s6847_s4 }
  0x33   :  { %s6867_s4 = sld [smem:[%s7749_s0 + %s6654_s7]]  }
  0x34   :  { %s6872_s30 = sld [smem:[%s7749_s0 + %s6655_s15]]  }
  0x35   :  { %7793 = sst [smem:[#allocation72_spill]] %s6857_s12 }
  0x36   :  { %7794 = sst [smem:[#allocation73_spill]] %s6862_s19 }
  0x37   :  { %s6877_s12 = sld [smem:[%s7749_s0 + %s6656_s22]]  }
  0x38   :  { %s6882_s19 = sld [smem:[%s7749_s0 + %s6657_s28]]  }
  0x39   :  { %7795 = sst [smem:[#allocation74_spill]] %s6867_s4 }
  0x3a   :  { %7796 = sst [smem:[#allocation75_spill]] %s6872_s30 }
  0x3d   :  { %7797 = sst [smem:[#allocation76_spill]] %s6877_s12 }
  0x3e   :  { %7798 = sst [smem:[#allocation77_spill]] %s6882_s19 }
  0x3f   :  { %72 = vsyncpa [#allocation3], 0 }
  0x40   :  { %74 = vsyncpa [#allocation3 + $0x1], 0 }
  0x41   :  { %75 = vsyncpa [#allocation6], 0 }
  0x42   :  { %76 = vsyncpa [#allocation9], 0 }
  0x43   :  { %77 = vsyncpa [#allocation12], 0 }
  0x44   :  { %78 = vsyncpa [#allocation15], 0 }
  0x45   :  { %79 = vsyncpa [#allocation18], 0 }
  0x46   :  { %80 = vsyncpa [#allocation21], 0 }
  0x47   :  { %81 = vsyncpa [#allocation24], 0 }
  0x48   :  { %82 = vsyncpa [#allocation27], 0 }
  0x49   :  { %83 = vsyncpa [#allocation30], 0 }
  0x4a   :  { %84 = vsyncpa [#allocation33], 0 }
  0x4b   :  { %85 = vsyncpa [#allocation36], 0 }
  0x4c   :  { %86 = vsyncpa [#allocation4], 0 }
  0x4d   :  { %88 = vsyncpa [#allocation4 + $0x1], 0  ;;  %s6884_s7 = smov 0   ;;  %s6886_s10 = smov 0  }
  0x4e   :  { %s6888_s0 = smov 0   ;;  %s6890_s11 = smov 0  }
  0x4f LB: > { %s6658_s15 = smov [#allocation5]   ;;  %s6905_s18 = sadd.s32 4294967295, %s6623_s11   ;;  %s6623_s11 = sphi %s6890_s11, %s7871_s11   ;;  %s6619_s0 = sphi %s6888_s0, %s7870_s0   ;;  %s6615_s10 = sphi %s6886_s10, %s7869_s10   ;;  %s6611_s7 = sphi %s6884_s7, %s7868_s7  }
  0x50   : > { %s835_s16 = sshll.u32 %s6658_s15, 4  ;;  %p5022_p0 = scmp.ge.s32.totalorder %s6623_s11, 1  ;;  %s836_s16 = int_to_ptr.vmem [resolvable:$true] %s835_s16 }
  0x51   : > { %p7760_p1 = scmp.eq.s32.totalorder %s6905_s18, 0  ;;  %p823_p2 = scmp.lt.s32.totalorder %s6623_s11, 3 }
  0x52   : > { %s6659_s23 = smov [#allocation8]   ;;  %s6660_s1 = smov [#allocation11]  }
  0x53   : > { %p6910_p3 = pnand %p5022_p0, %p823_p2  ;;  %s863_s26 = sshll.u32 %s6659_s23, 4  ;;  %s864_s26 = int_to_ptr.vmem [resolvable:$true] %s863_s26 }
  0x54   : > { %s887_s2 = sshll.u32 %s6660_s1, 4  ;;  %s5926_s19 = scalar_lea.vmem %s836_s16, 256  ;;  %s6923_s2 = int_to_ptr.vmem [resolvable:$true] %s887_s2 }
  0x55   : > { %s7799_s22 = scalar_select %p6910_p3, 1, 0 }
  0x56   : > { %p5593_p5 = pneg %p6910_p3  ;;  %p5927_p8 = scmp.ne.s32.totalorder %s836_s16, %s5926_s19 }
  0x57   : > { %p5934_p11 = scmp.lt.s32.totalorder %s836_s16, %s836_s16  ;;  %p5935_p12 = scmp.lt.s32.totalorder %s5926_s19, %s5926_s19 }
  0x58   : > { %p6919_p6 = pnand %p5593_p5, %p7760_p1 }
  0x59   : > { %p5936_p13 = por %p5935_p12, %p5934_p11 }
  0x5a   : > { %p6927_p7 = pneg %p6919_p6 }
  0x5c   : > { %p5929_p9 = pnand %p5927_p8, %p6927_p7 }
  0x5e   : > { %p5930_p10 = pneg %p5929_p9 }
  0x60   : > { %p5937_p0 = pnand %p5936_p13, %p5930_p10 }
  0x62   : > { %5940 = shalt.err (!%p5937_p0)
}
  0x63   : > { %s7756_s23 = smov 64   ;;  %s7802_s9 = sld [smem:[#allocation53_spill]] }
  0x64   : > { %s7758_s1 = smov 4   ;;  %s5952_s12 = scalar_lea.vmem %s864_s26, 16 }
  0x65   : > { %p5953_p2 = scmp.ne.s32.totalorder %s864_s26, %s5952_s12  ;;  %s5959_s30 = scalar_lea.vmem %s864_s26, 32 }
  0x66   : > { %p5960_p9 = scmp.lt.s32.totalorder %s864_s26, %s864_s26  ;;  %p5961_p11 = scmp.lt.s32.totalorder %s5959_s30, %s5952_s12 }
  0x67   : > { %p5955_p5 = pnand %p5953_p2, %p6927_p7 }
  0x68   : > { %p5962_p10 = por %p5961_p11, %p5960_p9 }
  0x69   : > { %5596 = dma.hbm_to_vmem [thread:$0]  (!%p6919_p6), %s7802_s9, 256, %s836_s16, [#allocation6], %s7756_s23, %s7756_s23, %s7758_s1  }
  0x6a   : > { %p5956_p8 = pneg %p5955_p5 }
  0x6c   : > { %p5963_p12 = pnand %p5962_p10, %p5956_p8 }
  0x6e   : > { %5966 = shalt.err (!%p5963_p12)
}
  0x6f   : > { %5602 = dma.hbm_to_vmem [thread:$0]  (!%p6919_p6), %s6737_s21, 16, %s864_s26, [#allocation9]  }
  0x70   : > { %s5978_s19 = scalar_lea.vmem %s6923_s2, 16  ;;  %s5985_s16 = scalar_lea.vmem %s6923_s2, 32 }
  0x71   : > { %p5979_p13 = scmp.ne.s32.totalorder %s6923_s2, %s5978_s19  ;;  %p5986_p5 = scmp.lt.s32.totalorder %s6923_s2, %s6923_s2 }
  0x72   : > { %p5987_p9 = scmp.lt.s32.totalorder %s5985_s16, %s5978_s19 }
  0x73   : > { %p5981_p0 = pnand %p5979_p13, %p6927_p7 }
  0x74   : > { %p5988_p8 = por %p5987_p9, %p5986_p5 }
  0x75   : > { %p5982_p2 = pneg %p5981_p0 }
  0x77   : > { %p5989_p11 = pnand %p5988_p8, %p5982_p2 }
  0x79   : > { %5992 = shalt.err (!%p5989_p11)
}
  0x7a   : > { %5608 = dma.hbm_to_vmem [thread:$0]  (!%p6919_p6), %s6747_s29, 16, %s6923_s2, [#allocation12]  }
  0x7b   : > { %s6663_s30 = smov [#allocation14]   ;;  %s6664_s26 = smov [#allocation17]  }
  0x7c   : > { %s911_s12 = sshll.u32 %s6663_s30, 4  ;;  %s935_s23 = sshll.u32 %s6664_s26, 4  ;;  %s912_s12 = int_to_ptr.vmem [resolvable:$true] %s911_s12  ;;  %s936_s23 = int_to_ptr.vmem [resolvable:$true] %s935_s23 }
  0x7d   : > { %s6004_s1 = scalar_lea.vmem %s912_s12, 16  ;;  %s6011_s19 = scalar_lea.vmem %s912_s12, 32 }
  0x7e   : > { %p6005_p10 = scmp.ne.s32.totalorder %s912_s12, %s6004_s1  ;;  %p6012_p0 = scmp.lt.s32.totalorder %s912_s12, %s912_s12 }
  0x7f   : > { %p6013_p2 = scmp.lt.s32.totalorder %s6011_s19, %s6004_s1 }
  0x80   : > { %p6007_p12 = pnand %p6005_p10, %p6927_p7 }
  0x81   : > { %p6014_p5 = por %p6013_p2, %p6012_p0 }
  0x82   : > { %p6008_p13 = pneg %p6007_p12 }
  0x84   : > { %p6015_p9 = pnand %p6014_p5, %p6008_p13 }
  0x86   : > { %6018 = shalt.err (!%p6015_p9)
}
  0x87   : > { %s7803_s8 = sld [smem:[#allocation57_spill]]  ;;  %s6030_s2 = scalar_lea.vmem %s936_s23, 48 }
  0x88   : > { %p6031_p8 = scmp.ne.s32.totalorder %s936_s23, %s6030_s2  ;;  %s6037_s16 = scalar_lea.vmem %s936_s23, 64 }
  0x89   : > { %p6038_p10 = scmp.lt.s32.totalorder %s936_s23, %s936_s23  ;;  %p6039_p12 = scmp.lt.s32.totalorder %s6037_s16, %s6030_s2 }
  0x8a   : > { %p6033_p11 = pnand %p6031_p8, %p6927_p7 }
  0x8b   : > { %p6040_p1 = por %p6039_p12, %p6038_p10 }
  0x8c   : > { %p6034_p4 = pneg %p6033_p11 }
  0x8d   : > { %5614 = dma.hbm_to_vmem [thread:$0]  (!%p6919_p6), %s7803_s8, 16, %s912_s12, [#allocation15]  }
  0x8e   : > { %p6041_p3 = pnand %p6040_p1, %p6034_p4 }
  0x90   : > { %6044 = shalt.err (!%p6041_p3)
}
  0x91   : > { %s7762_s1 = smov 16   ;;  %s7764_s30 = smov 1  }
  0x92   : > { %5620 = dma.hbm_to_vmem [thread:$0]  (!%p6919_p6), %s6772_s24, 48, %s936_s23, [#allocation18], %s7762_s1, %s7762_s1, %s7764_s30  }
  0x93   : > { %s6667_s12 = smov [#allocation20]   ;;  %s6668_s19 = smov [#allocation23]  }
  0x94   : > { %s962_s26 = sshll.u32 %s6667_s12, 4  ;;  %s984_s8 = sshll.u32 %s6668_s19, 4  ;;  %s963_s26 = int_to_ptr.vmem [resolvable:$true] %s962_s26  ;;  %s985_s8 = int_to_ptr.vmem [resolvable:$true] %s984_s8 }
  0x95   : > { %s6056_s9 = scalar_lea.vmem %s963_s26, 16  ;;  %s6063_s2 = scalar_lea.vmem %s963_s26, 32 }
  0x96   : > { %p6057_p13 = scmp.ne.s32.totalorder %s963_s26, %s6056_s9  ;;  %p6064_p4 = scmp.lt.s32.totalorder %s963_s26, %s963_s26 }
  0x97   : > { %p6065_p0 = scmp.lt.s32.totalorder %s6063_s2, %s6056_s9 }
  0x98   : > { %p6059_p1 = pnand %p6057_p13, %p6927_p7 }
  0x99   : > { %p6066_p2 = por %p6065_p0, %p6064_p4 }
  0x9a   : > { %p6060_p3 = pneg %p6059_p1 }
  0x9c   : > { %p6067_p5 = pnand %p6066_p2, %p6060_p3 }
  0x9e   : > { %6070 = shalt.err (!%p6067_p5)
}
  0x9f   : > { %s7804_s6 = sld [smem:[#allocation61_spill]]  ;;  %s6082_s23 = scalar_lea.vmem %s985_s8, 64 }
  0xa0   : > { %p6083_p9 = scmp.ne.s32.totalorder %s985_s8, %s6082_s23  ;;  %p6090_p10 = scmp.lt.s32.totalorder %s985_s8, %s985_s8 }
  0xa1   : > { %p6091_p12 = scmp.lt.s32.totalorder %s6082_s23, %s6082_s23 }
  0xa2   : > { %p6085_p8 = pnand %p6083_p9, %p6927_p7 }
  0xa3   : > { %p6092_p13 = por %p6091_p12, %p6090_p10 }
  0xa4   : > { %p6086_p11 = pneg %p6085_p8 }
  0xa5   : > { %5626 = dma.hbm_to_vmem [thread:$0]  (!%p6919_p6), %s7804_s6, 16, %s963_s26, [#allocation21]  }
  0xa6   : > { %p6093_p1 = pnand %p6092_p13, %p6086_p11 }
  0xa8   : > { %6096 = shalt.err (!%p6093_p1)
}
  0xa9   : > { %5632 = dma.hbm_to_vmem [thread:$0]  (!%p6919_p6), %s6792_s20, 64, %s985_s8, [#allocation24]  }
  0xaa   : > { %s6669_s9 = smov [#allocation26]   ;;  %s6670_s12 = smov [#allocation29]  }
  0xab   : > { %s1010_s16 = sshll.u32 %s6669_s9, 4  ;;  %s1035_s26 = sshll.u32 %s6670_s12, 4  ;;  %s1011_s16 = int_to_ptr.vmem [resolvable:$true] %s1010_s16  ;;  %s1036_s26 = int_to_ptr.vmem [resolvable:$true] %s1035_s26 }
  0xac   : > { %s6108_s19 = scalar_lea.vmem %s1011_s16, 48  ;;  %s6115_s2 = scalar_lea.vmem %s1011_s16, 64 }
  0xad   : > { %p6109_p3 = scmp.ne.s32.totalorder %s1011_s16, %s6108_s19  ;;  %p6116_p2 = scmp.lt.s32.totalorder %s1011_s16, %s1011_s16 }
  0xae   : > { %p6117_p5 = scmp.lt.s32.totalorder %s6115_s2, %s6108_s19 }
  0xaf   : > { %p6111_p4 = pnand %p6109_p3, %p6927_p7 }
  0xb0   : > { %p6118_p9 = por %p6117_p5, %p6116_p2 }
  0xb1   : > { %p6112_p0 = pneg %p6111_p4 }
  0xb3   : > { %p6119_p8 = pnand %p6118_p9, %p6112_p0 }
  0xb5   : > { %6122 = shalt.err (!%p6119_p8)
}
  0xb6   : > { %5638 = dma.hbm_to_vmem [thread:$0]  (!%p6919_p6), %s6807_s14, 48, %s1011_s16, [#allocation27], %s7762_s1, %s7762_s1, %s7764_s30  }
  0xb7   : > { %s6134_s8 = scalar_lea.vmem %s1036_s26, 16  ;;  %s6141_s23 = scalar_lea.vmem %s1036_s26, 32 }
  0xb8   : > { %p6135_p11 = scmp.ne.s32.totalorder %s1036_s26, %s6134_s8  ;;  %p6142_p13 = scmp.lt.s32.totalorder %s1036_s26, %s1036_s26 }
  0xb9   : > { %p6143_p1 = scmp.lt.s32.totalorder %s6141_s23, %s6134_s8 }
  0xba   : > { %p6137_p10 = pnand %p6135_p11, %p6927_p7 }
  0xbb   : > { %p6144_p3 = por %p6143_p1, %p6142_p13 }
  0xbc   : > { %p6138_p12 = pneg %p6137_p10 }
  0xbe   : > { %p6145_p4 = pnand %p6144_p3, %p6138_p12 }
  0xc0   : > { %6148 = shalt.err (!%p6145_p4)
}
  0xc1   : > { %5644 = dma.hbm_to_vmem [thread:$0]  (!%p6919_p6), %s6817_s27, 16, %s1036_s26, [#allocation30]  }
  0xc2   : > { %s6671_s9 = smov [#allocation32]   ;;  %s6672_s16 = smov [#allocation35]  }
  0xc3   : > { %s1059_s12 = sshll.u32 %s6671_s9, 4  ;;  %s1084_s19 = sshll.u32 %s6672_s16, 4  ;;  %s1060_s12 = int_to_ptr.vmem [resolvable:$true] %s1059_s12  ;;  %s1085_s19 = int_to_ptr.vmem [resolvable:$true] %s1084_s19 }
  0xc4   : > { %s6160_s2 = scalar_lea.vmem %s1060_s12, 256  ;;  %p6168_p9 = scmp.lt.s32.totalorder %s1060_s12, %s1060_s12 }
  0xc5   : > { %p6161_p0 = scmp.ne.s32.totalorder %s1060_s12, %s6160_s2  ;;  %p6169_p8 = scmp.lt.s32.totalorder %s6160_s2, %s6160_s2 }
  0xc7   : > { %p6163_p2 = pnand %p6161_p0, %p6927_p7  ;;  %p6170_p11 = por %p6169_p8, %p6168_p9 }
  0xc9   : > { %p6164_p5 = pneg %p6163_p2 }
  0xcb   : > { %p6171_p10 = pnand %p6170_p11, %p6164_p5 }
  0xcd   : > { %6174 = shalt.err (!%p6171_p10)
}
  0xce   : > { %s7805_s8 = smov 4   ;;  %s7806_s23 = smov 64  }
  0xcf   : > { %5650 = dma.hbm_to_vmem [thread:$0]  (!%p6919_p6), %s6832_s17, 256, %s1060_s12, [#allocation33], %s7806_s23, %s7806_s23, %s7805_s8  }
  0xd0   : > { %s6186_s26 = scalar_lea.vmem %s1085_s19, 16  ;;  %s6193_s9 = scalar_lea.vmem %s1085_s19, 32 }
  0xd1   : > { %p6187_p12 = scmp.ne.s32.totalorder %s1085_s19, %s6186_s26  ;;  %p6194_p3 = scmp.lt.s32.totalorder %s1085_s19, %s1085_s19 }
  0xd2   : > { %p6195_p4 = scmp.lt.s32.totalorder %s6193_s9, %s6186_s26 }
  0xd3   : > { %p6189_p13 = pnand %p6187_p12, %p6927_p7 }
  0xd4   : > { %p6196_p0 = por %p6195_p4, %p6194_p3 }
  0xd5   : > { %p6190_p1 = pneg %p6189_p13 }
  0xd7   : > { %p6197_p2 = pnand %p6196_p0, %p6190_p1 }
  0xd9   : > { %6200 = shalt.err (!%p6197_p2)
}
  0xda   : > { %s7807_s5 = sld [smem:[#allocation69_spill]]  ;;  %s6673_s16 = smov [#allocation7]  }
  0xdb   : > { %s849_s2 = sshll.u32 %s6673_s16, 4  ;;  %s6674_s12 = smov [#allocation10]   ;;  %s850_s2 = int_to_ptr.vmem [resolvable:$true] %s849_s2 }
  0xdc   : > { %s873_s1 = sshll.u32 %s6674_s12, 4  ;;  %s6212_s30 = scalar_lea.vmem %s850_s2, 16  ;;  %s874_s1 = int_to_ptr.vmem [resolvable:$true] %s873_s1 }
  0xdd   : > { %p6213_p5 = scmp.ne.s32.totalorder %s850_s2, %s6212_s30  ;;  %s6219_s6 = scalar_lea.vmem %s850_s2, 32 }
  0xde   : > { %p6220_p11 = scmp.lt.s32.totalorder %s850_s2, %s850_s2  ;;  %p6221_p10 = scmp.lt.s32.totalorder %s6219_s6, %s6212_s30 }
  0xdf   : > { %p6215_p9 = pnand %p6213_p5, %p6927_p7 }
  0xe0   : > { %5656 = dma.hbm_to_vmem [thread:$0]  (!%p6919_p6), %s7807_s5, 16, %s1085_s19, [#allocation36]  }
  0xe1   : > { %p6216_p8 = pneg %p6215_p9  ;;  %p6222_p12 = por %p6221_p10, %p6220_p11 }
  0xe3   : > { %p6223_p13 = pnand %p6222_p12, %p6216_p8 }
  0xe5   : > { %6226 = shalt.err (!%p6223_p13)
}
  0xe6   : > { %s7808_s13 = sld [smem:[#allocation54_spill]]  ;;  %s6238_s19 = scalar_lea.vmem %s874_s1, 768 }
  0xe7   : > { %p6239_p1 = scmp.ne.s32.totalorder %s874_s1, %s6238_s19  ;;  %p6246_p0 = scmp.lt.s32.totalorder %s874_s1, %s874_s1 }
  0xe8   : > { %p6247_p2 = scmp.lt.s32.totalorder %s6238_s19, %s6238_s19 }
  0xe9   : > { %p6241_p3 = pnand %p6239_p1, %p6927_p7 }
  0xea   : > { %p6248_p5 = por %p6247_p2, %p6246_p0 }
  0xeb   : > { %p6242_p4 = pneg %p6241_p3 }
  0xec   : > { %5599 = dma.hbm_to_vmem [thread:$0]  (!%p6919_p6), %s7808_s13, 16, %s850_s2, [#allocation6]  }
  0xed   : > { %p6249_p9 = pnand %p6248_p5, %p6242_p4 }
  0xef   : > { %6252 = shalt.err (!%p6249_p9)
}
  0xf0   : > { %5605 = dma.hbm_to_vmem [thread:$0]  (!%p6919_p6), %s6742_s25, 768, %s874_s1, [#allocation9], %s7806_s23, %s7806_s23, %s7805_s8  }
  0xf1   : > { %s6675_s6 = smov [#allocation13]   ;;  %s6676_s26 = smov [#allocation16]  }
  0xf2   : > { %s897_s30 = sshll.u32 %s6675_s6, 4  ;;  %s925_s9 = sshll.u32 %s6676_s26, 4  ;;  %s898_s30 = int_to_ptr.vmem [resolvable:$true] %s897_s30  ;;  %s926_s9 = int_to_ptr.vmem [resolvable:$true] %s925_s9 }
  0xf3   : > { %s6264_s16 = scalar_lea.vmem %s898_s30, 512  ;;  %p6272_p12 = scmp.lt.s32.totalorder %s898_s30, %s898_s30 }
  0xf4   : > { %p6265_p8 = scmp.ne.s32.totalorder %s898_s30, %s6264_s16  ;;  %p6273_p13 = scmp.lt.s32.totalorder %s6264_s16, %s6264_s16 }
  0xf6   : > { %p6267_p11 = pnand %p6265_p8, %p6927_p7  ;;  %p6274_p1 = por %p6273_p13, %p6272_p12 }
  0xf8   : > { %p6268_p10 = pneg %p6267_p11 }
  0xfa   : > { %p6275_p3 = pnand %p6274_p1, %p6268_p10 }
  0xfc   : > { %6278 = shalt.err (!%p6275_p3)
}
  0xfd   : > { %s7809_s3 = sld [smem:[#allocation56_spill]]  ;;  %s6290_s1 = scalar_lea.vmem %s926_s9, 16 }
  0xfe   : > { %p6291_p4 = scmp.ne.s32.totalorder %s926_s9, %s6290_s1  ;;  %s6297_s2 = scalar_lea.vmem %s926_s9, 32 }
  0xff   : > { %p6298_p5 = scmp.lt.s32.totalorder %s926_s9, %s926_s9  ;;  %p6299_p9 = scmp.lt.s32.totalorder %s6297_s2, %s6290_s1 }
 0x100   : > { %p6293_p0 = pnand %p6291_p4, %p6927_p7 }
 0x101   : > { %p6300_p8 = por %p6299_p9, %p6298_p5 }
 0x102   : > { %p6294_p2 = pneg %p6293_p0 }
 0x103   : > { %5611 = dma.hbm_to_vmem [thread:$0]  (!%p6919_p6), %s7809_s3, 512, %s898_s30, [#allocation12], %s7806_s23, %s7806_s23, %s7805_s8  }
 0x104   : > { %p6301_p11 = pnand %p6300_p8, %p6294_p2 }
 0x106   : > { %6304 = shalt.err (!%p6301_p11)
}
 0x107   : > { %s7810_s12 = sld [smem:[#allocation59_spill]]  ;;  %s6677_s19 = smov [#allocation19]  }
 0x108   : > { %s948_s6 = sshll.u32 %s6677_s19, 4  ;;  %s6678_s8 = smov [#allocation22]   ;;  %s949_s6 = int_to_ptr.vmem [resolvable:$true] %s948_s6 }
 0x109   : > { %s973_s23 = sshll.u32 %s6678_s8, 4  ;;  %s6316_s30 = scalar_lea.vmem %s949_s6, 48  ;;  %s974_s23 = int_to_ptr.vmem [resolvable:$true] %s973_s23 }
 0x10a   : > { %p6317_p10 = scmp.ne.s32.totalorder %s949_s6, %s6316_s30  ;;  %s6323_s26 = scalar_lea.vmem %s949_s6, 64 }
 0x10b   : > { %p6324_p1 = scmp.lt.s32.totalorder %s949_s6, %s949_s6  ;;  %p6325_p3 = scmp.lt.s32.totalorder %s6323_s26, %s6316_s30 }
 0x10c   : > { %p6319_p12 = pnand %p6317_p10, %p6927_p7 }
 0x10d   : > { %5617 = dma.hbm_to_vmem [thread:$0]  (!%p6919_p6), %s7810_s12, 16, %s926_s9, [#allocation15]  }
 0x10e   : > { %p6320_p13 = pneg %p6319_p12  ;;  %p6326_p4 = por %p6325_p3, %p6324_p1 }
 0x110   : > { %p6327_p0 = pnand %p6326_p4, %p6320_p13 }
 0x112   : > { %6330 = shalt.err (!%p6327_p0)
}
 0x113   : > { %s7811_s16 = smov 1   ;;  %s7812_s9 = smov 16  }
 0x114   : > { %s7813_s1 = sld [smem:[#allocation60_spill]]  ;;  %s6342_s2 = scalar_lea.vmem %s974_s23, 16 }
 0x115   : > { %p6343_p2 = scmp.ne.s32.totalorder %s974_s23, %s6342_s2  ;;  %s6349_s12 = scalar_lea.vmem %s974_s23, 32 }
 0x116   : > { %p6350_p8 = scmp.lt.s32.totalorder %s974_s23, %s974_s23  ;;  %p6351_p11 = scmp.lt.s32.totalorder %s6349_s12, %s6342_s2 }
 0x117   : > { %p6345_p5 = pnand %p6343_p2, %p6927_p7 }
 0x118   : > { %p6352_p10 = por %p6351_p11, %p6350_p8 }
 0x119   : > { %p6346_p9 = pneg %p6345_p5 }
 0x11a   : > { %5623 = dma.hbm_to_vmem [thread:$0]  (!%p6919_p6), %s7813_s1, 48, %s949_s6, [#allocation18], %s7812_s9, %s7812_s9, %s7811_s16  }
 0x11b   : > { %p6353_p12 = pnand %p6352_p10, %p6346_p9 }
 0x11d   : > { %6356 = shalt.err (!%p6353_p12)
}
 0x11e   : > { %s7814_s19 = sld [smem:[#allocation62_spill]]  ;;  %s6679_s8 = smov [#allocation25]  }
 0x11f   : > { %s997_s30 = sshll.u32 %s6679_s8, 4  ;;  %s6680_s6 = smov [#allocation28]   ;;  %s998_s30 = int_to_ptr.vmem [resolvable:$true] %s997_s30 }
 0x120   : > { %s1024_s26 = sshll.u32 %s6680_s6, 4  ;;  %s6368_s1 = scalar_lea.vmem %s998_s30, 48  ;;  %s1025_s26 = int_to_ptr.vmem [resolvable:$true] %s1024_s26 }
 0x121   : > { %p6369_p13 = scmp.ne.s32.totalorder %s998_s30, %s6368_s1  ;;  %s6375_s3 = scalar_lea.vmem %s998_s30, 64 }
 0x122   : > { %p6376_p4 = scmp.lt.s32.totalorder %s998_s30, %s998_s30  ;;  %p6377_p0 = scmp.lt.s32.totalorder %s6375_s3, %s6368_s1 }
 0x123   : > { %p6371_p1 = pnand %p6369_p13, %p6927_p7 }
 0x124   : > { %5629 = dma.hbm_to_vmem [thread:$0]  (!%p6919_p6), %s7814_s19, 16, %s974_s23, [#allocation21]  }
 0x125   : > { %p6372_p3 = pneg %p6371_p1  ;;  %p6378_p2 = por %p6377_p0, %p6376_p4 }
 0x127   : > { %p6379_p5 = pnand %p6378_p2, %p6372_p3 }
 0x129   : > { %6382 = shalt.err (!%p6379_p5)
}
 0x12a   : > { %s7815_s23 = sld [smem:[#allocation64_spill]]  ;;  %s6394_s2 = scalar_lea.vmem %s1025_s26, 16 }
 0x12b   : > { %p6395_p9 = scmp.ne.s32.totalorder %s1025_s26, %s6394_s2  ;;  %s6401_s12 = scalar_lea.vmem %s1025_s26, 32 }
 0x12c   : > { %p6402_p10 = scmp.lt.s32.totalorder %s1025_s26, %s1025_s26  ;;  %p6403_p12 = scmp.lt.s32.totalorder %s6401_s12, %s6394_s2 }
 0x12d   : > { %p6397_p8 = pnand %p6395_p9, %p6927_p7 }
 0x12e   : > { %p6404_p13 = por %p6403_p12, %p6402_p10 }
 0x12f   : > { %p6398_p11 = pneg %p6397_p8 }
 0x130   : > { %5635 = dma.hbm_to_vmem [thread:$0]  (!%p6919_p6), %s7815_s23, 48, %s998_s30, [#allocation24], %s7812_s9, %s7812_s9, %s7811_s16  }
 0x131   : > { %p6405_p1 = pnand %p6404_p13, %p6398_p11 }
 0x133   : > { %6408 = shalt.err (!%p6405_p1)
}
 0x134   : > { %s7816_s3 = sld [smem:[#allocation65_spill]]  ;;  %s6681_s19 = smov [#allocation31]  }
 0x135   : > { %s1046_s8 = sshll.u32 %s6681_s19, 4  ;;  %s6682_s16 = smov [#allocation34]   ;;  %s1047_s8 = int_to_ptr.vmem [resolvable:$true] %s1046_s8 }
 0x136   : > { %s1073_s9 = sshll.u32 %s6682_s16, 4  ;;  %s6420_s30 = scalar_lea.vmem %s1047_s8, 64  ;;  %s1074_s9 = int_to_ptr.vmem [resolvable:$true] %s1073_s9 }
 0x137   : > { %p6421_p3 = scmp.ne.s32.totalorder %s1047_s8, %s6420_s30  ;;  %p6428_p2 = scmp.lt.s32.totalorder %s1047_s8, %s1047_s8 }
 0x138   : > { %p6429_p5 = scmp.lt.s32.totalorder %s6420_s30, %s6420_s30 }
 0x139   : > { %p6423_p4 = pnand %p6421_p3, %p6927_p7 }
 0x13a   : > { %5641 = dma.hbm_to_vmem [thread:$0]  (!%p6919_p6), %s7816_s3, 16, %s1025_s26, [#allocation27]  }
 0x13b   : > { %p6424_p0 = pneg %p6423_p4  ;;  %p6430_p9 = por %p6429_p5, %p6428_p2 }
 0x13d   : > { %p6431_p8 = pnand %p6430_p9, %p6424_p0 }
 0x13f   : > { %6434 = shalt.err (!%p6431_p8)
}
 0x140   : > { %s7817_s6 = sld [smem:[#allocation66_spill]]  ;;  %s6446_s26 = scalar_lea.vmem %s1074_s9, 16 }
 0x141   : > { %p6447_p11 = scmp.ne.s32.totalorder %s1074_s9, %s6446_s26  ;;  %s6453_s1 = scalar_lea.vmem %s1074_s9, 32 }
 0x142   : > { %p6454_p13 = scmp.lt.s32.totalorder %s1074_s9, %s1074_s9  ;;  %p6455_p1 = scmp.lt.s32.totalorder %s6453_s1, %s6446_s26 }
 0x143   : > { %p6449_p10 = pnand %p6447_p11, %p6927_p7 }
 0x144   : > { %p6456_p3 = por %p6455_p1, %p6454_p13 }
 0x145   : > { %p6450_p12 = pneg %p6449_p10 }
 0x146   : > { %5647 = dma.hbm_to_vmem [thread:$0]  (!%p6919_p6), %s7817_s6, 64, %s1047_s8, [#allocation30]  }
 0x147   : > { %p6457_p4 = pnand %p6456_p3, %p6450_p12 }
 0x149   : > { %6460 = shalt.err (!%p6457_p4)
}
 0x14a   : > { %s7818_s23 = sld [smem:[#allocation68_spill]]  ;;  %s6683_s2 = smov [#allocation37]  }
 0x14b   : > { %s1095_s12 = sshll.u32 %s6683_s2, 4  ;;  %s1096_s12 = int_to_ptr.vmem [resolvable:$true] %s1095_s12 }
 0x14c   : > { %s6472_s3 = scalar_lea.vmem %s1096_s12, 16  ;;  %s6479_s19 = scalar_lea.vmem %s1096_s12, 32 }
 0x14d   : > { %p6473_p0 = scmp.ne.s32.totalorder %s1096_s12, %s6472_s3  ;;  %p6480_p9 = scmp.lt.s32.totalorder %s1096_s12, %s1096_s12 }
 0x14e   : > { %p6481_p8 = scmp.lt.s32.totalorder %s6479_s19, %s6472_s3 }
 0x14f   : > { %p6475_p2 = pnand %p6473_p0, %p6927_p7 }
 0x150   : > { %5653 = dma.hbm_to_vmem [thread:$0]  (!%p6919_p6), %s7818_s23, 16, %s1074_s9, [#allocation33]  }
 0x151   : > { %p6476_p5 = pneg %p6475_p2  ;;  %p6482_p11 = por %p6481_p8, %p6480_p9 }
 0x153   : > { %p6483_p10 = pnand %p6482_p11, %p6476_p5 }
 0x155   : > { %6486 = shalt.err (!%p6483_p10)
}
 0x156   : > { %s7819_s8 = sld [smem:[#allocation70_spill]]  ;;  %s5021_s15 = sadd.s32 4294967294, %s6623_s11  }
 0x157   : > { %s7073_s16 = sadd.s32 1, %s6623_s11   ;;  %s101_s9 = sadd.s32 1, %s6619_s0 }
 0x158   : > { %s98_s28 = ssub.s32 %s6623_s11, %s7073_s16  ;;  %s7820_s30 = sld [smem:[#allocation52_spill]] }
 0x159   : > { %p99_p7 = scmp.eq.s32.totalorder %s98_s28, 0  ;;  %p108_p12 = scmp.ne.s32.totalorder %s6619_s0, %s6615_s10 }
 0x15a   : > { %p109_p13 = scmp.eq.s32.totalorder %s6623_s11, 0  ;;  %p114_p1 = scmp.ne.s32.totalorder %s6615_s10, %s6611_s7 }
 0x15b   : > { %s7084_s6 = scalar_select %p99_p7, %s6619_s0, %s101_s9  }
 0x15c   : > { %5659 = dma.hbm_to_vmem [thread:$0]  (!%p6919_p6), %s7819_s8, 16, %s1096_s12, [#allocation36]  }
 0x15d   : > { %p7086_p3 = por %p109_p13, %p108_p12  ;;  %p7822_p4 = scmp.eq.s32.totalorder %s6905_s18, 0 }
 0x15e   : > { %p810_p0 = scmp.eq.s32.totalorder %s6905_s18, 1  ;;  %p816_p2 = scmp.eq.s32.totalorder %s5021_s15, 1 }
 0x15f   : > { %p7092_p6 = por %p7822_p4, %p114_p1  ;;  %p5690_p5 = scmp.lt.s32.totalorder %s6623_s11, 2 }
 0x160   : > { %s1124_s23 = sand.u32 1, %s6619_s0   ;;  %p7099_p9 = por %p810_p0, %p108_p12 }
 0x161   : > { %s7823_s1 = scalar_select %p7092_p6, 1, 0 }
 0x162   : > { %s7824_s2 = scalar_select %p7099_p9, 1, 0 }
 0x163   : > { %p7103_p8 = por %p816_p2, %p114_p1  ;;  %s5046_s3 = sshll.u32 %s1124_s23, 3 }
 0x164   : > { %s5047_s19 = sshll.u32 %s6623_s11, 7  ;;  %s1128_s15 = scalar_lea.vmem [#allocation2], %s5046_s3 }
 0x165   : > { %s7825_s12 = scalar_select %p7103_p8, 1, 0 }
 0x166   : > { %s7109_s8 = scalar_lea.hbm %s7820_s30, %s5047_s19  ;;  %s1135_s28 = sshll.u32 %s1128_s15, 4  ;;  %s1136_s28 = int_to_ptr.vmem [resolvable:$true] %s1135_s28 }
 0x167   : > { %p7113_p11 = pnand %p5690_p5, %p7086_p3  ;;  %s1125_s5 = scalar_lea.sflag [#allocation3], %s1124_s23 }
 0x168   : > { %s6487_s13 = scalar_lea.hbm %s7109_s8, 128  ;;  %s6492_s19 = scalar_lea.hbm %s7820_s30, 256 }
 0x169   : > { %s7826_s9 = scalar_select %p7113_p11, 1, 0 }
 0x16a   : > { %p6488_p10 = scmp.ne.s32.totalorder %s7109_s8, %s6487_s13  ;;  %p6489_p7 = pneg %p7113_p11 }
 0x16b   : > { %p6493_p1 = scmp.lt.s32.totalorder %s7109_s8, %s7820_s30  ;;  %p6494_p4 = scmp.lt.s32.totalorder %s6492_s19, %s6487_s13 }
 0x16c   : > { %p6490_p12 = pnand %p6489_p7, %p6488_p10 }
 0x16d   : > { %p6495_p0 = por %p6494_p4, %p6493_p1 }
 0x16e   : > { %p6491_p13 = pneg %p6490_p12 }
 0x170   : > { %p6496_p2 = pnand %p6495_p0, %p6491_p13 }
 0x172   : > { %6499 = shalt.err (!%p6496_p2)
}
 0x173   : > { %s6500_s3 = scalar_lea.vmem %s1136_s28, 128  ;;  %s6684_s26 = smov [#allocation2]  }
 0x174   : > { %p6501_p8 = scmp.ne.s32.totalorder %s1136_s28, %s6500_s3  ;;  %s6505_s15 = sshll.u32 %s6684_s26, 4  ;;  %s6506_s15 = int_to_ptr.vmem [resolvable:$false] %s6505_s15 }
 0x175   : > { %s6507_s23 = scalar_lea.vmem %s6506_s15, 256  ;;  %p6508_p9 = scmp.lt.s32.totalorder %s1136_s28, %s6506_s15 }
 0x176   : > { %p6503_p3 = pnand %p6501_p8, %p6489_p7  ;;  %p6509_p6 = scmp.lt.s32.totalorder %s6507_s23, %s6500_s3 }
 0x178   : > { %p6504_p5 = pneg %p6503_p3  ;;  %p6510_p11 = por %p6509_p6, %p6508_p9 }
 0x17a   : > { %p6511_p10 = pnand %p6510_p11, %p6504_p5 }
 0x17c   : > { %6514 = shalt.err (!%p6511_p10)
}
 0x17d   : > { %p7827_p12 = scmp.ne.s32.totalorder %s7826_s9, 0  ;;  %p7828_p13 = scmp.ne.s32.totalorder %s7799_s22, 0 }
 0x17e   : > { %s7130_s13 = sand.u32 (!%p7828_p13), 1, %s6615_s10   ;;  %p7829_p6 = scmp.ne.s32.totalorder (!%p7828_p13), %s7823_s1, 0 }
 0x17f   : > { %5663 = dma.hbm_to_vmem [thread:$0]  (!%p7827_p12), %s7109_s8, 128, %s1136_s28, %s1125_s5  }
 0x180   : > { %1144 = sbr.rel (%p7828_p13) target bundleno = 3327 (0xcff), region = 152  ;;  %s7769_s19 = sshll.u32 (!%p7828_p13), %s7130_s13, 3 }
 0x181   : > { %s1147_s26 = scalar_lea.sflag (!%p7828_p13), [#allocation3], %s7130_s13  ;;  %s7136_s3 = scalar_lea.vmem (!%p7828_p13), [#allocation2], %s7769_s19 }
 0x185   : > { %6558 = dma.done.wait (%p7829_p6), %s1147_s26, 128  }
 0x186   : > { %6560 = vsyncadd (%p7829_p6), %s1147_s26, 4294967168  ;;  %p7830_p9 = scmp.eq.s32.totalorder %s6905_s18, 0 }
 0x188   : > { %6562 = dma.done.wait (%p7830_p9), [#allocation6], 272   ;;  %p7831_p8 = pmov %p7830_p9 }
 0x18a   : > { %6564 = vsyncadd (%p7831_p8), [#allocation6], 4294967024  ;;  %p7832_p11 = pmov %p7831_p8 }
 0x18b   : > { %p7833_p7 = pmov %p7831_p8 }
 0x18c   : > { %6566 = dma.done.wait (%p7832_p11), [#allocation9], 784  }
 0x18d   : > { %6568 = vsyncadd (%p7833_p7), [#allocation9], 4294966512  ;;  %p7834_p1 = pmov %p7833_p7 }
 0x18f   : > { %6570 = dma.done.wait (%p7834_p1), [#allocation12], 528   ;;  %p7835_p4 = pmov %p7834_p1 }
 0x190   : > { %p7836_p0 = pmov %p7834_p1 }
 0x191   : > { %6572 = vsyncadd (%p7835_p4), [#allocation12], 4294966768 }
 0x192   : > { %6574 = dma.done.wait (%p7836_p0), [#allocation15], 32   ;;  %p7837_p2 = pmov %p7836_p0 }
 0x193   : > { %p7838_p3 = pmov %p7836_p0 }
 0x194   : > { %6576 = vsyncadd (%p7837_p2), [#allocation15], 4294967264 }
 0x195   : > { %6578 = dma.done.wait (%p7838_p3), [#allocation18], 96   ;;  %p7839_p5 = pmov %p7836_p0 }
 0x196   : > { %p7840_p10 = pmov %p7836_p0 }
 0x197   : > { %6580 = vsyncadd (%p7839_p5), [#allocation18], 4294967200 }
 0x198   : > { %6582 = dma.done.wait (%p7840_p10), [#allocation21], 32   ;;  %p7841_p12 = pmov %p7836_p0 }
 0x199   : > { %p7842_p13 = pmov %p7836_p0 }
 0x19a   : > { %6584 = vsyncadd (%p7841_p12), [#allocation21], 4294967264 }
 0x19b   : > { %6586 = dma.done.wait (%p7842_p13), [#allocation24], 112   ;;  %p7843_p6 = pmov %p7836_p0 }
 0x19c   : > { %p7844_p9 = pmov %p7836_p0 }
 0x19d   : > { %6588 = vsyncadd (%p7843_p6), [#allocation24], 4294967184 }
 0x19e   : > { %6590 = dma.done.wait (%p7844_p9), [#allocation27], 64   ;;  %p7845_p8 = pmov %p7836_p0 }
 0x19f   : > { %p7846_p11 = pmov %p7836_p0 }
 0x1a0   : > { %6592 = vsyncadd (%p7845_p8), [#allocation27], 4294967232 }
 0x1a1   : > { %6594 = dma.done.wait (%p7846_p11), [#allocation30], 80   ;;  %p7847_p7 = pmov %p7836_p0 }
 0x1a2   : > { %p7848_p1 = pmov %p7836_p0 }
 0x1a3   : > { %6596 = vsyncadd (%p7847_p7), [#allocation30], 4294967216 }
 0x1a4   : > { %6598 = dma.done.wait (%p7848_p1), [#allocation33], 272   ;;  %p7849_p4 = pmov %p7836_p0 }
 0x1a6   : > { %6600 = vsyncadd (%p7849_p4), [#allocation33], 4294967024 }
 0x1a7   : > { %6602 = dma.done.wait (%p7836_p0), [#allocation36], 32   ;;  %p7850_p2 = pmov %p7836_p0 }
 0x1a8   : > { %s7851_s5 = sld [smem:[#allocation55_spill]]  ;;  %v6685_v0 = vmov 0.0   ;;  %vm6686_vm0 = vmmov 0   ;;  %v5830_v1 = vld [vmem:[#allocation5 + $0x8] sm:$0xff]   ;;  %v5831_v2 = vld [vmem:[#allocation5] sm:$0xff]   ;;  %v7193_v3 = vld [vmem:[%s7136_s3] sm:$0xff] }
 0x1a9   : > { %6604 = vsyncadd (%p7850_p2), [#allocation36], 4294967264  ;;  %5277 = vmatprep.subr.bf16.mxu0 %v6685_v0  ;;  %5281 = vmatprep.mubr.msk.bf16.mxu0 %vm6686_vm0, %v6685_v0  ;;  %vm1347_vm1 = vcmask 261120   ;;  %v1323_v5 = vpack.c.bf16 %v7193_v3, %v7193_v3  ;;  %v5073_v9 = vld [vmem:[#allocation7] ss:$0 sm:$0xff]  ;;  %vm1525_vm2 = vcmask 1043456  }
 0x1aa   : > { %5285 = vmatprep.subr.bf16.mxu1 %v6685_v0  ;;  %5289 = vmatprep.mubr.msk.bf16.mxu1 %vm6686_vm0, %v6685_v0  ;;  %vm1526_vm3 = vsmask.f32 3328  ;;  %s6687_s22 = smov 96   ;;  %vm1400_vm4 = vcmask 1040384   ;;  %vm1401_vm5 = vsmask.f32 256 }
 0x1ab   : > { %5278 = vmatpush3.bf16.msra.mxu0 %v5830_v1  ;;  %vm1527_vm6 = vmand %vm1525_vm2, %vm1526_vm3  ;;  %v5838_v25 = vld [vmem:[#allocation10 + $0x18] sm:$0xff]   ;;  %v5840_v28 = vld [vmem:[#allocation10 + $0x8] sm:$0xff]   ;;  %v2047_v31 = vrot.slane %v7193_v3, 7  ;;  %v2051_v35 = vrot.slane %v7193_v3, 1  ;;  %vm2053_vm8 = vcmask 1046528   ;;  %s6688_s1 = smov 32  }
 0x1ac   : > { %5279 = vmatprep.subr.bf16.mxu0 %v6685_v0  ;;  %vm7225_vm7 = vmand %vm1400_vm4, %vm1401_vm5  ;;  %v5839_v29 = vld [vmem:[#allocation10 + $0x10] sm:$0xff]   ;;  %v5842_v30 = vld [vmem:[#allocation10] sm:$0xff]   ;;  %s7854_s8 = sld [smem:[#allocation58_spill]]  ;;  %vm2154_vm9 = vcmask 523264   ;;  %s6690_s9 = smov 120   ;;  %vm3260_vm10 = vcmask 31744  }
 0x1ad   : > { %v7244_v32 = vsel %vm1400_vm4, 0.0, %v2047_v31  ;;  %v5127_v33 = vld [vmem:[#allocation19] ss:$0 sm:$0xff]  ;;  %v5128_v34 = vld [vmem:[#allocation19 + $0x1] ss:$0 sm:$0xff]  ;;  %v7249_v38 = vsel %vm2053_vm8, %v2051_v35, 0.0 }
 0x1ae   : > { %v5832_v4 = vld [vmem:[%s7851_s5 + $0x18] sm:$0xff]   ;;  %v5833_v6 = vld [vmem:[%s7851_s5 + $0x10] sm:$0xff]   ;;  %v5834_v7 = vld [vmem:[%s7851_s5 + $0x8] sm:$0xff]   ;;  %v2099_v36 = vmul.f32 %v5127_v33, %v7244_v32  ;;  %v2106_v37 = vmul.f32 %v5128_v34, %v7193_v3  ;;  %s7855_s28 = sld [smem:[#allocation63_spill]]  ;;  %s6691_s15 = smov 124   ;;  %vm3629_vm11 = vcmask 64512  }
 0x1af   : > { %5286 = vmatpush3.bf16.msra.mxu1 %v5832_v4  ;;  %5280 = vmatpush3.bf16.msra.mxu0 %v5831_v2  ;;  %v5836_v8 = vld [vmem:[%s7851_s5] sm:$0xff]   ;;  %v5835_v13 = vld [vmem:[%s7851_s5 + $0x28] sm:$0xff]   ;;  %v5845_v63 = vld [vmem:[#allocation13] sm:$0xff]   ;;  %s6692_s23 = smov 112   ;;  %s6693_s26 = smov 116   ;;  %vm4397_vm12 = vcmask 97280  }
 0x1b0   : > { %5287 = vmatprep.subr.bf16.mxu1 %v6685_v0  ;;  %5293 = vmatprep.subr.bf16.mxu0 %v6685_v0  ;;  %v5837_v19 = vld [vmem:[%s7851_s5 + $0x20] sm:$0xff]   ;;  %v2107_v39 = vadd.f32 %v2106_v37, %v2099_v36  ;;  %v5841_v54 = vld [vmem:[#allocation10 + $0x28] sm:$0xff]   ;;  %s7856_s19 = sld [smem:[#allocation67_spill]]  ;;  %vm4399_vm13 = vcmask 130048   ;;  %vm4401_vm14 = vcmask 162816   ;;  %vm4403_vm15 = vcmask 195584  }
 0x1b1   : > { %v5129_v40 = vld [vmem:[#allocation19 + $0x2] ss:$0 sm:$0xff]  ;;  %v5130_v43 = vld [vmem:[#allocation22] ss:$0 sm:$0xff]  ;;  %v5848_v57 = vld [vmem:[#allocation13 + $0x18] sm:$0xff]   ;;  %s7860_s4 = sld [smem:[#allocation74_spill]] }
 0x1b2   : > { %5282 = vmatmul.mubr.msk.bf16.vlgmr.msra.gmra.mxu0 %vm1347_vm1, %v1323_v5  ;;  %v2114_v41 = vmul.f32 %v5129_v40, %v7249_v38  ;;  %v5843_v56 = vld [vmem:[#allocation10 + $0x20] sm:$0xff]   ;;  %v5126_v35 = vld [vmem:[#allocation20] ss:$0 sm:$0xff]  ;;  %v5137_v37 = vld [vmem:[#allocation26] ss:$0 sm:$0xff]  ;;  %s4696_s5 = scalar_lea.sflag [#allocation4], %s7130_s13 }
 0x1b3   : > { %5297 = vmatprep.mubr.msk.bf16.mxu0 %vm6686_vm0, %v6685_v0  ;;  %5288 = vmatpush3.bf16.msra.mxu1 %v5833_v6  ;;  %v5844_v59 = vld [vmem:[#allocation13 + $0x8] sm:$0xff]   ;;  %v5849_v62 = vld [vmem:[#allocation13 + $0x10] sm:$0xff]   ;;  %p7865_p5 = scmp.ne.s32.totalorder %s7824_s2, 0 }
 0x1b4   : > { %5301 = vmatprep.subr.bf16.mxu1 %v6685_v0  ;;  %5294 = vmatpush3.bf16.msra.mxu0 %v5834_v7  ;;  %v2115_v42 = vadd.f32 %v2114_v41, %v2107_v39  ;;  %v5846_v1 = vld [vmem:[%s7854_s8 + $0x8] sm:$0xff]   ;;  %v5847_v2 = vld [vmem:[%s7854_s8] sm:$0xff]   ;;  %v2251_v41 = vmul.f32 %v5137_v37, %v7244_v32 }
 0x1b5   : > { %5295 = vmatprep.subr.bf16.mxu0 %v6685_v0  ;;  %v5138_v39 = vld [vmem:[#allocation26 + $0x1] ss:$0 sm:$0xff] }
 0x1b6   : > { %v2123_v44 = vadd.f32 %v5130_v43, %v2115_v42  ;;  %v2258_v42 = vmul.f32 %v5138_v39, %v7193_v3 }
 0x1b8   : > { %5296 = vmatpush3.bf16.msra.mxu0 %v5836_v8  ;;  %v2134_v45 = vmul.f32 %v2123_v44, %v2123_v44  ;;  %v2133_v51 = vmul.f32 0.5, %v2123_v44 }
 0x1b9   : > { %5309 = vmatprep.subr.bf16.mxu0 %v6685_v0 }
 0x1ba   : > { %v2135_v46 = vmul.f32 %v2134_v45, %v2123_v44 }
 0x1bc   : > { %v2136_v47 = vmul.f32 0.044715, %v2135_v46  ;;  %v5139_v46 = vld [vmem:[#allocation26 + $0x2] ss:$0 sm:$0xff] }
 0x1be   : > { %v2137_v48 = vadd.f32 %v2136_v47, %v2123_v44  ;;  %v2259_v44 = vadd.f32 %v2258_v42, %v2251_v41  ;;  %v2266_v47 = vmul.f32 %v5139_v46, %v7249_v38  ;;  %v5133_v42 = vld [vmem:[#allocation25] ss:$0 sm:$0xff]  ;;  %v5135_v46 = vld [vmem:[#allocation25 + $0x2] ss:$0 sm:$0xff] }
 0x1c0   : > { %v2138_v49 = vmul.f32 0.7978846, %v2137_v48  ;;  %v5140_v48 = vld [vmem:[#allocation29] ss:$0 sm:$0xff] }
 0x1c2   : > { %5860 = vtanh.f32 %v2138_v49  ;;  %v2267_v49 = vadd.f32 %v2266_v47, %v2259_v44  ;;  %v2220_v44 = vmul.f32 %v5133_v42, %v7244_v32 }
 0x1cf   : > { %v5861_v50 = vpop.eup %5860 }
 0x1d0   : > { %v2140_v52 = vadd.f32 1.0, %v5861_v50 }
 0x1d2   : > { %v2141_v53 = vmul.f32 %v2140_v52, %v2133_v51  ;;  %v2275_v51 = vadd.f32 %v5140_v48, %v2267_v49  ;;  %v2235_v48 = vmul.f32 %v5135_v46, %v7249_v38  ;;  %v6698_v46 = vmov 1983009808  }
 0x1d4   : > { %v2286_v52 = vmul.f32 %v2275_v51, %v2275_v51 }
 0x272   : > { %v1385_v10 = vpop.f32.mrf.mxu0 }
 0x273   : > { %v1386_v11 = vadd.f32 %v5073_v9, %v1385_v10 }
 0x274   : > { %v5283_v12 = vpop.f32.mrf.mxu0 }
 0x275   : > { %v7211_v14 = vpack.c.bf16 %v1386_v11, %v1386_v11  ;;  %v5094_v11 = vld [vmem:[#allocation8] ss:$0 sm:$0xff] }
 0x276   : > { %v1388_v15 = vpop.f32.mrf.mxu0 }
 0x277   : > { %1613 = vrot.lane.b32.xlu0 %v7211_v14, %s6687_s22  ;;  %5290 = vmatmul.mubr.msk.bf16.vlgmr.msra.gmra.mxu1 %vm1347_vm1, %v7211_v14  ;;  %v1393_v16 = vshrl.u32 %v7211_v14, 16  ;;  %v1396_v17 = vshll.u32 %v7211_v14, 16 }
 0x278   : > { %v5284_v18 = vpop.f32.mrf.mxu0  ;;  %5302 = vmatpush3.bf16.msra.mxu1 %v5835_v13  ;;  %5305 = vmatprep.mubr.msk.bf16.mxu1 %vm6686_vm0, %v6685_v0 }
 0x279   : > { %5303 = vmatprep.subr.bf16.mxu1 %v6685_v0  ;;  %v1395_v20 = vrot.slane %v1393_v16, 7  ;;  %v1522_v21 = vrot.slane %v1396_v17, 1 }
 0x27b   : > { %v1398_v23 = vor.u32 %v1396_v17, %v1395_v20  ;;  %v1523_v24 = vor.u32 %v1522_v21, %v1393_v16  ;;  %v5850_v20 = vld [vmem:[%s7854_s8 + $0x18] sm:$0xff]  }
 0x27c   : > { %5304 = vmatpush3.bf16.msra.mxu1 %v5837_v19 }
 0x27d   : > { %1599 = vrot.lane.b32.xlu0 %v1398_v23, %s6687_s22  ;;  %v1528_v26 = vsel %vm1527_vm6, %v1523_v24, 0  ;;  %v1403_v27 = vsel %vm7225_vm7, 0, %v1398_v23  ;;  %5317 = vmatprep.subr.bf16.mxu1 %v6685_v0  ;;  %v5851_v23 = vld [vmem:[%s7854_s8 + $0x10] sm:$0xff]   ;;  %v2148_v24 = vld [vmem:[%s7855_s28] sm:$0xff]  ;;  %s6696_s28 = smov 100  }
 0x27e   : > { %1731 = vrot.lane.b32.xlu1 %v1528_v26, %s6687_s22  ;;  %5298 = vmatmul.mubr.msk.bf16.vlgmr.msra.gmra.mxu0 %vm1347_vm1, %v1403_v27  ;;  %v5124_v27 = vld [vmem:[#allocation17 + $0x1] ss:$0 sm:$0xff]  ;;  %s6694_s22 = smov 104  }
 0x27f   : > { %5306 = vmatmul.mubr.msk.bf16.vlgmr.msra.gmra.mxu1 %vm1347_vm1, %v1528_v26  ;;  %5310 = vmatpush3.bf16.msra.mxu0 %v5838_v25  ;;  %v6689_v25 = vmov 0   ;;  %v5123_v26 = vld [vmem:[#allocation17] ss:$0 sm:$0xff] }
 0x280   : > { %5311 = vmatprep.subr.bf16.mxu0 %v6685_v0  ;;  %5313 = vmatprep.mubr.msk.bf16.mxu0 %vm6686_vm0, %v6685_v0 }
 0x281   : > { %5318 = vmatpush3.bf16.msra.mxu1 %v5840_v28  ;;  %5321 = vmatprep.mubr.msk.bf16.mxu1 %vm6686_vm0, %v6685_v0  ;;  %v2068_v28 = vmul.f32 %v5123_v26, %v7244_v32 }
 0x282   : > { %5319 = vmatprep.subr.bf16.mxu1 %v6685_v0  ;;  %2143 = vrot.lane.b32.xlu1 %v2141_v53, %s6688_s1 }
 0x283   : > { %5312 = vmatpush3.bf16.msra.mxu0 %v5839_v29  ;;  %5828 = vset.pattern.permute.xlu0 %v6689_v25  ;;  %v2075_v29 = vmul.f32 %v5124_v27, %v7193_v3 }
 0x284   : > { %5325 = vmatprep.subr.bf16.mxu0 %v6685_v0  ;;  %2151 = vperm.xlu0 %5828, %v2148_v24  }
 0x285   : > { %5320 = vmatpush3.bf16.msra.mxu1 %v5842_v30  ;;  %5829 = vset.pattern.permute.xlu1 %v6689_v25  ;;  %v5125_v30 = vld [vmem:[#allocation17 + $0x2] ss:$0 sm:$0xff]  ;;  %v2076_v31 = vadd.f32 %v2075_v29, %v2068_v28 }
 0x286   : > { %5333 = vmatprep.subr.bf16.mxu1 %v6685_v0  ;;  %v2083_v33 = vmul.f32 %v5125_v30, %v7249_v38  ;;  %v2055_v30 = vld [vmem:[#allocation23] sm:$0xf]  ;;  %v2207_v38 = vld [vmem:[#allocation31] sm:$0xf] }
 0x288   : > { %v2084_v34 = vadd.f32 %v2083_v33, %v2076_v31 }
 0x28a   : > { %v2092_v36 = vadd.f32 %v5126_v35, %v2084_v34 }
 0x28c   : > { %v2125_v40 = vmul.f32 %v2092_v36, %v2092_v36 }
 0x28e   : > { %v2126_v43 = vmul.f32 %v2125_v40, %v2092_v36 }
 0x290   : > { %v2127_v45 = vmul.f32 0.044715, %v2126_v43  ;;  %v5134_v43 = vld [vmem:[#allocation25 + $0x1] ss:$0 sm:$0xff] }
 0x292   : > { %v2128_v50 = vadd.f32 %v2127_v45, %v2092_v36  ;;  %v2227_v45 = vmul.f32 %v5134_v43, %v7193_v3 }
 0x294   : > { %v2129_v53 = vmul.f32 0.7978846, %v2128_v50  ;;  %v2228_v47 = vadd.f32 %v2227_v45, %v2220_v44  ;;  %v5136_v50 = vld [vmem:[#allocation28] ss:$0 sm:$0xff]  ;;  %v2300_v45 = vld [vmem:[%s7856_s19] sm:$0xff]  ;;  %s6697_s19 = smov 64  }
 0x296   : > { %5862 = vtanh.f32 %v2129_v53  ;;  %v2236_v49 = vadd.f32 %v2235_v48, %v2228_v47  ;;  %v2383_v47 = vunpack.c.l.s4 %v6698_v46 }
 0x2e9   : > { %v1614_v55 = vpop.permute.xlu0 %1613 }
 0x2ea   : > { %5314 = vmatmul.mubr.msk.bf16.vlgmr.msra.gmra.mxu0 %vm1347_vm1, %v1614_v55 }
 0x2eb   : > { %5326 = vmatpush3.bf16.msra.mxu0 %v5841_v54  ;;  %5329 = vmatprep.mubr.msk.bf16.mxu0 %vm6686_vm0, %v6685_v0  ;;  %v2287_v54 = vmul.f32 %v2286_v52, %v2275_v51 }
 0x2ec   : > { %5327 = vmatprep.subr.bf16.mxu0 %v6685_v0 }
 0x2ef   : > { %v1600_v58 = vpop.permute.xlu0 %1599  ;;  %5328 = vmatpush3.bf16.msra.mxu0 %v5843_v56 }
 0x2f0   : > { %v1602_v60 = vsel %vm7225_vm7, 0, %v1600_v58  ;;  %v1732_v61 = vpop.permute.xlu1 %1731  ;;  %5341 = vmatprep.subr.bf16.mxu0 %v6685_v0  ;;  %v5863_v58 = vpop.eup %5862 }
 0x2f1   : > { %5322 = vmatmul.mubr.msk.bf16.vlgmr.msra.gmra.mxu1 %vm1347_vm1, %v1602_v60  ;;  %v2131_v60 = vadd.f32 1.0, %v5863_v58 }
 0x2f2   : > { %5330 = vmatmul.mubr.msk.bf16.vlgmr.msra.gmra.mxu0 %vm1347_vm1, %v1732_v61  ;;  %5334 = vmatpush3.bf16.msra.mxu1 %v5848_v57 }
 0x2f3   : > { %5342 = vmatpush3.bf16.msra.mxu0 %v5844_v59  ;;  %5345 = vmatprep.mubr.msk.bf16.mxu0 %vm6686_vm0, %v6685_v0  ;;  %v2124_v59 = vmul.f32 0.5, %v2092_v36 }
 0x2f4   : > { %5343 = vmatprep.subr.bf16.mxu0 %v6685_v0  ;;  %5335 = vmatprep.subr.bf16.mxu1 %v6685_v0 }
 0x2f5   : > { %5337 = vmatprep.mubr.msk.bf16.mxu1 %vm6686_vm0, %v6685_v0 }
 0x2f6   : > { %5336 = vmatpush3.bf16.msra.mxu1 %v5849_v62  ;;  %v2285_v62 = vmul.f32 0.5, %v2275_v51 }
 0x2f7   : > { %5344 = vmatpush3.bf16.msra.mxu0 %v5845_v63  ;;  %5349 = vmatprep.subr.bf16.mxu1 %v6685_v0 }
 0x2f8   : > { %5357 = vmatprep.subr.bf16.mxu0 %v6685_v0 }
 0x2fa   : > { %5346 = vmatmul.mubr.msk.bf16.vlgmr.msra.gmra.mxu0 %vm1347_vm1, %v7211_v14 }
 0x2fb   : > { %5358 = vmatpush3.bf16.msra.mxu0 %v5846_v1  ;;  %5361 = vmatprep.mubr.msk.bf16.mxu0 %vm6686_vm0, %v6685_v0 }
 0x2fc   : > { %5359 = vmatprep.subr.bf16.mxu0 %v6685_v0 }
 0x2ff   : > { %5360 = vmatpush3.bf16.msra.mxu0 %v5847_v2 }
 0x300   : > { %5371 = vmatprep.subr.bf16.mxu0 %v6685_v0 }
 0x302   : > { %5362 = vmatmul.mubr.msk.bf16.vlgmr.msra.gmra.mxu0 %vm1347_vm1, %v1614_v55  ;;  %v2288_v55 = vmul.f32 0.044715, %v2287_v54 }
 0x303   : > { %5373 = vmatprep.mubr.msk.bf16.mxu0 %vm6686_vm0, %v6685_v0 }
 0x304   : > { %v2289_v56 = vadd.f32 %v2288_v55, %v2275_v51  ;;  %v2244_v51 = vadd.f32 %v5136_v50, %v2236_v49  ;;  %v2384_v50 = vunpack.c.0.s8 %v2383_v47 }
 0x306   : > { %v2290_v57 = vmul.f32 0.7978846, %v2289_v56  ;;  %v2277_v52 = vmul.f32 %v2244_v51, %v2244_v51 }
 0x308   : > { %5864 = vtanh.f32 %v2290_v57  ;;  %v2278_v53 = vmul.f32 %v2277_v52, %v2244_v51  ;;  %v2276_v57 = vmul.f32 0.5, %v2244_v51 }
 0x30a   : > { %v2279_v54 = vmul.f32 0.044715, %v2278_v53 }
 0x30c   : > { %v2280_v55 = vadd.f32 %v2279_v54, %v2244_v51  ;;  %v6699_v51 = vmov 1934713408  }
 0x30d   : > { %v2447_v52 = vunpack.c.l.s4 %v6699_v51 }
 0x30e   : > { %v2281_v56 = vmul.f32 0.7978846, %v2280_v55 }
 0x310   : > { %5866 = vtanh.f32 %v2281_v56  ;;  %v2448_v56 = vunpack.c.0.s8 %v2447_v52 }
 0x315   : > { %v5865_v63 = vpop.eup %5864 }
 0x316   : > { %v2292_v2 = vadd.f32 1.0, %v5865_v63 }
 0x31d   : > { %v5867_v58 = vpop.eup %5866 }
 0x337   : > { %v1461_v4 = vpop.f32.mrf.mxu1 }
 0x339   : > { %v5291_v5 = vpop.f32.mrf.mxu1 }
 0x33b   : > { %v1464_v6 = vpop.f32.mrf.mxu1 }
 0x33c   : > { %v2144_v6 = vpop.permute.xlu1 %2143 }
 0x33d   : > { %v5292_v7 = vpop.f32.mrf.mxu1 }
 0x33e   : > { %v1516_v8 = vpop.f32.mrf.mxu0  ;;  %v2293_v7 = vmul.f32 %v2292_v2, %v2285_v62 }
 0x33f   : > { %v1517_v9 = vadd.f32 %v1516_v8, %v1461_v4  ;;  %v1583_v10 = vpop.f32.mrf.mxu1  ;;  %v2132_v4 = vmul.f32 %v2131_v60, %v2124_v59  ;;  %v2283_v59 = vadd.f32 1.0, %v5867_v58 }
 0x340   : > { %v5299_v12 = vpop.f32.mrf.mxu0  ;;  %2295 = vrot.lane.b32.xlu1 %v2293_v7, %s6688_s1  ;;  %s6695_s1 = smov 108  }
 0x341   : > { %v1589_v13 = vadd.f32 %v1583_v10, %v1517_v9  ;;  %v5307_v15 = vpop.f32.mrf.mxu1  ;;  %v2146_v10 = vsel %vm1347_vm1, %v2132_v4, %v2144_v6  ;;  %v2284_v32 = vmul.f32 %v2283_v59, %v2276_v57 }
 0x342   : > { %v1519_v16 = vpop.f32.mrf.mxu0 }
 0x343   : > { %v1597_v17 = vadd.f32 %v5094_v11, %v1589_v13  ;;  %v1586_v18 = vpop.f32.mrf.mxu1  ;;  %v5104_v13 = vld [vmem:[#allocation11] ss:$0 sm:$0xff] }
 0x344   : > { %v5300_v19 = vpop.f32.mrf.mxu0  ;;  %v2147_v18 = vpack.c.bf16 %v2146_v10, %v2146_v10 }
 0x345   : > { %v1598_v21 = vpack.c.bf16 %v1597_v17, %v1597_v17  ;;  %v5308_v22 = vpop.f32.mrf.mxu1 }
 0x346   : > { %v2159_v26 = vsel %vm2154_vm9, %v2147_v18, 0 }
 0x347   : > { %5338 = vmatmul.mubr.msk.bf16.vlgmr.msra.gmra.mxu1 %vm1347_vm1, %v1598_v21 }
 0x348   : > { %5350 = vmatpush3.bf16.msra.mxu1 %v5850_v20  ;;  %5353 = vmatprep.mubr.msk.bf16.mxu1 %vm6686_vm0, %v6685_v0 }
 0x349   : > { %5351 = vmatprep.subr.bf16.mxu1 %v6685_v0 }
 0x34c   : > { %5352 = vmatpush3.bf16.msra.mxu1 %v5851_v23 }
 0x34d   : > { %5365 = vmatprep.subr.bf16.mxu1 %v6685_v0 }
 0x3aa   : > { %v1664_v61 = vpop.f32.mrf.mxu0 }
 0x3ac   : > { %v5315_v1 = vpop.f32.mrf.mxu0 }
 0x3ad   : > { %v5122_v1 = vld [vmem:[#allocation16] ss:$0 sm:$0xff] }
 0x3ae   : > { %v1667_v5 = vpop.f32.mrf.mxu0 }
 0x3b0   : > { %v5316_v8 = vpop.f32.mrf.mxu0 }
 0x3b1   : > { %v1719_v9 = vpop.f32.mrf.mxu1 }
 0x3b2   : > { %v1720_v11 = vadd.f32 %v1719_v9, %v1664_v61  ;;  %v1782_v12 = vpop.f32.mrf.mxu0  ;;  %v2296_v60 = vpop.permute.xlu1 %2295 }
 0x3b3   : > { %v5323_v15 = vpop.f32.mrf.mxu1  ;;  %v2298_v3 = vsel %vm1347_vm1, %v2284_v32, %v2296_v60  ;;  %v2152_v9 = vpop.permute.xlu0 %2151 }
 0x3b4   : > { %v1788_v16 = vadd.f32 %v1782_v12, %v1720_v11  ;;  %v5331_v17 = vpop.f32.mrf.mxu0  ;;  %v2299_v61 = vpack.c.bf16 %v2298_v3, %v2298_v3 }
 0x3b5   : > { %v1722_v19 = vpop.f32.mrf.mxu1  ;;  %v5111_v17 = vld [vmem:[#allocation14] ss:$0 sm:$0xff] }
 0x3b6   : > { %v1796_v20 = vadd.f32 %v5104_v13, %v1788_v16  ;;  %v1785_v21 = vpop.f32.mrf.mxu0  ;;  %v2310_v62 = vsel %vm2154_vm9, %v2299_v61, 0 }
 0x3b7   : > { %v5324_v22 = vpop.f32.mrf.mxu1  ;;  %5372 = vmatpush3.bf16.xpose.msra.mxu0 %v2310_v62 }
 0x3b8   : > { %v1797_v23 = vpack.c.bf16 %v1796_v20, %v1796_v20  ;;  %v5332_v24 = vpop.f32.mrf.mxu0  ;;  %5383 = vmatprep.subr.bf16.mxu0 %v6685_v0  ;;  %v2385_v22 = vlaneseq }
 0x3ba   : > { %v7300_v27 = vpop.f32.mrf.mxu0  ;;  %5354 = vmatmul.mubr.msk.bf16.vlgmr.msra.gmra.mxu1 %vm1347_vm1, %v1797_v23  ;;  %v7351_v23 = vshrl.u32 %v2385_v22, 7 }
 0x3bb   : > { %5366 = vmatpush3.bf16.xpose.msra.mxu1 %v2159_v26  ;;  %5367 = vmatprep.mubr.msk.bf16.mxu1 %vm6686_vm0, %v6685_v0 }
 0x3bc   : > { %v5347_v28 = vpop.f32.mrf.mxu0  ;;  %5377 = vmatprep.subr.bf16.mxu1 %v6685_v0  ;;  %v2662_v24 = vsub.s32 1, %v7351_v23  ;;  %v7355_v26 = vsub.s32 0, %v7351_v23  ;;  %v2697_v42 = vsub.s32 6, %v7351_v23  ;;  %v7382_v55 = vsub.s32 %v2384_v50, %v7351_v23 }
 0x3be   : > { %v1911_v29 = vpop.f32.mrf.mxu0  ;;  %5374 = vmatmul.mubr.msk.bf16.vlgmr.msra.gmra.mxu0 %vm2154_vm9, %v2207_v38 }
 0x3bf   : > { %5385 = vmatprep.mubr.msk.bf16.mxu0 %vm6686_vm0, %v6685_v0 }
 0x3c0   : > { %v5348_v31 = vpop.f32.mrf.mxu0 }
 0x3c1   : > { %v2676_v31 = vsub.s32 3, %v7351_v23 }
 0x3c2   : > { %v2032_v33 = vpop.f32.mrf.mxu0  ;;  %5368 = vmatmul.mubr.msk.bf16.vlgmr.msra.gmra.mxu1 %vm2154_vm9, %v2055_v30 }
 0x3c3   : > { %5379 = vmatprep.mubr.msk.bf16.mxu1 %vm6686_vm0, %v6685_v0 }
 0x3c4   : > { %v5363_v34 = vpop.f32.mrf.mxu0 }
 0x3c6   : > { %v2035_v35 = vpop.f32.mrf.mxu0 }
 0x3c8   : > { %v5364_v36 = vpop.f32.mrf.mxu0 }
 0x3c9   : > { %v2690_v36 = vsub.s32 5, %v7351_v23 }
 0x407   : > { %v1856_v37 = vpop.f32.mrf.mxu1 }
 0x408   : > { %v1909_v16 = vadd.f32 %v7300_v27, %v1856_v37  ;;  %v2683_v37 = vsub.s32 4, %v7351_v23 }
 0x409   : > { %v5339_v39 = vpop.f32.mrf.mxu1 }
 0x40a   : > { %v7333_v19 = vadd.f32 %v5111_v17, %v1909_v16 }
 0x40b   : > { %v1859_v40 = vpop.f32.mrf.mxu1 }
 0x40d   : > { %v5340_v41 = vpop.f32.mrf.mxu1 }
 0x40e   : > { %v2704_v41 = vsub.s32 7, %v7351_v23 }
 0x47a   : > { %v1980_v63 = vpop.f32.mrf.mxu1 }
 0x47b   : > { %v2033_v2 = vadd.f32 %v2032_v33, %v1980_v63  ;;  %v2669_v33 = vsub.s32 2, %v7351_v23 }
 0x47c   : > { %v5355_v4 = vpop.f32.mrf.mxu1 }
 0x47d   : > { %v2045_v5 = vadd.f32 %v5122_v1, %v2033_v2 }
 0x47e   : > { %v1983_v6 = vpop.f32.mrf.mxu1 }
 0x47f   : > { %v7318_v7 = vpack.c.bf16 %v2045_v5, %v2045_v5 }
 0x480   : > { %v5356_v8 = vpop.f32.mrf.mxu1 }
 0x481   : > { %2730 = vrot.lane.b32.xlu0 %v7318_v7, %s6690_s9  ;;  %2727 = vrot.lane.b32.xlu1 %v7318_v7, %s6691_s15 }
 0x482   : > { %v2195_v10 = vpop.f32.mrf.mxu1 }
 0x483   : > { %v2196_v11 = vadd.f32 %v2195_v10, %v2152_v9 }
 0x484   : > { %v5369_v12 = vpop.f32.mrf.mxu1 }
 0x485   : > { %v5132_v13 = vmul.f32 -1.442695, %v2196_v11  ;;  %2736 = vrot.lane.b32.xlu0 %v7318_v7, %s6692_s23  ;;  %2733 = vrot.lane.b32.xlu1 %v7318_v7, %s6693_s26 }
 0x486   : > { %v2198_v15 = vpop.f32.mrf.mxu1 }
 0x487   : > { %5868 = vpow2.f32 %v5132_v13 }
 0x488   : > { %v5370_v18 = vpop.f32.mrf.mxu1 }
 0x489   : > { %2742 = vrot.lane.b32.xlu0 %v7318_v7, %s6694_s22  ;;  %2739 = vrot.lane.b32.xlu1 %v7318_v7, %s6695_s1 }
 0x48d   : > { %2359 = vrot.lane.b32.xlu0 %v7333_v19, %s6691_s15  ;;  %2745 = vrot.lane.b32.xlu1 %v7318_v7, %s6696_s28 }
 0x491   : > { %2365 = vrot.lane.b32.xlu0 %v7333_v19, %s6693_s26  ;;  %2362 = vrot.lane.b32.xlu1 %v7333_v19, %s6690_s9 }
 0x494   : > { %v5869_v20 = vpop.eup %5868 }
 0x495   : > { %v2204_v21 = vadd.f32 1.0, %v5869_v20  ;;  %2371 = vrot.lane.b32.xlu0 %v7333_v19, %s6695_s1  ;;  %2368 = vrot.lane.b32.xlu1 %v7333_v19, %s6692_s23 }
 0x497   : > { %5870 = vrcp.f32 %v2204_v21 }
 0x499   : > { %2377 = vrot.lane.b32.xlu0 %v7333_v19, %s6696_s28  ;;  %2374 = vrot.lane.b32.xlu1 %v7333_v19, %s6694_s22 }
 0x4a4   : > { %v5871_v27 = vpop.eup %5870 }
 0x4a5   : > { %v2652_v28 = vmul.f32 0.5, %v5871_v27 }
 0x4a7   : > { %v2663_v29 = vrot.slane %v2652_v28, %v2662_v24  ;;  %v2656_v30 = vrot.slane %v2652_v28, %v7355_v26  ;;  %v2677_v34 = vrot.slane %v2652_v28, %v2676_v31  ;;  %v2670_v35 = vrot.slane %v2652_v28, %v2669_v33 }
 0x4a8   : > { %v2691_v39 = vrot.slane %v2652_v28, %v2690_v36  ;;  %v2684_v40 = vrot.slane %v2652_v28, %v2683_v37  ;;  %v2705_v43 = vrot.slane %v2652_v28, %v2704_v41  ;;  %v2698_v44 = vrot.slane %v2652_v28, %v2697_v42 }
 0x4a9   : > { %2665 = vbcast.lane.b32.xlu0 %v2663_v29, 256  ;;  %2658 = vbcast.lane.b32.xlu1 %v2656_v30, 256 }
 0x4ad   : > { %2679 = vbcast.lane.b32.xlu0 %v2677_v34, 256  ;;  %2672 = vbcast.lane.b32.xlu1 %v2670_v35, 256 }
 0x4b1   : > { %2693 = vbcast.lane.b32.xlu0 %v2691_v39, 256  ;;  %2686 = vbcast.lane.b32.xlu1 %v2684_v40, 256 }
 0x4b5   : > { %2707 = vbcast.lane.b32.xlu0 %v2705_v43, 256  ;;  %2700 = vbcast.lane.b32.xlu1 %v2698_v44, 256 }
 0x4b9   : > { %2940 = vrot.lane.b32.xlu0 %v7211_v14, %s6691_s15  ;;  %2303 = vperm.xlu1 %5829, %v2300_v45   ;;  %s6702_s15 = smov 4  }
 0x4bd   : > { %2944 = vrot.lane.b32.xlu0 %v7211_v14, %s6693_s26  ;;  %2942 = vrot.lane.b32.xlu1 %v7211_v14, %s6690_s9  ;;  %s6701_s9 = smov 8   ;;  %s6704_s26 = smov 20  }
 0x4c1   : > { %2948 = vrot.lane.b32.xlu0 %v7211_v14, %s6695_s1  ;;  %2946 = vrot.lane.b32.xlu1 %v7211_v14, %s6692_s23  ;;  %s6703_s23 = smov 12   ;;  %s6706_s1 = smov 28  }
 0x4c5   : > { %2952 = vrot.lane.b32.xlu0 %v7211_v14, %s6696_s28  ;;  %2950 = vrot.lane.b32.xlu1 %v7211_v14, %s6694_s22  ;;  %s6705_s22 = smov 16   ;;  %s6707_s28 = smov 24  }
 0x4c9   : > { %2954 = vrot.lane.b32.xlu0 %v7211_v14, %s6697_s19  ;;  %v7386_v14 = vsub.s32 %v2448_v56, %v7351_v23 }
 0x4f3   : > { %v2731_v48 = vpop.permute.xlu0 %2730  ;;  %v2728_v49 = vpop.permute.xlu1 %2727 }
 0x4f7   : > { %v2737_v53 = vpop.permute.xlu0 %2736  ;;  %v2734_v54 = vpop.permute.xlu1 %2733 }
 0x4f8   : > { %v2748_v57 = vcombine.low %v7318_v7, %v2737_v53 }
 0x4fa   : > { %v2755_v32 = vrot.slane %v2748_v57, %v7382_v55 }
 0x4fb   : > { %v2743_v58 = vpop.permute.xlu0 %2742  ;;  %v2740_v59 = vpop.permute.xlu1 %2739 }
 0x4fc   : > { %v2756_v60 = vcombine.low %v2731_v48, %v2743_v58  ;;  %v2782_v61 = vcombine.low %v2728_v49, %v2740_v59 }
 0x4fe   : > { %v2763_v3 = vrot.slane %v2756_v60, %v7382_v55  ;;  %v2789_v7 = vrot.slane %v2782_v61, %v7382_v55 }
 0x4ff   : > { %v2360_v62 = vpop.permute.xlu0 %2359  ;;  %v2746_v38 = vpop.permute.xlu1 %2745 }
 0x500   : > { %v2764_v63 = vcombine.low %v2755_v32, %v2763_v3  ;;  %v2765_v1 = vcombine.high %v2755_v32, %v2763_v3  ;;  %v2790_v2 = vcombine.low %v2734_v54, %v2746_v38 }
 0x502   : > { %v2772_v4 = vrot.slane %v2764_v63, %v7386_v14  ;;  %v2779_v5 = vrot.slane %v2765_v1, %v7386_v14  ;;  %v2797_v6 = vrot.slane %v2790_v2, %v7382_v55 }
 0x503   : > { %v2366_v8 = vpop.permute.xlu0 %2365  ;;  %v2363_v9 = vpop.permute.xlu1 %2362 }
 0x504   : > { %v2780_v10 = vcombine.high %v2772_v4, %v6689_v25  ;;  %v2798_v11 = vcombine.low %v2789_v7, %v2797_v6  ;;  %v2799_v12 = vcombine.high %v2789_v7, %v2797_v6  ;;  %v2396_v13 = vcombine.low %v2360_v62, %v2366_v8 }
 0x505   : > { %v2397_v15 = vcombine.high %v2360_v62, %v2366_v8  ;;  %v2781_v16 = vcombine.high %v2779_v5, %v6689_v25  ;;  %v2820_v17 = vshrl.u32 %v2772_v4, 16  ;;  %v2380_v18 = vcombine.low %v7333_v19, %v2363_v9 }
 0x506   : > { %v2381_v20 = vcombine.high %v7333_v19, %v2363_v9  ;;  %v2836_v21 = vshrl.u32 %v2779_v5, 16  ;;  %v2806_v22 = vrot.slane %v2798_v11, %v7386_v14  ;;  %v2813_v24 = vrot.slane %v2799_v12, %v7386_v14 }
 0x507   : > { %v2404_v27 = vrot.slane %v2396_v13, %v7382_v55  ;;  %v2372_v28 = vpop.permute.xlu0 %2371  ;;  %v2369_v29 = vpop.permute.xlu1 %2368  ;;  %v2828_v30 = vshrl.u32 %v2780_v10, 16  ;;  %v2411_v31 = vrot.slane %v2397_v15, %v7382_v55  ;;  %v2388_v33 = vrot.slane %v2380_v18, %v7382_v55 }
 0x508   : > { %v2395_v34 = vrot.slane %v2381_v20, %v7382_v55  ;;  %v2814_v35 = vcombine.high %v2806_v22, %v6689_v25  ;;  %v2815_v19 = vcombine.high %v2813_v24, %v6689_v25  ;;  %v2818_v36 = vpack.i.b16 %v2806_v22, %v2772_v4 }
 0x509   : > { %v2821_v37 = vshrl.u32 %v2806_v22, 16  ;;  %v2834_v39 = vpack.i.b16 %v2813_v24, %v2779_v5  ;;  %v2837_v40 = vshrl.u32 %v2813_v24, 16  ;;  %v2444_v41 = vcombine.low %v2388_v33, %v2404_v27 }
 0x50a   : > { %v2445_v42 = vcombine.high %v2388_v33, %v2404_v27  ;;  %v2844_v43 = vshrl.u32 %v2781_v16, 16  ;;  %v2826_v44 = vpack.i.b16 %v2814_v35, %v2780_v10  ;;  %v2829_v45 = vshrl.u32 %v2814_v35, 16 }
 0x50b   : > { %v2842_v46 = vpack.i.b16 %v2815_v19, %v2781_v16  ;;  %v2378_v47 = vpop.permute.xlu0 %2377  ;;  %v2822_v48 = vpack.i.b16 %v2821_v37, %v2820_v17  ;;  %v2838_v49 = vpack.i.b16 %v2837_v40, %v2836_v21  ;;  %v2845_v50 = vshrl.u32 %v2815_v19, 16  ;;  %v2375_v57 = vpop.permute.xlu1 %2374 }
 0x50c   : > { %v2452_v51 = vrot.slane %v2444_v41, %v7386_v14  ;;  %v2848_v52 = vcombine.low %v2818_v36, %v2834_v39  ;;  %v2459_v54 = vrot.slane %v2445_v42, %v7386_v14  ;;  %v2460_v56 = vcombine.low %v2395_v34, %v2411_v31 }
 0x50d   : > { %v2856_v53 = vcombine.low %v2826_v44, %v2842_v46  ;;  %v2830_v58 = vpack.i.b16 %v2829_v45, %v2828_v30  ;;  %v2846_v59 = vpack.i.b16 %v2845_v50, %v2844_v43  ;;  %v2461_v60 = vcombine.high %v2395_v34, %v2411_v31 }
 0x50e   : > { %v2428_v32 = vcombine.low %v2372_v28, %v2378_v47  ;;  %v2468_v3 = vrot.slane %v2460_v56, %v7386_v14  ;;  %v5143_v61 = vcombine.low %v2452_v51, %v2459_v54  ;;  %v5145_v62 = vcombine.high %v2452_v51, %v2459_v54 }
 0x50f   : > { %v2429_v38 = vcombine.high %v2372_v28, %v2378_v47  ;;  %v2475_v63 = vrot.slane %v2461_v60, %v7386_v14  ;;  %v2412_v2 = vcombine.low %v2369_v29, %v2375_v57  ;;  %v2413_v4 = vcombine.high %v2369_v29, %v2375_v57 }
 0x510   : > { %v2436_v1 = vrot.slane %v2428_v32, %v7382_v55  ;;  %v2882_v5 = vcombine.low %v2822_v48, %v2838_v49  ;;  %v7413_v7 = vrot.slane %v2848_v52, %v7382_v55  ;;  %v7416_v8 = vrot.slane %v2856_v53, %v7382_v55 }
 0x511   : > { %v2443_v6 = vrot.slane %v2429_v38, %v7382_v55  ;;  %v5147_v9 = vcombine.low %v2468_v3, %v2475_v63  ;;  %v5149_v10 = vcombine.high %v2468_v3, %v2475_v63  ;;  %v2420_v11 = vrot.slane %v2412_v2, %v7382_v55 }
 0x512   : > { %v2427_v12 = vrot.slane %v2413_v4, %v7382_v55  ;;  %v2864_v13 = vcombine.low %v7413_v7, %v7416_v8  ;;  %v2890_v15 = vcombine.low %v2830_v58, %v2846_v59  ;;  %v2524_v16 = vrot.slane %v5143_v61, %v7382_v55 }
 0x513   : > { %v2540_v17 = vrot.slane %v5145_v62, %v7382_v55  ;;  %v2476_v18 = vcombine.low %v2420_v11, %v2436_v1  ;;  %v2477_v20 = vcombine.high %v2420_v11, %v2436_v1  ;;  %v7425_v24 = vrot.slane %v2882_v5, %v7382_v55 }
 0x514   : > { %v2492_v21 = vcombine.low %v2427_v12, %v2443_v6  ;;  %v2493_v22 = vcombine.high %v2427_v12, %v2443_v6  ;;  %v7428_v27 = vrot.slane %v2890_v15, %v7382_v55  ;;  %v2556_v28 = vrot.slane %v5147_v9, %v7382_v55 }
 0x515   : > { %v2572_v29 = vrot.slane %v5149_v10, %v7382_v55  ;;  %v2484_v30 = vrot.slane %v2476_v18, %v7386_v14  ;;  %v2491_v31 = vrot.slane %v2477_v20, %v7386_v14  ;;  %v2872_v33 = vrot.slane %v2864_v13, %v7386_v14 }
 0x516   : > { %v2898_v34 = vcombine.low %v7425_v24, %v7428_v27  ;;  %v2580_v35 = vcombine.low %v2524_v16, %v2540_v17  ;;  %v2500_v36 = vrot.slane %v2492_v21, %v7386_v14  ;;  %v2507_v37 = vrot.slane %v2493_v22, %v7386_v14 }
 0x517   : > { %v2612_v19 = vcombine.low %v2556_v28, %v2572_v29  ;;  %v5144_v42 = vcombine.low %v2484_v30, %v2491_v31  ;;  %v5146_v43 = vcombine.high %v2484_v30, %v2491_v31  ;;  %v2919_v44 = vshrl.u32 %v2872_v33, 16 }
 0x518   : > { %v2906_v39 = vrot.slane %v2898_v34, %v7386_v14  ;;  %v2588_v40 = vrot.slane %v2580_v35, %v7386_v14  ;;  %v2581_v50 = vcombine.high %v2524_v16, %v2540_v17  ;;  %v5148_v51 = vcombine.low %v2500_v36, %v2507_v37 }
 0x519   : > { %v2620_v41 = vrot.slane %v2612_v19, %v7386_v14  ;;  %v5150_v52 = vcombine.high %v2500_v36, %v2507_v37  ;;  %v2613_v53 = vcombine.high %v2556_v28, %v2572_v29  ;;  %v2880_v59 = vcombine.high %v2872_v33, %v6689_v25 }
 0x51a   : > { %v2918_v45 = vpack.i.b16 %v2906_v39, %v2872_v33  ;;  %v2920_v47 = vshrl.u32 %v2906_v39, 16  ;;  %v2914_v54 = vcombine.high %v2906_v39, %v6689_v25  ;;  %v2595_v61 = vrot.slane %v2581_v50, %v7386_v14 }
 0x51b   : > { %v2666_v46 = vpop.permute.xlu0 %2665  ;;  %v2644_v48 = vcombine.low %v2588_v40, %v2620_v41  ;;  %v2659_v49 = vpop.permute.xlu1 %2658  ;;  %v2645_v60 = vcombine.high %v2588_v40, %v2620_v41  ;;  %v7449_v62 = vrot.slane %v5144_v42, %v7382_v55  ;;  %v7452_v38 = vrot.slane %v5146_v43, %v7382_v55 }
 0x51c   : > { %v3265_v56 = vsel %vm3260_vm10, %v2918_v45, 0  ;;  %v2921_v57 = vpack.i.b16 %v2920_v47, %v2919_v44  ;;  %v2627_v1 = vrot.slane %v2613_v53, %v7386_v14  ;;  %v2924_v2 = vpack.i.b16 %v2914_v54, %v2880_v59 }
 0x51d   : > { %v2709_v58 = vmul.f32 %v2659_v49, %v2644_v48  ;;  %5378 = vmatpush3.bf16.xpose.msra.mxu1 %v3265_v56  ;;  %v2710_v63 = vmul.f32 %v2666_v46, %v2645_v60  ;;  %v7456_v4 = vrot.slane %v5148_v51, %v7382_v55  ;;  %v2579_v6 = vrot.slane %v5150_v52, %v7382_v55  ;;  %v2346_v60 = vpop.f32.mrf.mxu0 }
 0x51e   : > { %v3311_v32 = vsel %vm3260_vm10, %v2921_v57, 0  ;;  %5389 = vmatprep.subr.bf16.mxu1 %v6685_v0  ;;  %v2925_v9 = vshrl.u32 %v2880_v59, 16  ;;  %v2926_v10 = vshrl.u32 %v2914_v54, 16  ;;  %v2865_v13 = vcombine.high %v7413_v7, %v7416_v8 }
 0x51f   : > { %v2680_v3 = vpop.permute.xlu0 %2679  ;;  %5384 = vmatpush3.bf16.xpose.msra.mxu0 %v3311_v32  ;;  %v2717_v5 = vpack.c.bf16 %v2709_v58, %v2709_v58  ;;  %v2899_v15 = vcombine.high %v7425_v24, %v7428_v27  ;;  %v2718_v16 = vpack.c.bf16 %v2710_v63, %v2710_v63  ;;  %v2646_v17 = vcombine.low %v2595_v61, %v2627_v1  ;;  %v2673_v18 = vpop.permute.xlu1 %2672 }
 0x520   : > { %5395 = vmatprep.subr.bf16.mxu0 %v6685_v0  ;;  %v2927_v12 = vpack.i.b16 %v2926_v10, %v2925_v9  ;;  %v2596_v20 = vcombine.low %v7449_v62, %v7452_v38  ;;  %v3357_v21 = vsel %vm3260_vm10, %v2924_v2, 0  ;;  %v2628_v22 = vcombine.low %v7456_v4, %v2579_v6 }
 0x521   : > { %v2879_v28 = vrot.slane %v2865_v13, %v7386_v14  ;;  %v2913_v29 = vrot.slane %v2899_v15, %v7386_v14  ;;  %v2647_v7 = vcombine.high %v2595_v61, %v2627_v1  ;;  %v2711_v8 = vmul.f32 %v2673_v18, %v2646_v17 }
 0x522   : > { %v3403_v24 = vsel %vm3260_vm10, %v2927_v12, 0  ;;  %v2604_v33 = vrot.slane %v2596_v20, %v7386_v14  ;;  %v2636_v34 = vrot.slane %v2628_v22, %v7386_v14  ;;  %v2597_v43 = vcombine.high %v7449_v62, %v7452_v38  ;;  %v5375_v38 = vpop.f32.mrf.mxu0 }
 0x523   : > { %v2694_v11 = vpop.permute.xlu0 %2693  ;;  %v2932_v30 = vshrl.u32 %v2913_v29, 16  ;;  %v2712_v31 = vmul.f32 %v2680_v3, %v2647_v7  ;;  %v2930_v35 = vpack.i.b16 %v2913_v29, %v2879_v28  ;;  %v2931_v19 = vshrl.u32 %v2879_v28, 16  ;;  %v2687_v36 = vpop.permute.xlu1 %2686 }
 0x524   : > { %5380 = vmatmul.mubr.msk.bf16.vlgmr.msra.gmra.mxu1 %vm3260_vm10, %v2717_v5  ;;  %v2719_v37 = vpack.c.bf16 %v2711_v8, %v2711_v8  ;;  %v2915_v41 = vcombine.high %v2913_v29, %v6689_v25  ;;  %v2648_v44 = vcombine.low %v2604_v33, %v2636_v34  ;;  %v2629_v45 = vcombine.high %v7456_v4, %v2579_v6  ;;  %v2349_v5 = vpop.f32.mrf.mxu0 }
 0x525   : > { %5390 = vmatpush3.bf16.xpose.msra.mxu1 %v3357_v21  ;;  %5391 = vmatprep.mubr.msk.bf16.mxu1 %vm6686_vm0, %v6685_v0  ;;  %v2933_v40 = vpack.i.b16 %v2932_v30, %v2931_v19  ;;  %v2720_v42 = vpack.c.bf16 %v2712_v31, %v2712_v31  ;;  %v3449_v46 = vsel %vm3260_vm10, %v2930_v35, 0  ;;  %v2881_v47 = vcombine.high %v2879_v28, %v6689_v25 }
 0x526   : > { %5386 = vmatmul.mubr.msk.bf16.vlgmr.msra.gmra.mxu0 %vm3260_vm10, %v2718_v16  ;;  %5401 = vmatprep.subr.bf16.mxu1 %v6685_v0  ;;  %v2649_v48 = vcombine.high %v2604_v33, %v2636_v34  ;;  %v2713_v49 = vmul.f32 %v2687_v36, %v2648_v44  ;;  %v2938_v52 = vshrl.u32 %v2915_v41, 16  ;;  %v2611_v53 = vrot.slane %v2597_v43, %v7386_v14  ;;  %v5376_v12 = vpop.f32.mrf.mxu0 }
 0x527   : > { %v7475_v27 = vpop.permute.xlu0 %2707  ;;  %5396 = vmatpush3.bf16.xpose.msra.mxu0 %v3403_v24  ;;  %5397 = vmatprep.mubr.msk.bf16.mxu0 %vm6686_vm0, %v6685_v0  ;;  %v3495_v50 = vsel %vm3260_vm10, %v2933_v40, 0  ;;  %v2701_v54 = vpop.permute.xlu1 %2700  ;;  %v2643_v57 = vrot.slane %v2629_v45, %v7386_v14  ;;  %v2936_v58 = vpack.i.b16 %v2915_v41, %v2881_v47  ;;  %v2937_v59 = vshrl.u32 %v2881_v47, 16 }
 0x528   : > { %5407 = vmatprep.subr.bf16.mxu0 %v6685_v0  ;;  %v2714_v56 = vmul.f32 %v2694_v11, %v2649_v48  ;;  %v2721_v32 = vpack.c.bf16 %v2713_v49, %v2713_v49  ;;  %v6700_v22 = vmov 1966171168  }
 0x529   : > { %v2939_v61 = vpack.i.b16 %v2938_v52, %v2937_v59  ;;  %v2650_v1 = vcombine.low %v2611_v53, %v2643_v57  ;;  %v3541_v2 = vsel %vm3260_vm10, %v2936_v58, 0  ;;  %v2651_v6 = vcombine.high %v2611_v53, %v2643_v57 }
 0x52a   : > { %v2722_v63 = vpack.c.bf16 %v2714_v56, %v2714_v56  ;;  %v3173_v28 = vunpack.c.l.s4 %v6700_v22 }
 0x52b   : > { %v2941_v39 = vpop.permute.xlu0 %2940  ;;  %v2715_v9 = vmul.f32 %v2701_v54, %v2650_v1  ;;  %v3587_v10 = vsel %vm3260_vm10, %v2939_v61, 0  ;;  %v2716_v13 = vmul.f32 %v7475_v27, %v2651_v6 }
 0x52c   : > { %2956 = vrot.lane.b32.xlu1 %v2941_v39, %s6697_s19  ;;  %5392 = vmatmul.mubr.msk.bf16.vlgmr.msra.gmra.mxu1 %vm3260_vm10, %v2719_v37  ;;  %v3174_v29 = vunpack.c.0.s8 %v3173_v28 }
 0x52d   : > { %5402 = vmatpush3.bf16.xpose.msra.mxu1 %v3449_v46  ;;  %5403 = vmatprep.mubr.msk.bf16.mxu1 %vm6686_vm0, %v6685_v0  ;;  %v2723_v15 = vpack.c.bf16 %v2715_v9, %v2715_v9  ;;  %v2724_v17 = vpack.c.bf16 %v2716_v13, %v2716_v13 }
 0x52e   : > { %5398 = vmatmul.mubr.msk.bf16.vlgmr.msra.gmra.mxu0 %vm3260_vm10, %v2720_v42  ;;  %5413 = vmatprep.subr.bf16.mxu1 %v6685_v0  ;;  %v3177_v7 = vsub.s32 %v3174_v29, %v7351_v23 }
 0x52f   : > { %v2945_v51 = vpop.permute.xlu0 %2944  ;;  %5408 = vmatpush3.bf16.xpose.msra.mxu0 %v3495_v50  ;;  %5409 = vmatprep.mubr.msk.bf16.mxu0 %vm6686_vm0, %v6685_v0 }
 0x530   : > { %2960 = vrot.lane.b32.xlu0 %v2945_v51, %s6697_s19  ;;  %5419 = vmatprep.subr.bf16.mxu0 %v6685_v0 }
 0x533   : > { %v2949_v3 = vpop.permute.xlu0 %2948 }
 0x534   : > { %2964 = vrot.lane.b32.xlu0 %v2949_v3, %s6697_s19  ;;  %v2304_v62 = vpop.permute.xlu1 %2303  ;;  %5404 = vmatmul.mubr.msk.bf16.vlgmr.msra.gmra.mxu1 %vm3260_vm10, %v2721_v32 }
 0x535   : > { %v2347_v4 = vadd.f32 %v2346_v60, %v2304_v62  ;;  %5414 = vmatpush3.bf16.xpose.msra.mxu1 %v3541_v2  ;;  %5415 = vmatprep.mubr.msk.bf16.mxu1 %vm6686_vm0, %v6685_v0 }
 0x536   : > { %5410 = vmatmul.mubr.msk.bf16.vlgmr.msra.gmra.mxu0 %vm3260_vm10, %v2722_v63  ;;  %5425 = vmatprep.subr.bf16.mxu1 %v6685_v0 }
 0x537   : > { %5420 = vmatpush3.bf16.xpose.msra.mxu0 %v3587_v10  ;;  %5421 = vmatprep.mubr.msk.bf16.mxu0 %vm6686_vm0, %v6685_v0  ;;  %v5142_v18 = vmul.f32 -1.442695, %v2347_v4  ;;  %v2953_v1 = vpop.permute.xlu0 %2952 }
 0x538   : > { %v2943_v11 = vpop.permute.xlu1 %2942  ;;  %5431 = vmatprep.subr.bf16.mxu0 %v6685_v0 }
 0x539   : > { %2958 = vrot.lane.b32.xlu1 %v2943_v11, %s6697_s19  ;;  %5872 = vpow2.f32 %v5142_v18 }
 0x53c   : > { %v2947_v16 = vpop.permute.xlu1 %2946  ;;  %5416 = vmatmul.mubr.msk.bf16.vlgmr.msra.gmra.mxu1 %vm3260_vm10, %v2723_v15 }
 0x53d   : > { %2962 = vrot.lane.b32.xlu1 %v2947_v16, %s6697_s19  ;;  %5427 = vmatprep.mubr.msk.bf16.mxu1 %vm6686_vm0, %v6685_v0 }
 0x53e   : > { %5422 = vmatmul.mubr.msk.bf16.vlgmr.msra.gmra.mxu0 %vm3260_vm10, %v2724_v17 }
 0x53f   : > { %5433 = vmatprep.mubr.msk.bf16.mxu0 %vm6686_vm0, %v6685_v0 }
 0x540   : > { %v2951_v58 = vpop.permute.xlu1 %2950 }
 0x546   : > { %v5873_v20 = vpop.eup %5872 }
 0x547   : > { %v2355_v21 = vadd.f32 1.0, %v5873_v20 }
 0x549   : > { %5874 = vrcp.f32 %v2355_v21 }
 0x556   : > { %v5875_v8 = vpop.eup %5874 }
 0x557   : > { %v3178_v24 = vrot.slane %v5875_v8, %v3177_v7  ;;  %v3171_v10 = vcombine.high %v5875_v8, %v5875_v8 }
 0x559   : > { %v3186_v27 = vcombine.high %v3178_v24, %v3178_v24  ;;  %v3194_v30 = vrot.slane %v3178_v24, %v3177_v7  ;;  %v3185_v11 = vrot.slane %v3171_v10, %v3177_v7 }
 0x55b   : > { %v3208_v31 = vrot.slane %v3186_v27, %v3177_v7  ;;  %v3223_v33 = vrot.slane %v3194_v30, %v7355_v26  ;;  %v3216_v12 = vcombine.high %v3194_v30, %v3194_v30  ;;  %v3187_v13 = vcombine.high %v3185_v11, %v3185_v11 }
 0x55c   : > { %v3201_v21 = vrot.slane %v3185_v11, %v3177_v7 }
 0x55d   : > { %v3227_v34 = vrot.slane %v3208_v31, %v7355_v26  ;;  %v3218_v15 = vcombine.high %v3208_v31, %v3208_v31  ;;  %v3231_v16 = vrot.slane %v3216_v12, %v7355_v26  ;;  %v3215_v17 = vrot.slane %v3187_v13, %v3177_v7 }
 0x55e   : > { %v3239_v24 = vrot.slane %v3201_v21, %v7355_v26  ;;  %v3217_v27 = vcombine.high %v3201_v21, %v3201_v21 }
 0x55f   : > { %v3235_v20 = vrot.slane %v3218_v15, %v7355_v26  ;;  %v3243_v28 = vrot.slane %v3215_v17, %v7355_v26  ;;  %v3219_v29 = vcombine.high %v3215_v17, %v3215_v17 }
 0x5e4   : > { %v3301_v35 = vpop.f32.mrf.mxu1 }
 0x5e5   : > { %v7525_v19 = vadd.f32 %v3301_v35, %v3223_v33  ;;  %v3251_v33 = vrot.slane %v3219_v29, %v7355_v26 }
 0x5e6   : > { %v5381_v36 = vpop.f32.mrf.mxu1  ;;  %v3347_v37 = vpop.f32.mrf.mxu0 }
 0x5e7   : > { %v7527_v39 = vadd.f32 %v3347_v37, %v3227_v34  ;;  %v3630_v23 = vsel %vm3629_vm11, %v7525_v19, -inf  ;;  %v3247_v34 = vrot.slane %v3217_v27, %v7355_v26  ;;  %v2957_v26 = vpop.permute.xlu1 %2956 }
 0x5e8   : > { %v3304_v40 = vpop.f32.mrf.mxu1  ;;  %3631 = vmax.xlane.f32.xlu1 %v3630_v23  ;;  %v5387_v41 = vpop.f32.mrf.mxu0 }
 0x5e9   : > { %v3633_v42 = vsel %vm3629_vm11, %v7527_v39, -inf }
 0x5ea   : > { %v5382_v43 = vpop.f32.mrf.mxu1  ;;  %3634 = vmax.xlane.f32.xlu0 %v3633_v42  ;;  %v3350_v44 = vpop.f32.mrf.mxu0 }
 0x5eb   : > { %v2955_v42 = vpop.permute.xlu0 %2954  ;;  %v2959_v43 = vpop.permute.xlu1 %2958 }
 0x5ec   : > { %v5388_v45 = vpop.f32.mrf.mxu0  ;;  %v3393_v46 = vpop.f32.mrf.mxu1 }
 0x5ed   : > { %v7536_v18 = vadd.f32 %v3393_v46, %v3231_v16 }
 0x5ee   : > { %v5393_v47 = vpop.f32.mrf.mxu1  ;;  %v3439_v48 = vpop.f32.mrf.mxu0 }
 0x5ef   : > { %v7539_v22 = vadd.f32 %v3439_v48, %v3235_v20  ;;  %v3636_v30 = vsel %vm3629_vm11, %v7536_v18, -inf  ;;  %v2961_v44 = vpop.permute.xlu0 %2960  ;;  %v2963_v45 = vpop.permute.xlu1 %2962 }
 0x5f0   : > { %v3396_v49 = vpop.f32.mrf.mxu1  ;;  %v5399_v50 = vpop.f32.mrf.mxu0 }
 0x5f1   : > { %v3639_v7 = vsel %vm3629_vm11, %v7539_v22, -inf  ;;  %v2978_v50 = vcombine.low %v2955_v42, %v2963_v45 }
 0x5f2   : > { %v5394_v51 = vpop.f32.mrf.mxu1  ;;  %v3442_v52 = vpop.f32.mrf.mxu0 }
 0x5f3   : > { %v2965_v46 = vpop.permute.xlu0 %2964 }
 0x5f4   : > { %v5400_v53 = vpop.f32.mrf.mxu0  ;;  %v3485_v54 = vpop.f32.mrf.mxu1 }
 0x5f5   : > { %v7547_v31 = vadd.f32 %v3485_v54, %v3239_v24  ;;  %v3012_v54 = vcombine.low %v2957_v26, %v2965_v46 }
 0x5f6   : > { %v5405_v56 = vpop.f32.mrf.mxu1  ;;  %v3531_v57 = vpop.f32.mrf.mxu0 }
 0x5f7   : > { %v7543_v8 = vadd.f32 %v3531_v57, %v3243_v28  ;;  %v3642_v23 = vsel %vm3629_vm11, %v7547_v31, -inf }
 0x5f8   : > { %v3488_v59 = vpop.f32.mrf.mxu1  ;;  %v5411_v60 = vpop.f32.mrf.mxu0 }
 0x5f9   : > { %2966 = vrot.lane.b32.xlu1 %v2951_v58, %s6697_s19  ;;  %v3645_v36 = vsel %vm3629_vm11, %v7543_v8, -inf  ;;  %v2985_v59 = vrot.slane %v2978_v50, %v7382_v55 }
 0x5fa   : > { %v5406_v32 = vpop.f32.mrf.mxu1  ;;  %v3534_v3 = vpop.f32.mrf.mxu0 }
 0x5fb   : > { %v3019_v3 = vrot.slane %v3012_v54, %v7382_v55 }
 0x5fc   : > { %v5412_v61 = vpop.f32.mrf.mxu0  ;;  %v3577_v62 = vpop.f32.mrf.mxu1 }
 0x5fd   : > { %v7557_v37 = vadd.f32 %v3577_v62, %v3247_v34 }
 0x5fe   : > { %v5417_v38 = vpop.f32.mrf.mxu1  ;;  %v3623_v63 = vpop.f32.mrf.mxu0 }
 0x5ff   : > { %v7553_v35 = vadd.f32 %v3623_v63, %v3251_v33  ;;  %v3648_v41 = vsel %vm3629_vm11, %v7557_v37, -inf }
 0x600   : > { %v3580_v2 = vpop.f32.mrf.mxu1  ;;  %2968 = vrot.lane.b32.xlu0 %v2953_v1, %s6697_s19  ;;  %v5423_v4 = vpop.f32.mrf.mxu0  ;;  %s7857_s19 = sld [smem:[#allocation71_spill]] }
 0x601   : > { %v3651_v40 = vsel %vm3629_vm11, %v7553_v35, -inf }
 0x602   : > { %v5418_v5 = vpop.f32.mrf.mxu1  ;;  %v3626_v6 = vpop.f32.mrf.mxu0 }
 0x604   : > { %v5424_v9 = vpop.f32.mrf.mxu0 }
 0x61d   : > { %3637 = vmax.xlane.f32.xlu1 %v3636_v30 }
 0x61f   : > { %3640 = vmax.xlane.f32.xlu0 %v3639_v7 }
 0x621   : > { %3646 = vmax.xlane.f32.xlu1 %v3645_v36 }
 0x623   : > { %3643 = vmax.xlane.f32.xlu0 %v3642_v23 }
 0x625   : > { %3652 = vmax.xlane.f32.xlu1 %v3651_v40 }
 0x627   : > { %3649 = vmax.xlane.f32.xlu0 %v3648_v41 }
 0x671   : > { %v3632_v47 = vpop.xlane.xlu1 %3631 }
 0x672   : > { %v3654_v48 = vsub.f32 %v7525_v19, %v3632_v47 }
 0x673   : > { %v3635_v49 = vpop.xlane.xlu0 %3634 }
 0x674   : > { %v3662_v51 = vmul.f32 1.442695, %v3654_v48  ;;  %v3655_v52 = vsub.f32 %v7527_v39, %v3635_v49 }
 0x675   : > { %v2967_v53 = vpop.permute.xlu1 %2966 }
 0x676   : > { %5876 = vpow2.f32 %v3662_v51  ;;  %v3664_v56 = vmul.f32 1.442695, %v3655_v52  ;;  %v2986_v57 = vcombine.low %v2959_v43, %v2967_v53 }
 0x677   : > { %v2969_v58 = vpop.permute.xlu0 %2968 }
 0x678   : > { %5878 = vpow2.f32 %v3664_v56  ;;  %v2993_v60 = vrot.slane %v2986_v57, %v7382_v55  ;;  %v3020_v32 = vcombine.low %v2961_v44, %v2969_v58 }
 0x67a   : > { %v2994_v19 = vcombine.low %v2985_v59, %v2993_v60  ;;  %v2995_v61 = vcombine.high %v2985_v59, %v2993_v60  ;;  %v3027_v62 = vrot.slane %v3020_v32, %v7382_v55 }
 0x67c   : > { %v3002_v39 = vrot.slane %v2994_v19, %v7386_v14  ;;  %v3009_v38 = vrot.slane %v2995_v61, %v7386_v14  ;;  %v3028_v63 = vcombine.low %v3019_v3, %v3027_v62  ;;  %v3029_v1 = vcombine.high %v3019_v3, %v3027_v62 }
 0x67e   : > { %v3010_v2 = vcombine.high %v3002_v39, %v6689_v25  ;;  %v3011_v4 = vcombine.high %v3009_v38, %v6689_v25  ;;  %v3036_v5 = vrot.slane %v3028_v63, %v7386_v14  ;;  %v3043_v6 = vrot.slane %v3029_v1, %v7386_v14 }
 0x67f   : > { %v3050_v9 = vshrl.u32 %v3002_v39, 16  ;;  %v3066_v10 = vshrl.u32 %v3009_v38, 16 }
 0x680   : > { %v3044_v11 = vcombine.high %v3036_v5, %v6689_v25  ;;  %v3045_v12 = vcombine.high %v3043_v6, %v6689_v25  ;;  %v3048_v13 = vpack.i.b16 %v3036_v5, %v3002_v39  ;;  %v3051_v15 = vshrl.u32 %v3036_v5, 16 }
 0x681   : > { %v3058_v16 = vshrl.u32 %v3010_v2, 16  ;;  %v3074_v17 = vshrl.u32 %v3011_v4, 16  ;;  %v3064_v20 = vpack.i.b16 %v3043_v6, %v3009_v38  ;;  %v3067_v21 = vshrl.u32 %v3043_v6, 16 }
 0x682   : > { %v3052_v29 = vpack.i.b16 %v3051_v15, %v3050_v9  ;;  %v3056_v24 = vpack.i.b16 %v3044_v11, %v3010_v2  ;;  %v3059_v27 = vshrl.u32 %v3044_v11, 16  ;;  %v3072_v30 = vpack.i.b16 %v3045_v12, %v3011_v4 }
 0x683   : > { %v5877_v28 = vpop.eup %5876  ;;  %v3068_v33 = vpack.i.b16 %v3067_v21, %v3066_v10  ;;  %v3075_v7 = vshrl.u32 %v3045_v12, 16  ;;  %v3078_v34 = vcombine.low %v3048_v13, %v3064_v20 }
 0x684   : > { %v3678_v36 = vsel %vm3629_vm11, %v5877_v28, 0.0  ;;  %v3060_v40 = vpack.i.b16 %v3059_v27, %v3058_v16  ;;  %v3086_v41 = vcombine.low %v3056_v24, %v3072_v30  ;;  %v3702_v62 = vpack.c.bf16 %v5877_v28, %v5877_v28 }
 0x685   : > { %v5879_v23 = vpop.eup %5878  ;;  %3679 = vadd.xlane.f32.xlu0 %v3678_v36  ;;  %v3076_v26 = vpack.i.b16 %v3075_v7, %v3074_v17  ;;  %v3112_v42 = vcombine.low %v3052_v29, %v3068_v33  ;;  %v7582_v44 = vrot.slane %v3078_v34, %v7382_v55 }
 0x686   : > { %v3681_v43 = vsel %vm3629_vm11, %v5879_v23, 0.0  ;;  %v3093_v45 = vrot.slane %v3086_v41, %v7382_v55  ;;  %v3703_v63 = vpack.c.bf16 %v5879_v23, %v5879_v23 }
 0x687   : > { %3682 = vadd.xlane.f32.xlu1 %v3681_v43  ;;  %v3120_v46 = vcombine.low %v3060_v40, %v3076_v26  ;;  %v3119_v48 = vrot.slane %v3112_v42, %v7382_v55 }
 0x688   : > { %v3094_v47 = vcombine.low %v7582_v44, %v3093_v45  ;;  %v3095_v28 = vcombine.high %v7582_v44, %v3093_v45 }
 0x689   : > { %v3127_v49 = vrot.slane %v3120_v46, %v7382_v55 }
 0x68a   : > { %v3102_v50 = vrot.slane %v3094_v47, %v7386_v14  ;;  %v3109_v30 = vrot.slane %v3095_v28, %v7386_v14 }
 0x68b   : > { %v3128_v51 = vcombine.low %v3119_v48, %v3127_v49  ;;  %v3129_v17 = vcombine.high %v3119_v48, %v3127_v49 }
 0x68c   : > { %v3110_v52 = vcombine.high %v3102_v50, %v6689_v25  ;;  %v3149_v56 = vshrl.u32 %v3102_v50, 16  ;;  %v3161_v7 = vshrl.u32 %v3109_v30, 16  ;;  %v3111_v43 = vcombine.high %v3109_v30, %v6689_v25 }
 0x68d   : > { %v3136_v53 = vrot.slane %v3128_v51, %v7386_v14 }
 0x68e   : > { %v3155_v59 = vshrl.u32 %v3110_v52, 16 }
 0x68f   : > { %v3148_v54 = vpack.i.b16 %v3136_v53, %v3102_v50  ;;  %v3150_v57 = vshrl.u32 %v3136_v53, 16  ;;  %v3144_v58 = vcombine.high %v3136_v53, %v6689_v25  ;;  %v3167_v50 = vshrl.u32 %v3111_v43, 16 }
 0x691   : > { %v3715_v60 = vsel %vm1525_vm2, %v3148_v54, 0  ;;  %v3151_v32 = vpack.i.b16 %v3150_v57, %v3149_v56  ;;  %v3154_v3 = vpack.i.b16 %v3144_v58, %v3110_v52  ;;  %v3156_v19 = vshrl.u32 %v3144_v58, 16 }
 0x692   : > { %5426 = vmatpush3.bf16.msra.mxu1 %v3715_v60 }
 0x693   : > { %v3761_v61 = vsel %vm1525_vm2, %v3151_v32, 0  ;;  %5437 = vmatprep.subr.bf16.mxu1 %v6685_v0  ;;  %v3157_v39 = vpack.i.b16 %v3156_v19, %v3155_v59  ;;  %v3807_v38 = vsel %vm1525_vm2, %v3154_v3, 0 }
 0x694   : > { %5432 = vmatpush3.bf16.msra.mxu0 %v3761_v61 }
 0x695   : > { %5428 = vmatmul.mubr.msk.bf16.vlgmr.msra.gmra.mxu1 %vm3629_vm11, %v3702_v62  ;;  %5443 = vmatprep.subr.bf16.mxu0 %v6685_v0  ;;  %v3853_v1 = vsel %vm1525_vm2, %v3157_v39, 0 }
 0x696   : > { %5438 = vmatpush3.bf16.msra.mxu1 %v3807_v38  ;;  %5439 = vmatprep.mubr.msk.bf16.mxu1 %vm6686_vm0, %v6685_v0 }
 0x697   : > { %5434 = vmatmul.mubr.msk.bf16.vlgmr.msra.gmra.mxu0 %vm3629_vm11, %v3703_v63  ;;  %5449 = vmatprep.subr.bf16.mxu1 %v6685_v0 }
 0x698   : > { %5444 = vmatpush3.bf16.msra.mxu0 %v3853_v1  ;;  %5445 = vmatprep.mubr.msk.bf16.mxu0 %vm6686_vm0, %v6685_v0 }
 0x699   : > { %5455 = vmatprep.subr.bf16.mxu0 %v6685_v0 }
 0x6a6   : > { %v3638_v2 = vpop.xlane.xlu1 %3637 }
 0x6a7   : > { %v3656_v4 = vsub.f32 %v7536_v18, %v3638_v2 }
 0x6a8   : > { %v3641_v5 = vpop.xlane.xlu0 %3640 }
 0x6a9   : > { %v3666_v6 = vmul.f32 1.442695, %v3656_v4  ;;  %v3657_v9 = vsub.f32 %v7539_v22, %v3641_v5 }
 0x6aa   : > { %v3647_v10 = vpop.xlane.xlu1 %3646 }
 0x6ab   : > { %5880 = vpow2.f32 %v3666_v6  ;;  %v3668_v11 = vmul.f32 1.442695, %v3657_v9  ;;  %v3659_v12 = vsub.f32 %v7543_v8, %v3647_v10  ;;  %v3143_v8 = vrot.slane %v3129_v17, %v7386_v14 }
 0x6ac   : > { %v3644_v13 = vpop.xlane.xlu0 %3643 }
 0x6ad   : > { %5882 = vpow2.f32 %v3668_v11  ;;  %v3672_v15 = vmul.f32 1.442695, %v3659_v12  ;;  %v3658_v16 = vsub.f32 %v7547_v31, %v3644_v13  ;;  %v3162_v31 = vshrl.u32 %v3143_v8, 16 }
 0x6ae   : > { %v3653_v20 = vpop.xlane.xlu1 %3652  ;;  %v3160_v33 = vpack.i.b16 %v3143_v8, %v3109_v30  ;;  %v3145_v40 = vcombine.high %v3143_v8, %v6689_v25 }
 0x6af   : > { %5884 = vpow2.f32 %v3672_v15  ;;  %v3670_v21 = vmul.f32 1.442695, %v3658_v16  ;;  %v3661_v18 = vsub.f32 %v7553_v35, %v3653_v20  ;;  %v3163_v23 = vpack.i.b16 %v3162_v31, %v3161_v7 }
 0x6b0   : > { %v3650_v29 = vpop.xlane.xlu0 %3649  ;;  %v3168_v46 = vshrl.u32 %v3145_v40, 16  ;;  %v3166_v25 = vpack.i.b16 %v3145_v40, %v3111_v43 }
 0x6b1   : > { %5886 = vpow2.f32 %v3670_v21  ;;  %v3676_v22 = vmul.f32 1.442695, %v3661_v18  ;;  %v3660_v24 = vsub.f32 %v7557_v37, %v3650_v29  ;;  %v3899_v37 = vsel %vm1525_vm2, %v3160_v33, 0 }
 0x6b2   : > { %v3945_v45 = vsel %vm1525_vm2, %v3163_v23, 0  ;;  %v3169_v53 = vpack.i.b16 %v3168_v46, %v3167_v50  ;;  %v3991_v56 = vsel %vm1525_vm2, %v3166_v25, 0 }
 0x6b3   : > { %v3674_v27 = vmul.f32 1.442695, %v3660_v24  ;;  %5888 = vpow2.f32 %v3676_v22 }
 0x6b4   : > { %v4037_v60 = vsel %vm1525_vm2, %v3169_v53, 0  ;;  %vm4405_vm2 = vcmask 228352  }
 0x6b5   : > { %5890 = vpow2.f32 %v3674_v27 }
 0x6b8   : > { %v5881_v34 = vpop.eup %5880 }
 0x6b9   : > { %v3684_v35 = vsel %vm3629_vm11, %v5881_v34, 0.0  ;;  %v3704_v36 = vpack.c.bf16 %v5881_v34, %v5881_v34 }
 0x6ba   : > { %v5883_v41 = vpop.eup %5882  ;;  %3685 = vadd.xlane.f32.xlu0 %v3684_v35 }
 0x6bb   : > { %5440 = vmatmul.mubr.msk.bf16.vlgmr.msra.gmra.mxu1 %vm3629_vm11, %v3704_v36  ;;  %v3687_v26 = vsel %vm3629_vm11, %v5883_v41, 0.0  ;;  %v3705_v42 = vpack.c.bf16 %v5883_v41, %v5883_v41 }
 0x6bc   : > { %v5885_v44 = vpop.eup %5884  ;;  %5450 = vmatpush3.bf16.msra.mxu1 %v3899_v37  ;;  %3688 = vadd.xlane.f32.xlu1 %v3687_v26 }
 0x6bd   : > { %5446 = vmatmul.mubr.msk.bf16.vlgmr.msra.gmra.mxu0 %vm3629_vm11, %v3705_v42  ;;  %5451 = vmatprep.mubr.msk.bf16.mxu1 %vm6686_vm0, %v6685_v0  ;;  %v3693_v49 = vsel %vm3629_vm11, %v5885_v44, 0.0  ;;  %v3707_v58 = vpack.c.bf16 %v5885_v44, %v5885_v44 }
 0x6be   : > { %v5887_v47 = vpop.eup %5886  ;;  %5456 = vmatpush3.bf16.msra.mxu0 %v3945_v45  ;;  %5461 = vmatprep.subr.bf16.mxu1 %v6685_v0 }
 0x6bf   : > { %v3690_v48 = vsel %vm3629_vm11, %v5887_v47, 0.0  ;;  %5457 = vmatprep.mubr.msk.bf16.mxu0 %vm6686_vm0, %v6685_v0  ;;  %5467 = vmatprep.subr.bf16.mxu0 %v6685_v0  ;;  %v3706_v52 = vpack.c.bf16 %v5887_v47, %v5887_v47 }
 0x6c0   : > { %3691 = vadd.xlane.f32.xlu0 %v3690_v48  ;;  %3694 = vadd.xlane.f32.xlu1 %v3693_v49  ;;  %v5889_v51 = vpop.eup %5888 }
 0x6c1   : > { %v3699_v59 = vsel %vm3629_vm11, %v5889_v51, 0.0  ;;  %v3709_v3 = vpack.c.bf16 %v5889_v51, %v5889_v51 }
 0x6c2   : > { %v5891_v54 = vpop.eup %5890 }
 0x6c3   : > { %5452 = vmatmul.mubr.msk.bf16.vlgmr.msra.gmra.mxu1 %vm3629_vm11, %v3706_v52  ;;  %v3696_v57 = vsel %vm3629_vm11, %v5891_v54, 0.0  ;;  %v3708_v32 = vpack.c.bf16 %v5891_v54, %v5891_v54 }
 0x6c4   : > { %5462 = vmatpush3.bf16.msra.mxu1 %v3991_v56  ;;  %3697 = vadd.xlane.f32.xlu0 %v3696_v57 }
 0x6c5   : > { %3700 = vadd.xlane.f32.xlu1 %v3699_v59  ;;  %5458 = vmatmul.mubr.msk.bf16.vlgmr.msra.gmra.mxu0 %vm3629_vm11, %v3707_v58 }
 0x6c6   : > { %5468 = vmatpush3.bf16.msra.mxu0 %v4037_v60  ;;  %5463 = vmatprep.mubr.msk.bf16.mxu1 %vm6686_vm0, %v6685_v0 }
 0x6c7   : > { %5469 = vmatprep.mubr.msk.bf16.mxu0 %vm6686_vm0, %v6685_v0  ;;  %5473 = vmatprep.subr.bf16.mxu1 %v6685_v0 }
 0x6c8   : > { %5481 = vmatprep.subr.bf16.mxu0 %v6685_v0 }
 0x6cb   : > { %5464 = vmatmul.mubr.msk.bf16.vlgmr.msra.gmra.mxu1 %vm3629_vm11, %v3708_v32 }
 0x6cc   : > { %5477 = vmatprep.mubr.msk.bf16.mxu1 %vm6686_vm0, %v6685_v0 }
 0x6cd   : > { %5470 = vmatmul.mubr.msk.bf16.vlgmr.msra.gmra.mxu0 %vm3629_vm11, %v3709_v3 }
 0x6ce   : > { %5485 = vmatprep.mubr.msk.bf16.mxu0 %vm6686_vm0, %v6685_v0 }
 0x70e   : > { %v3680_v4 = vpop.xlane.xlu0 %3679 }
 0x70f   : > { %5892 = vrcp.f32 %v3680_v4 }
 0x710   : > { %v3683_v5 = vpop.xlane.xlu1 %3682 }
 0x71c   : > { %v5893_v12 = vpop.eup %5892 }
 0x743   : > { %v3686_v6 = vpop.xlane.xlu0 %3685 }
 0x744   : > { %5894 = vrcp.f32 %v3686_v6 }
 0x745   : > { %v3689_v9 = vpop.xlane.xlu1 %3688  ;;  %5896 = vrcp.f32 %v3683_v5 }
 0x746   : > { %5898 = vrcp.f32 %v3689_v9 }
 0x749   : > { %v3692_v10 = vpop.xlane.xlu0 %3691  ;;  %v3695_v11 = vpop.xlane.xlu1 %3694 }
 0x74a   : > { %5900 = vrcp.f32 %v3692_v10 }
 0x74d   : > { %v3698_v13 = vpop.xlane.xlu0 %3697 }
 0x74e   : > { %v3701_v20 = vpop.xlane.xlu1 %3700  ;;  %5902 = vrcp.f32 %v3698_v13 }
 0x74f   : > { %5904 = vrcp.f32 %v3695_v11 }
 0x750   : > { %5906 = vrcp.f32 %v3701_v20 }
 0x751   : > { %v5895_v15 = vpop.eup %5894 }
 0x752   : > { %v5897_v17 = vpop.eup %5896 }
 0x753   : > { %v5899_v28 = vpop.eup %5898 }
 0x755   : > { %v3751_v19 = vpop.f32.mrf.mxu1 }
 0x756   : > { %v4087_v21 = vmul.f32 %v5893_v12, %v3751_v19 }
 0x757   : > { %v5429_v61 = vpop.f32.mrf.mxu1  ;;  %v3797_v62 = vpop.f32.mrf.mxu0 }
 0x758   : > { %v4088_v24 = vmul.f32 %v5897_v17, %v3797_v62  ;;  %v5901_v59 = vpop.eup %5900 }
 0x759   : > { %v3754_v39 = vpop.f32.mrf.mxu1  ;;  %v5435_v38 = vpop.f32.mrf.mxu0 }
 0x75b   : > { %v5430_v63 = vpop.f32.mrf.mxu1  ;;  %v3800_v1 = vpop.f32.mrf.mxu0 }
 0x75c   : > { %v5903_v3 = vpop.eup %5902 }
 0x75d   : > { %v5436_v2 = vpop.f32.mrf.mxu0 }
 0x75e   : > { %v5905_v2 = vpop.eup %5904 }
 0x75f   : > { %v5907_v10 = vpop.eup %5906 }
 0x77b   : > { %v3843_v16 = vpop.f32.mrf.mxu1 }
 0x77c   : > { %v4089_v18 = vmul.f32 %v5895_v15, %v3843_v16 }
 0x77d   : > { %v5441_v29 = vpop.f32.mrf.mxu1  ;;  %v3889_v22 = vpop.f32.mrf.mxu0 }
 0x77e   : > { %v4095_v8 = vcombine.low %v4087_v21, %v4089_v18  ;;  %v4096_v27 = vcombine.high %v4087_v21, %v4089_v18  ;;  %v4090_v30 = vmul.f32 %v5899_v28, %v3889_v22 }
 0x77f   : > { %v3846_v31 = vpop.f32.mrf.mxu1  ;;  %v5447_v33 = vpop.f32.mrf.mxu0 }
 0x780   : > { %v4111_v7 = vcombine.low %v4088_v24, %v4090_v30  ;;  %v4112_v34 = vcombine.high %v4088_v24, %v4090_v30  ;;  %v4103_v23 = vrot.slane %v4095_v8, %v7382_v55  ;;  %v4110_v40 = vrot.slane %v4096_v27, %v7382_v55 }
 0x781   : > { %v5442_v35 = vpop.f32.mrf.mxu1  ;;  %v3892_v36 = vpop.f32.mrf.mxu0 }
 0x782   : > { %v4119_v41 = vrot.slane %v4111_v7, %v7382_v55  ;;  %v4126_v37 = vrot.slane %v4112_v34, %v7382_v55 }
 0x783   : > { %v5448_v26 = vpop.f32.mrf.mxu0  ;;  %v3935_v42 = vpop.f32.mrf.mxu1 }
 0x784   : > { %v4159_v43 = vcombine.low %v4103_v23, %v4119_v41  ;;  %v4160_v44 = vcombine.high %v4103_v23, %v4119_v41  ;;  %v4175_v45 = vcombine.low %v4110_v40, %v4126_v37  ;;  %v4176_v46 = vcombine.high %v4110_v40, %v4126_v37 }
 0x785   : > { %v5453_v47 = vpop.f32.mrf.mxu1  ;;  %v3981_v48 = vpop.f32.mrf.mxu0  ;;  %v4091_v38 = vmul.f32 %v5901_v59, %v3935_v42 }
 0x786   : > { %v4167_v49 = vrot.slane %v4159_v43, %v7386_v14  ;;  %v4174_v25 = vrot.slane %v4160_v44, %v7386_v14  ;;  %v4183_v50 = vrot.slane %v4175_v45, %v7386_v14  ;;  %v4190_v51 = vrot.slane %v4176_v46, %v7386_v14  ;;  %v5852_v45 = vld [vmem:[#allocation32 + $0x8] sm:$0xff]  }
 0x787   : > { %v3938_v52 = vpop.f32.mrf.mxu1  ;;  %v5459_v53 = vpop.f32.mrf.mxu0  ;;  %v4092_v11 = vmul.f32 %v5905_v2, %v3981_v48  ;;  %5474 = vmatpush3.bf16.msra.mxu1 %v5852_v45  ;;  %v5180_v45 = vld [vmem:[#allocation37] ss:$0 sm:$0xff] }
 0x788   : > { %v5167_v54 = vcombine.low %v4167_v49, %v4174_v25  ;;  %v5169_v56 = vcombine.high %v4167_v49, %v4174_v25  ;;  %v5171_v57 = vcombine.low %v4183_v50, %v4190_v51  ;;  %v5173_v58 = vcombine.high %v4183_v50, %v4190_v51  ;;  %5475 = vmatprep.subr.bf16.mxu1 %v6685_v0 }
 0x789   : > { %v5454_v60 = vpop.f32.mrf.mxu1  ;;  %v3984_v32 = vpop.f32.mrf.mxu0 }
 0x78a   : > { %v4239_v19 = vrot.slane %v5167_v54, %v7382_v55  ;;  %v4255_v61 = vrot.slane %v5169_v56, %v7382_v55  ;;  %v4271_v62 = vrot.slane %v5171_v57, %v7382_v55  ;;  %v4287_v39 = vrot.slane %v5173_v58, %v7382_v55  ;;  %v5853_v58 = vld [vmem:[#allocation32] sm:$0xff]  }
 0x78b   : > { %v5460_v63 = vpop.f32.mrf.mxu0  ;;  %v4027_v1 = vpop.f32.mrf.mxu1  ;;  %5476 = vmatpush3.bf16.msra.mxu1 %v5853_v58 }
 0x78c   : > { %v4093_v4 = vmul.f32 %v5903_v3, %v4027_v1  ;;  %v4296_v5 = vcombine.high %v4239_v19, %v4255_v61  ;;  %v4328_v6 = vcombine.high %v4271_v62, %v4287_v39  ;;  %v4295_v9 = vcombine.low %v4239_v19, %v4255_v61  ;;  %5489 = vmatprep.subr.bf16.mxu1 %v6685_v0 }
 0x78d   : > { %v5465_v12 = vpop.f32.mrf.mxu1  ;;  %v4073_v13 = vpop.f32.mrf.mxu0  ;;  %v4327_v15 = vcombine.low %v4271_v62, %v4287_v39 }
 0x78e   : > { %v4127_v16 = vcombine.low %v4091_v38, %v4093_v4  ;;  %v4128_v17 = vcombine.high %v4091_v38, %v4093_v4  ;;  %v4094_v20 = vmul.f32 %v5907_v10, %v4073_v13  ;;  %v4310_v21 = vrot.slane %v4296_v5, %v7386_v14 }
 0x78f   : > { %v4030_v18 = vpop.f32.mrf.mxu1  ;;  %v5471_v28 = vpop.f32.mrf.mxu0  ;;  %v4342_v29 = vrot.slane %v4328_v6, %v7386_v14  ;;  %v7664_v22 = vrot.slane %v4295_v9, %v7386_v14  ;;  %v7667_v24 = vrot.slane %v4327_v15, %v7386_v14 }
 0x790   : > { %v4143_v8 = vcombine.low %v4092_v11, %v4094_v20  ;;  %v4144_v27 = vcombine.high %v4092_v11, %v4094_v20  ;;  %v4135_v35 = vrot.slane %v4127_v16, %v7382_v55  ;;  %v4142_v36 = vrot.slane %v4128_v17, %v7382_v55  ;;  %v5175_v18 = vld [vmem:[#allocation34] ss:$0 sm:$0xff] }
 0x791   : > { %v5466_v30 = vpop.f32.mrf.mxu1  ;;  %v4076_v31 = vpop.f32.mrf.mxu0  ;;  %v4361_v33 = vcombine.low %v4310_v21, %v4342_v29  ;;  %v4360_v7 = vcombine.high %v7664_v22, %v7667_v24  ;;  %v4359_v34 = vcombine.low %v7664_v22, %v7667_v24  ;;  %v4362_v44 = vcombine.high %v4310_v21, %v4342_v29  ;;  %v5914_v24 = vld [vmem:[%s7136_s3] sm:$0xff]  ;;  %s7859_s3 = sld [smem:[#allocation72_spill]] }
 0x792   : > { %v4151_v23 = vrot.slane %v4143_v8, %v7382_v55  ;;  %v4158_v40 = vrot.slane %v4144_v27, %v7382_v55 }
 0x793   : > { %4372 = vrot.lane.b32.xlu1 %v4361_v33, %s6701_s9  ;;  %4368 = vrot.lane.b32.xlu0 %v4360_v7, %s6702_s15  ;;  %v5472_v41 = vpop.f32.mrf.mxu0  ;;  %s7858_s9 = sld [smem:[#allocation73_spill]] }
 0x794   : > { %v4191_v37 = vcombine.low %v4135_v35, %v4151_v23  ;;  %v4192_v26 = vcombine.high %v4135_v35, %v4151_v23  ;;  %v4207_v42 = vcombine.low %v4142_v36, %v4158_v40  ;;  %v4208_v43 = vcombine.high %v4142_v36, %v4158_v40  ;;  %v5854_v23 = vld [vmem:[%s7857_s19 + $0x8] sm:$0xff]   ;;  %v5855_v40 = vld [vmem:[%s7857_s19] sm:$0xff]   ;;  %s7861_s15 = sld [smem:[#allocation75_spill]] }
 0x795   : > { %5482 = vmatpush3.bf16.msra.mxu0 %v5854_v23 }
 0x796   : > { %v4199_v46 = vrot.slane %v4191_v37, %v7386_v14  ;;  %v4206_v47 = vrot.slane %v4192_v26, %v7386_v14  ;;  %v4215_v48 = vrot.slane %v4207_v42, %v7386_v14  ;;  %v4222_v49 = vrot.slane %v4208_v43, %v7386_v14  ;;  %5483 = vmatprep.subr.bf16.mxu0 %v6685_v0  ;;  %v5179_v43 = vld [vmem:[#allocation35] ss:$0 sm:$0xff] }
 0x797   : > { %4376 = vrot.lane.b32.xlu1 %v4362_v44, %s6703_s23  ;;  %s7862_s23 = sld [smem:[#allocation76_spill]] }
 0x798   : > { %v5168_v25 = vcombine.low %v4199_v46, %v4206_v47  ;;  %v5170_v50 = vcombine.high %v4199_v46, %v4206_v47  ;;  %v5172_v51 = vcombine.low %v4215_v48, %v4222_v49  ;;  %v5174_v52 = vcombine.high %v4215_v48, %v4222_v49 }
 0x799   : > { %5484 = vmatpush3.bf16.msra.mxu0 %v5855_v40  ;;  %v5856_v49 = vld [vmem:[%s7858_s9 + $0x18] sm:$0xff]  }
 0x79a   : > { %v4246_v53 = vrot.slane %v5168_v25, %v7382_v55  ;;  %v4262_v54 = vrot.slane %v5170_v50, %v7382_v55  ;;  %v4278_v56 = vrot.slane %v5172_v51, %v7382_v55  ;;  %v4294_v57 = vrot.slane %v5174_v52, %v7382_v55  ;;  %v5857_v25 = vld [vmem:[%s7858_s9 + $0x10] sm:$0xff]   ;;  %v5858_v50 = vld [vmem:[%s7858_s9 + $0x8] sm:$0xff]   ;;  %v5859_v51 = vld [vmem:[%s7858_s9] sm:$0xff]   ;;  %s6708_s9 = smov [#allocation38]  }
 0x79b   : > { %v5181_v52 = vld [vmem:[%s7859_s3] ss:$0 sm:$0xff] }
 0x79c   : > { %v4311_v59 = vcombine.low %v4246_v53, %v4262_v54  ;;  %v4343_v60 = vcombine.low %v4278_v56, %v4294_v57  ;;  %v4312_v32 = vcombine.high %v4246_v53, %v4262_v54  ;;  %v4344_v3 = vcombine.high %v4278_v56, %v4294_v57 }
 0x79e   : > { %v4319_v19 = vrot.slane %v4311_v59, %v7386_v14  ;;  %v4351_v61 = vrot.slane %v4343_v60, %v7386_v14  ;;  %v4326_v38 = vrot.slane %v4312_v32, %v7386_v14  ;;  %v4358_v63 = vrot.slane %v4344_v3, %v7386_v14 }
 0x7a0   : > { %v4364_v62 = vcombine.high %v4319_v19, %v4351_v61  ;;  %v4363_v39 = vcombine.low %v4319_v19, %v4351_v61  ;;  %v4366_v55 = vcombine.high %v4326_v38, %v4358_v63  ;;  %v4365_v1 = vcombine.low %v4326_v38, %v4358_v63 }
 0x7a2   : > { %4384 = vrot.lane.b32.xlu1 %v4364_v62, %s6704_s26  ;;  %4380 = vrot.lane.b32.xlu0 %v4363_v39, %s6705_s22  ;;  %s7863_s26 = sld [smem:[#allocation77_spill]]  ;;  %s5194_s22 = sshll.u32 %s6905_s18, 7 }
 0x7a6   : > { %4392 = vrot.lane.b32.xlu1 %v4366_v55, %s6706_s1  ;;  %4388 = vrot.lane.b32.xlu0 %v4365_v1, %s6707_s28  ;;  %s7864_s1 = sshll.u32 %s7130_s13, 3 }
 0x7a7   : > { %s1320_s28 = scalar_lea.vmem [#allocation38], %s7864_s1 }
 0x7a8   : > { %s4709_s3 = sshll.u32 %s1320_s28, 4  ;;  %s4710_s3 = int_to_ptr.vmem [resolvable:$true] %s4709_s3 }
 0x7a9   : > { %s6515_s8 = scalar_lea.vmem %s4710_s3, 128 }
 0x7aa   : > { %p6516_p3 = scmp.ne.s32.totalorder %s4710_s3, %s6515_s8 }
 0x7ac   : > { %p6517_p10 = pnand %p6516_p3, %p7865_p5 }
 0x7ae   : > { %p6518_p12 = pneg %p6517_p10 }
 0x805   : > { %v4373_v2 = vpop.permute.xlu1 %4372  ;;  %v4369_v4 = vpop.permute.xlu0 %4368 }
 0x806   : > { %v4395_v5 = vsel %vm3260_vm10, %v4359_v34, %v4369_v4 }
 0x807   : > { %v4396_v9 = vsel %vm3629_vm11, %v4395_v5, %v4373_v2 }
 0x809   : > { %v4377_v6 = vpop.permute.xlu1 %4376 }
 0x80a   : > { %v4398_v14 = vsel %vm4397_vm12, %v4396_v9, %v4377_v6 }
 0x814   : > { %v4385_v10 = vpop.permute.xlu1 %4384  ;;  %v4381_v11 = vpop.permute.xlu0 %4380 }
 0x815   : > { %v4400_v12 = vsel %vm4399_vm13, %v4398_v14, %v4381_v11 }
 0x816   : > { %v4402_v15 = vsel %vm4401_vm14, %v4400_v12, %v4385_v10 }
 0x818   : > { %v4393_v13 = vpop.permute.xlu1 %4392  ;;  %v4389_v16 = vpop.permute.xlu0 %4388 }
 0x819   : > { %v4404_v17 = vsel %vm4403_vm15, %v4402_v15, %v4389_v16 }
 0x81a   : > { %v4406_v20 = vsel %vm4405_vm2, %v4404_v17, %v4393_v13 }
 0x81b   : > { %v4407_v21 = vpack.c.bf16 %v4406_v20, %v4406_v20 }
 0x81d   : > { %5478 = vmatmul.mubr.msk.bf16.vlgmr.msra.gmra.mxu1 %vm1347_vm1, %v4407_v21  ;;  %v5191_v21 = vld [vmem:[%s7861_s15] ss:$0 sm:$0xff]  ;;  %s6519_s15 = sshll.u32 %s6708_s9, 4  ;;  %s6520_s15 = int_to_ptr.vmem [resolvable:$false] %s6519_s15 }
 0x81e   : > { %5497 = vmatprep.mubr.msk.bf16.mxu1 %vm6686_vm0, %v6685_v0  ;;  %5490 = vmatpush3.bf16.msra.mxu1 %v5856_v49  ;;  %p6522_p13 = scmp.lt.s32.totalorder %s4710_s3, %s6520_s15 }
 0x81f   : > { %5491 = vmatprep.subr.bf16.mxu1 %v6685_v0 }
 0x822   : > { %5492 = vmatpush3.bf16.msra.mxu1 %v5857_v25 }
 0x823   : > { %5493 = vmatprep.subr.bf16.mxu1 %v6685_v0 }
 0x826   : > { %5494 = vmatpush3.bf16.msra.mxu1 %v5858_v50 }
 0x827   : > { %5495 = vmatprep.subr.bf16.mxu1 %v6685_v0  ;;  %v5185_v0 = vld [vmem:[%s7860_s4] ss:$0 sm:$0xff]  ;;  %s4707_s4 = scalar_lea.hbm %s7863_s26, %s5194_s22 }
 0x82a   : > { %5496 = vmatpush3.bf16.msra.mxu1 %v5859_v51 }
 0x8dd   : > { %v4468_v28 = vpop.f32.mrf.mxu1 }
 0x8de   : > { %v4469_v29 = vadd.f32 %v5175_v18, %v4468_v28  ;;  %v5192_v28 = vld [vmem:[%s7862_s23] ss:$0 sm:$0xff]  ;;  %s6521_s23 = scalar_lea.vmem %s6520_s15, 256 }
 0x8df   : > { %v5479_v22 = vpop.f32.mrf.mxu1  ;;  %p6523_p6 = scmp.lt.s32.totalorder %s6521_s23, %s6515_s8 }
 0x8e0   : > { %v4474_v8 = vadd.f32 %v5914_v24, %v4469_v29 }
 0x8e1   : > { %v4471_v27 = vpop.f32.mrf.mxu1  ;;  %p6524_p9 = por %p6523_p6, %p6522_p13 }
 0x8e2   : > { %v4475_v30 = vsel %vm1347_vm1, %v4474_v8, 0.0 }
 0x8e3   : > { %4476 = vadd.xlane.f32.xlu0 %v4475_v30  ;;  %v5480_v31 = vpop.f32.mrf.mxu1  ;;  %p6525_p8 = pnand %p6524_p9, %p6518_p12 }
 0x96c   : > { %v4477_v33 = vpop.xlane.xlu0 %4476 }
 0x96d   : > { %v4479_v7 = vmul.f32 0.03125, %v4477_v33 }
 0x96f   : > { %v4480_v34 = vsub.f32 %v4474_v8, %v4479_v7 }
 0x971   : > { %v4481_v35 = vmul.f32 %v4480_v34, %v4480_v34 }
 0x973   : > { %v4482_v36 = vsel %vm1347_vm1, %v4481_v35, 0.0 }
 0x974   : > { %4483 = vadd.xlane.f32.xlu1 %v4482_v36 }
 0x9fd   : > { %v4484_v41 = vpop.xlane.xlu1 %4483 }
 0x9fe   : > { %v4485_v37 = vmul.f32 0.03125, %v4484_v41 }
 0xa00   : > { %v4486_v26 = vadd.f32 1e-05, %v4485_v37 }
 0xa02   : > { %5908 = vrsqrt.f32 %v4486_v26 }
 0xa0f   : > { %v5909_v42 = vpop.eup %5908 }
 0xa10   : > { %v4488_v44 = vmul.f32 %v5909_v42, %v4480_v34 }
 0xa12   : > { %v4496_v46 = vmul.f32 %v5179_v43, %v4488_v44 }
 0xa14   : > { %v4504_v47 = vadd.f32 %v5180_v45, %v4496_v46 }
 0xa16   : > { %v4505_v48 = vpack.c.bf16 %v4504_v47, %v4504_v47 }
 0xa18   : > { %5486 = vmatmul.mubr.msk.bf16.vlgmr.msra.gmra.mxu0 %vm1347_vm1, %v4505_v48 }
 0xad8   : > { %v4566_v53 = vpop.f32.mrf.mxu0 }
 0xad9   : > { %v4567_v54 = vadd.f32 %v5181_v52, %v4566_v53 }
 0xada   : > { %v5487_v56 = vpop.f32.mrf.mxu0 }
 0xadb   : > { %v4573_v57 = vmul.f32 %v4567_v54, %v4567_v54  ;;  %v4572_v62 = vmul.f32 0.5, %v4567_v54 }
 0xadc   : > { %v4569_v58 = vpop.f32.mrf.mxu0 }
 0xadd   : > { %v4574_v59 = vmul.f32 %v4573_v57, %v4567_v54 }
 0xade   : > { %v5488_v60 = vpop.f32.mrf.mxu0 }
 0xadf   : > { %v4575_v32 = vmul.f32 0.044715, %v4574_v59 }
 0xae1   : > { %v4576_v3 = vadd.f32 %v4575_v32, %v4567_v54 }
 0xae3   : > { %v4577_v19 = vmul.f32 0.7978846, %v4576_v3 }
 0xae5   : > { %5910 = vtanh.f32 %v4577_v19 }
 0xaf2   : > { %v5911_v61 = vpop.eup %5910 }
 0xaf3   : > { %v4579_v39 = vadd.f32 1.0, %v5911_v61 }
 0xaf5   : > { %v4580_v38 = vmul.f32 %v4579_v39, %v4572_v62 }
 0xaf7   : > { %v4581_v63 = vpack.c.bf16 %v4580_v38, %v4580_v38 }
 0xaf9   : > { %5498 = vmatmul.mubr.msk.bf16.vlgmr.msra.gmra.mxu1 %vm2154_vm9, %v4581_v63 }
 0xbb9   : > { %v4658_v55 = vpop.f32.mrf.mxu1 }
 0xbba   : > { %v4659_v1 = vadd.f32 %v5185_v0, %v4658_v55 }
 0xbbb   : > { %v5499_v2 = vpop.f32.mrf.mxu1 }
 0xbbc   : > { %v4664_v4 = vadd.f32 %v4659_v1, %v4504_v47 }
 0xbbd   : > { %v4661_v5 = vpop.f32.mrf.mxu1 }
 0xbbe   : > { %v4665_v6 = vsel %vm1347_vm1, %v4664_v4, 0.0 }
 0xbbf   : > { %4666 = vadd.xlane.f32.xlu0 %v4665_v6  ;;  %v5500_v9 = vpop.f32.mrf.mxu1 }
 0xc48   : > { %v4667_v14 = vpop.xlane.xlu0 %4666 }
 0xc49   : > { %v4668_v10 = vmul.f32 0.03125, %v4667_v14 }
 0xc4b   : > { %v4669_v11 = vsub.f32 %v4664_v4, %v4668_v10 }
 0xc4d   : > { %v4670_v12 = vmul.f32 %v4669_v11, %v4669_v11 }
 0xc4f   : > { %v4671_v13 = vsel %vm1347_vm1, %v4670_v12, 0.0 }
 0xc50   : > { %4672 = vadd.xlane.f32.xlu0 %v4671_v13 }
 0xcd9   : > { %v4673_v15 = vpop.xlane.xlu0 %4672 }
 0xcda   : > { %v4674_v16 = vmul.f32 0.03125, %v4673_v15 }
 0xcdc   : > { %v4675_v17 = vadd.f32 1e-05, %v4674_v16 }
 0xcde   : > { %5912 = vrsqrt.f32 %v4675_v17 }
 0xceb   : > { %v5913_v20 = vpop.eup %5912 }
 0xcec   : > { %v4677_v18 = vmul.f32 %v5913_v20, %v4669_v11 }
 0xcee   : > { %v4685_v29 = vmul.f32 %v5191_v21, %v4677_v18 }
 0xcf0   : > { %v4693_v22 = vadd.f32 %v5192_v28, %v4685_v29 }
 0xcf2   : > { %4694 = vst.msk [vmem:[%s1320_s28] sm:$0xff] %vm1347_vm1, %v4693_v22 }
 0xcf3   : > { %6528 = shalt.err (!%p6525_p8)
}
 0xcf4   : > { %s6529_s18 = scalar_lea.hbm %s4707_s4, 128  ;;  %s6533_s13 = scalar_lea.hbm %s7863_s26, 256 }
 0xcf5   : > { %p6530_p11 = scmp.ne.s32.totalorder %s4707_s4, %s6529_s18  ;;  %p6534_p4 = scmp.lt.s32.totalorder %s4707_s4, %s7863_s26 }
 0xcf6   : > { %p6535_p0 = scmp.lt.s32.totalorder %s6533_s13, %s6529_s18 }
 0xcf7   : > { %p6531_p7 = pnand %p6530_p11, %p7865_p5 }
 0xcf8   : > { %p6536_p2 = por %p6535_p0, %p6534_p4 }
 0xcf9   : > { %p6532_p1 = pneg %p6531_p7 }
 0xcfb   : > { %p6537_p3 = pnand %p6536_p2, %p6532_p1 }
 0xcfd   : > { %6540 = shalt.err (!%p6537_p3)
}
 0xcfe   : > { %5591 = dma.vmem_to_hbm [thread:$0]  (%p7865_p5), %s4710_s3, 128, %s4707_s4, %s4696_s5  }
 0xcff PF: > { %s4721_s8 = sand.u32 1, %s6611_s7   ;;  %p7866_p10 = scmp.ne.s32.totalorder %s7825_s12, 0 }
 0xd00   : > { %p7867_p12 = scmp.ge.s32.totalorder %s6623_s11, 2  ;;  %s4722_s9 = scalar_lea.sflag [#allocation4], %s4721_s8 }
 0xd02   : > { %p5665_p13 = pnand %p7867_p12, %p7866_p10 }
 0xd04   : > { %p5666_p6 = pneg %p5665_p13 }
 0xd06   : > { %6606 = dma.done.wait (%p5666_p6), %s4722_s9, 128  }
 0xd07   : > { %6608 = vsyncadd (%p5666_p6), %s4722_s9, 4294967168  ;;  %p91_p9 = scmp.ge.s32.totalorder %s7073_s16, 4   ;;  %s7868_s7 = smov %s6615_s10 }
 0xd08   : > { %s7869_s10 = smov %s6619_s0  ;;  %s7870_s0 = smov %s7084_s6 }
 0xd09   : > { %s7871_s11 = smov %s7073_s16  ;;  %93 = sbr.rel (!%p91_p9) target bundleno = 79 (0x4f), region = 324 }
 0xd0e   :  { %4727 = vsyncpa [#allocation3], 1 }
 0xd0f   :  { %4729 = vsyncpa [#allocation3 + $0x1], 1 }
 0xd10   :  { %4730 = vsyncpa [#allocation6], 1 }
 0xd11   :  { %4731 = vsyncpa [#allocation9], 1 }
 0xd12   :  { %4732 = vsyncpa [#allocation12], 1 }
 0xd13   :  { %4733 = vsyncpa [#allocation15], 1 }
 0xd14   :  { %4734 = vsyncpa [#allocation18], 1 }
 0xd15   :  { %4735 = vsyncpa [#allocation21], 1 }
 0xd16   :  { %4736 = vsyncpa [#allocation24], 1 }
 0xd17   :  { %4737 = vsyncpa [#allocation27], 1 }
 0xd18   :  { %4738 = vsyncpa [#allocation30], 1 }
 0xd19   :  { %4739 = vsyncpa [#allocation33], 1 }
 0xd1a   :  { %4740 = vsyncpa [#allocation36], 1 }
 0xd1b   :  { %4741 = vsyncpa [#allocation4], 1 }
 0xd1c   :  { %4743 = vsyncpa [#allocation4 + $0x1], 1 }

</bundles_post_ra>
